<compile_context>
chip_gen: v6e
topology: v6e:2x2x1
jax: 0.10.0
libtpu: 0.0.40
codegen_flags: <defaults>
</compile_context>

<pallas_src>
import jax
import jax.numpy as jnp
from jax.experimental import pallas as pl
from jax.experimental.pallas import tpu as pltpu

_COMPUTE_DTYPE = jnp.bfloat16  # matmul operand dtype (accumulation is f32)


def _pick_tile_h(H, W, pad):
    """Largest H tile that divides H, keeps the dilation halo inside the image,
    yields >= 2 tiles (second parallel grid axis), and keeps TH*W MXU-friendly."""
    cand = [th for th in range(1, H)
            if H % th == 0 and th >= max(pad, 1) and th + 2 * pad <= H]
    if not cand:
        return H
    good = [th for th in cand if th * W >= 128]
    return max(good) if good else max(cand)


def _vmem_limit_bytes():
    """Generation-aware scoped-VMEM limit (headroom on v7x, most of v5e/v6e)."""
    phys = 128 * 1024 * 1024
    try:
        phys = int(pltpu.get_tpu_info().vmem_capacity_bytes)
    except Exception:
        pass
    if phys <= 64 * 1024 * 1024:
        return 48 * 1024 * 1024          # v7x: leave headroom below 64 MiB
    return 100 * 1024 * 1024             # v5e/v6e: use most of 128 MiB


def _make_aspp_kernel(H, W, Cin, Cout, rates, pad, TH, n_h, pack_kx):
    n_rates = len(rates)
    cdt = _COMPUTE_DTYPE
    Wp = W + 2 * pad
    Hs = TH + 2 * pad          # scratch rows (tile + dilation halo)
    M = TH * W

    def kernel(x_ref, *args):
        # arg order (weights bf16, scale/bias f32):
        #   w0, s0, b0, wp0, [wr, sr, br, wpr]*n_rates,
        #   wpool, spool, bpool, wppool, sproj, bproj, out_ref, xpad_ref
        out_ref = args[-2]
        xpad_ref = args[-1]
        wargs = args[:-2]

        w0, s0, b0, wp0 = wargs[0], wargs[1], wargs[2], wargs[3]
        rate_args = [wargs[4 + 4 * i: 8 + 4 * i] for i in range(n_rates)]
        off = 4 + 4 * n_rates
        wpool, spool, bpool, wppool = (wargs[off], wargs[off + 1],
                                       wargs[off + 2], wargs[off + 3])
        sproj, bproj = wargs[off + 4], wargs[off + 5]

        h = pl.program_id(1)

        # ---- stage this tile's halo'ed window in bf16 scratch ---------------
        # zero only the halo ring; interior is one cast copy from x_ref.
        if pad > 0:
            zcol = jnp.zeros((Hs, pad, Cin), dtype=cdt)
            xpad_ref[:, 0:pad, :] = zcol
            xpad_ref[:, pad + W:Wp, :] = zcol
        if n_h == 1:
            if pad > 0:
                zrow = jnp.zeros((pad, Wp, Cin), dtype=cdt)
                xpad_ref[0:pad, :, :] = zrow
                xpad_ref[pad + H:Hs, :, :] = zrow
            xpad_ref[pad:pad + H, pad:pad + W, :] = x_ref[...].astype(cdt)
        else:
            @pl.when(h == 0)
            def _():
                if pad > 0:
                    xpad_ref[0:pad, :, :] = jnp.zeros((pad, Wp, Cin), dtype=cdt)
                xpad_ref[pad:Hs, pad:pad + W, :] = (
                    x_ref[0:TH + pad, :, :].astype(cdt))

            if n_h > 2:
                @pl.when(jnp.logical_and(h > 0, h < n_h - 1))
                def _():
                    xpad_ref[:, pad:pad + W, :] = (
                        x_ref[pl.ds(h * TH - pad, Hs), :, :].astype(cdt))

            @pl.when(h == n_h - 1)
            def _():
                if pad > 0:
                    xpad_ref[TH + pad:Hs, :, :] = (
                        jnp.zeros((pad, Wp, Cin), dtype=cdt))
                xpad_ref[0:TH + pad, pad:pad + W, :] = (
                    x_ref[H - TH - pad:H, :, :].astype(cdt))

        def bn_relu(y, s_ref, b_ref):
            return jnp.maximum(y * s_ref[...] + b_ref[...], 0.0)

        # ---- branch 0: 1x1 conv + BN + ReLU, projected immediately ----------
        xb0 = xpad_ref[pad:pad + TH, pad:pad + W, :].reshape(M, Cin)   # bf16
        y0 = jnp.dot(xb0, w0[...], preferred_element_type=jnp.float32)
        acc = jnp.dot(bn_relu(y0, s0, b0).astype(cdt), wp0[...],
                      preferred_element_type=jnp.float32)              # (M, Cout)

        # ---- dilated 3x3 branches, each projected then dropped --------------
        for r, (wr, sr, br, wpr) in zip(rates, rate_args):
            acc_b = None
            for ky in range(3):
                ys = pad + (ky - 1) * r
                if pack_kx:
                    # im2col the 3 kx taps into one K=3*Cin matmul (small Cin)
                    patch = jnp.concatenate(
                        [xpad_ref[ys:ys + TH,
                                  pad + (kx - 1) * r: pad + (kx - 1) * r + W,
                                  :].reshape(M, Cin) for kx in range(3)],
                        axis=-1)
                    term = jnp.dot(patch, wr[ky],
                                   preferred_element_type=jnp.float32)
                    acc_b = term if acc_b is None else acc_b + term
                else:
                    for kx in range(3):
                        xs = pad + (kx - 1) * r
                        patch = xpad_ref[ys:ys + TH, xs:xs + W, :].reshape(M, Cin)
                        term = jnp.dot(patch, wr[ky * 3 + kx],
                                       preferred_element_type=jnp.float32)
                        acc_b = term if acc_b is None else acc_b + term
            bo = bn_relu(acc_b, sr, br)
            acc = acc + jnp.dot(bo.astype(cdt), wpr[...],
                                preferred_element_type=jnp.float32)

        # ---- pooled branch, folded into the projection bias -----------------
        # TODO(synk): at production sizes compute the global mean in the wrapper.
        xmean = jnp.mean(x_ref[...].reshape(H * W, Cin), axis=0, keepdims=True)
        p = bn_relu(jnp.dot(xmean.astype(cdt), wpool[...],
                            preferred_element_type=jnp.float32), spool, bpool)
        bias_eff = bproj[...] + sproj[...] * jnp.dot(
            p.astype(cdt), wppool[...], preferred_element_type=jnp.float32)

        # ---- projection BN + ReLU (Dropout(0.5) is identity in eval mode) ---
        out = jnp.maximum(acc * sproj[...] + bias_eff, 0.0)
        out_ref[...] = out.reshape(TH, W, Cout).astype(out_ref.dtype)

    return kernel


def aspp_forward(x_nchw, params, rates, out_dtype=jnp.float32):
    N, Cin, H, W = x_nchw.shape
    Cout = params['w0'].shape[1]
    rates = tuple(rates)
    pad = max(rates) if rates else 0
    cdt = _COMPUTE_DTYPE
    nb = 2 + len(rates)

    TH = _pick_tile_h(H, W, pad)
    n_h = H // TH
    Wp = W + 2 * pad
    pack_kx = bool(rates) and (3 * Cin <= 128)   # skip at production Cin

    x_nhwc = jnp.transpose(x_nchw, (0, 2, 3, 1))
    wproj = params['wproj']

    def proj_slice(bi):
        return wproj[bi * Cout:(bi + 1) * Cout, :].astype(cdt)

    # flatten parameters into kernel argument order (weights pre-cast to bf16,
    # BN scale/bias kept f32).
    args = [params['w0'].astype(cdt), params['s0'], params['b0'], proj_slice(0)]
    for i in range(len(rates)):
        w = params['w_rate'][i]
        if pack_kx:
            wr = w.reshape(3, 3 * Cin, Cout).astype(cdt)   # (ky, kx*Cin, Cout)
        else:
            wr = w.reshape(9, Cin, Cout).astype(cdt)
        args += [wr, params['s_rate'][i], params['b_rate'][i], proj_slice(1 + i)]
    args += [params['wpool'].astype(cdt), params['spool'], params['bpool'],
             proj_slice(nb - 1), params['sproj'], params['bproj']]

    def full_spec(a):
        nd = a.ndim
        return pl.BlockSpec(a.shape, lambda n, h, _nd=nd: (0,) * _nd)

    in_specs = [pl.BlockSpec((None, H, W, Cin), lambda n, h: (n, 0, 0, 0))]
    in_specs += [full_spec(a) for a in args]

    kernel = _make_aspp_kernel(H, W, Cin, Cout, rates, pad, TH, n_h, pack_kx)
    out_nhwc = pl.pallas_call(
        kernel,
        out_shape=jax.ShapeDtypeStruct((N, H, W, Cout), out_dtype),
        grid=(N, n_h),
        in_specs=in_specs,
        out_specs=pl.BlockSpec((None, TH, W, Cout), lambda n, h: (n, h, 0, 0)),
        scratch_shapes=[pltpu.VMEM((TH + 2 * pad, Wp, Cin), cdt)],
        compiler_params=pltpu.CompilerParams(
            dimension_semantics=("parallel", "parallel"),
            vmem_limit_bytes=_vmem_limit_bytes()),
    )(x_nhwc, *args)
    return jnp.transpose(out_nhwc, (0, 3, 1, 2))


def init_params(key, Cin, Cout, rates):
    eps = 1e-5
    keys = iter(jax.random.split(key, 64))

    def bn_fold(k):
        k1, k2, k3, k4 = jax.random.split(k, 4)
        gamma = jax.random.uniform(k1, (Cout,), jnp.float32, 0.5, 1.5)
        beta = 0.1 * jax.random.normal(k2, (Cout,), jnp.float32)
        rmean = 0.1 * jax.random.normal(k3, (Cout,), jnp.float32)
        rvar = jax.random.uniform(k4, (Cout,), jnp.float32, 0.5, 1.5)
        scale = gamma / jnp.sqrt(rvar + eps)
        bias = beta - rmean * scale
        return scale.reshape(1, Cout), bias.reshape(1, Cout)

    p = {}
    p['w0'] = 0.1 * jax.random.normal(next(keys), (Cin, Cout), jnp.float32)
    p['s0'], p['b0'] = bn_fold(next(keys))
    p['w_rate'], p['s_rate'], p['b_rate'] = [], [], []
    for _ in rates:
        p['w_rate'].append(
            0.1 * jax.random.normal(next(keys), (3, 3, Cin, Cout), jnp.float32))
        s, b = bn_fold(next(keys))
        p['s_rate'].append(s)
        p['b_rate'].append(b)
    p['wpool'] = 0.1 * jax.random.normal(next(keys), (Cin, Cout), jnp.float32)
    p['spool'], p['bpool'] = bn_fold(next(keys))
    nb = 2 + len(rates)
    p['wproj'] = 0.1 * jax.random.normal(next(keys), (nb * Cout, Cout), jnp.float32)
    p['sproj'], p['bproj'] = bn_fold(next(keys))
    return p


def aspp_reference(x_nchw, params, rates, compute_dtype=None):
    """Pure-JAX reference (inference-mode ASPP), NCHW in / NCHW out.

    compute_dtype=None      -> f32 HIGHEST precision (original module math).
    compute_dtype=bfloat16  -> matmul/conv operands rounded to bf16 with f32
                               accumulation (mirrors the kernel's MXU usage).
    """
    x = jnp.transpose(x_nchw, (0, 2, 3, 1))
    hp = jax.lax.Precision.HIGHEST

    if compute_dtype is None:
        def cast(a):
            return a
    else:
        def cast(a):
            return a.astype(compute_dtype)

    def mm(a, w):
        return jnp.einsum('nhwc,cf->nhwf', cast(a), cast(w), precision=hp,
                          preferred_element_type=jnp.float32)

    def bn_relu(y, s, b):
        return jnp.maximum(y * s + b, 0.0)

    outs = [bn_relu(mm(x, params['w0']), params['s0'], params['b0'])]
    for i, r in enumerate(rates):
        y = jax.lax.conv_general_dilated(
            cast(x), cast(params['w_rate'][i]), window_strides=(1, 1),
            padding=((r, r), (r, r)), rhs_dilation=(r, r),
            dimension_numbers=('NHWC', 'HWIO', 'NHWC'), precision=hp,
            preferred_element_type=jnp.float32)
        outs.append(bn_relu(y, params['s_rate'][i], params['b_rate'][i]))
    xm = jnp.mean(x, axis=(1, 2), keepdims=True)
    p = bn_relu(mm(xm, params['wpool']), params['spool'], params['bpool'])
    outs.append(jnp.broadcast_to(p, outs[0].shape))
    cat = jnp.concatenate(outs, axis=-1)
    y = mm(cat, params['wproj'])
    y = jnp.maximum(y * params['sproj'] + params['bproj'], 0.0)
    return jnp.transpose(y, (0, 3, 1, 2))


if __name__ == "__main__":
    key = jax.random.PRNGKey(0)
    N, Cin, H, W = 2, 4, 16, 16
    Cout = 8
    rates = (1, 2)

    kx, kp = jax.random.split(key)
    x = jax.random.normal(kx, (N, Cin, H, W), jnp.float32)
    params = init_params(kp, Cin, Cout, rates)

    out = aspp_forward(x, params, rates)
    out = jax.block_until_ready(out)
    assert out.shape == (N, Cout, H, W)

    # Tight check vs a reference with matched (bf16-operand) matmul precision.
    ref_bf16 = aspp_reference(x, params, rates, compute_dtype=_COMPUTE_DTYPE)
    if not jnp.allclose(out, ref_bf16, atol=2e-3, rtol=2e-3):
        raise SystemExit("mismatch vs bf16-matched reference: max abs diff = "
                         f"{float(jnp.max(jnp.abs(out - ref_bf16)))}")

    # Sanity check vs the full-f32 reference (only bf16 operand rounding differs).
    ref_f32 = aspp_reference(x, params, rates)
    if not jnp.allclose(out, ref_f32, atol=1e-2, rtol=1e-2):
        raise SystemExit("mismatch vs f32 reference: max abs diff = "
                         f"{float(jnp.max(jnp.abs(out - ref_f32)))}")

    print("KERNEL_OK")
</pallas_src>

<mosaic_0001>
module attributes {stable_mosaic.version = 11 : i64} {
  func.func @kernel(%arg0: i32, %arg1: i32, %arg2: memref<1x16x16x4xf32, #tpu.memory_space<vmem>>, %arg3: memref<4x8xbf16, #tpu.memory_space<vmem>>, %arg4: memref<1x8xf32, #tpu.memory_space<vmem>>, %arg5: memref<1x8xf32, #tpu.memory_space<vmem>>, %arg6: memref<8x8xbf16, #tpu.memory_space<vmem>>, %arg7: memref<3x12x8xbf16, #tpu.memory_space<vmem>>, %arg8: memref<1x8xf32, #tpu.memory_space<vmem>>, %arg9: memref<1x8xf32, #tpu.memory_space<vmem>>, %arg10: memref<8x8xbf16, #tpu.memory_space<vmem>>, %arg11: memref<3x12x8xbf16, #tpu.memory_space<vmem>>, %arg12: memref<1x8xf32, #tpu.memory_space<vmem>>, %arg13: memref<1x8xf32, #tpu.memory_space<vmem>>, %arg14: memref<8x8xbf16, #tpu.memory_space<vmem>>, %arg15: memref<4x8xbf16, #tpu.memory_space<vmem>>, %arg16: memref<1x8xf32, #tpu.memory_space<vmem>>, %arg17: memref<1x8xf32, #tpu.memory_space<vmem>>, %arg18: memref<8x8xbf16, #tpu.memory_space<vmem>>, %arg19: memref<1x8xf32, #tpu.memory_space<vmem>>, %arg20: memref<1x8xf32, #tpu.memory_space<vmem>>, %arg21: memref<1x8x16x8xf32, #tpu.memory_space<vmem>>, %arg22: memref<12x20x4xbf16, #tpu.memory_space<vmem>>) attributes {dimension_semantics = [#tpu.dimension_semantics<parallel>, #tpu.dimension_semantics<parallel>], iteration_bounds = array<i64: 2, 2>, scalar_prefetch = 0 : i64, scratch_operands = 1 : i64, tpu.core_type = #tpu.core_type<tc>, window_params = [{transform_indices = @transform_0, window_bounds = array<i64: 1, 16, 16, 4>}, {pipeline_mode = #tpu.pipeline_mode<synchronous>, transform_indices = @transform_1, window_bounds = array<i64: 4, 8>}, {pipeline_mode = #tpu.pipeline_mode<synchronous>, transform_indices = @transform_2, window_bounds = array<i64: 1, 8>}, {pipeline_mode = #tpu.pipeline_mode<synchronous>, transform_indices = @transform_3, window_bounds = array<i64: 1, 8>}, {pipeline_mode = #tpu.pipeline_mode<synchronous>, transform_indices = @transform_4, window_bounds = array<i64: 8, 8>}, {pipeline_mode = #tpu.pipeline_mode<synchronous>, transform_indices = @transform_5, window_bounds = array<i64: 3, 12, 8>}, {pipeline_mode = #tpu.pipeline_mode<synchronous>, transform_indices = @transform_6, window_bounds = array<i64: 1, 8>}, {pipeline_mode = #tpu.pipeline_mode<synchronous>, transform_indices = @transform_7, window_bounds = array<i64: 1, 8>}, {pipeline_mode = #tpu.pipeline_mode<synchronous>, transform_indices = @transform_8, window_bounds = array<i64: 8, 8>}, {pipeline_mode = #tpu.pipeline_mode<synchronous>, transform_indices = @transform_9, window_bounds = array<i64: 3, 12, 8>}, {pipeline_mode = #tpu.pipeline_mode<synchronous>, transform_indices = @transform_10, window_bounds = array<i64: 1, 8>}, {pipeline_mode = #tpu.pipeline_mode<synchronous>, transform_indices = @transform_11, window_bounds = array<i64: 1, 8>}, {pipeline_mode = #tpu.pipeline_mode<synchronous>, transform_indices = @transform_12, window_bounds = array<i64: 8, 8>}, {pipeline_mode = #tpu.pipeline_mode<synchronous>, transform_indices = @transform_13, window_bounds = array<i64: 4, 8>}, {pipeline_mode = #tpu.pipeline_mode<synchronous>, transform_indices = @transform_14, window_bounds = array<i64: 1, 8>}, {pipeline_mode = #tpu.pipeline_mode<synchronous>, transform_indices = @transform_15, window_bounds = array<i64: 1, 8>}, {pipeline_mode = #tpu.pipeline_mode<synchronous>, transform_indices = @transform_16, window_bounds = array<i64: 8, 8>}, {pipeline_mode = #tpu.pipeline_mode<synchronous>, transform_indices = @transform_17, window_bounds = array<i64: 1, 8>}, {pipeline_mode = #tpu.pipeline_mode<synchronous>, transform_indices = @transform_18, window_bounds = array<i64: 1, 8>}, {transform_indices = @transform_19, window_bounds = array<i64: 1, 8, 16, 8>}]} {
    %cst = arith.constant 0.000000e+00 : bf16
    %0 = vector.broadcast %cst : bf16 to vector<12x2x4xbf16>
    %c0 = arith.constant 0 : index
    %c0_0 = arith.constant 0 : index
    %c0_1 = arith.constant 0 : index
    %1 = vector.load %arg22[%c0, %c0_0, %c0_1] : memref<12x20x4xbf16, #tpu.memory_space<vmem>>, vector<12x2x4xbf16>
    tpu.vector_store %arg22[%c0, %c0_0, %c0_1], %0 {strides = array<i32>} : memref<12x20x4xbf16, #tpu.memory_space<vmem>>, vector<12x2x4xbf16>,
    %c0_2 = arith.constant 0 : index
    %c18 = arith.constant 18 : index
    %c0_3 = arith.constant 0 : index
    %2 = vector.load %arg22[%c0_2, %c18, %c0_3] : memref<12x20x4xbf16, #tpu.memory_space<vmem>>, vector<12x2x4xbf16>
    tpu.vector_store %arg22[%c0_2, %c18, %c0_3], %0 {strides = array<i32>} : memref<12x20x4xbf16, #tpu.memory_space<vmem>>, vector<12x2x4xbf16>,
    %c0_i32 = arith.constant 0 : i32
    %3 = arith.cmpi eq, %arg1, %c0_i32 : i32
    %4 = arith.extui %3 : i1 to i32
    %c0_i32_4 = arith.constant 0 : i32
    %5 = arith.cmpi ne, %4, %c0_i32_4 : i32
    scf.if %5 {
      %cst_138 = arith.constant 0.000000e+00 : bf16
      %146 = vector.broadcast %cst_138 : bf16 to vector<2x20x4xbf16>
      %c0_139 = arith.constant 0 : index
      %c0_140 = arith.constant 0 : index
      %c0_141 = arith.constant 0 : index
      %147 = vector.load %arg22[%c0_139, %c0_140, %c0_141] : memref<12x20x4xbf16, #tpu.memory_space<vmem>>, vector<2x20x4xbf16>
      tpu.vector_store %arg22[%c0_139, %c0_140, %c0_141], %146 {strides = array<i32>} : memref<12x20x4xbf16, #tpu.memory_space<vmem>>, vector<2x20x4xbf16>,
      %c0_142 = arith.constant 0 : index
      %c0_143 = arith.constant 0 : index
      %c0_144 = arith.constant 0 : index
      %c0_145 = arith.constant 0 : index
      %148 = vector.load %arg2[%c0_142, %c0_143, %c0_144, %c0_145] : memref<1x16x16x4xf32, #tpu.memory_space<vmem>>, vector<1x10x16x4xf32>
      %149 = vector.shape_cast %148 : vector<1x10x16x4xf32> to vector<10x16x4xf32>
      %150 = arith.truncf %149 : vector<10x16x4xf32> to vector<10x16x4xbf16>
      %c2_146 = arith.constant 2 : index
      %c2_147 = arith.constant 2 : index
      %c0_148 = arith.constant 0 : index
      %151 = vector.load %arg22[%c2_146, %c2_147, %c0_148] : memref<12x20x4xbf16, #tpu.memory_space<vmem>>, vector<10x16x4xbf16>
      tpu.vector_store %arg22[%c2_146, %c2_147, %c0_148], %150 {strides = array<i32>} : memref<12x20x4xbf16, #tpu.memory_space<vmem>>, vector<10x16x4xbf16>,
    } else {
    }
    %c1_i32 = arith.constant 1 : i32
    %6 = arith.cmpi eq, %arg1, %c1_i32 : i32
    %7 = arith.extui %6 : i1 to i32
    %c0_i32_5 = arith.constant 0 : i32
    %8 = arith.cmpi ne, %7, %c0_i32_5 : i32
    scf.if %8 {
      %cst_138 = arith.constant 0.000000e+00 : bf16
      %146 = vector.broadcast %cst_138 : bf16 to vector<2x20x4xbf16>
      %c10 = arith.constant 10 : index
      %c0_139 = arith.constant 0 : index
      %c0_140 = arith.constant 0 : index
      %147 = vector.load %arg22[%c10, %c0_139, %c0_140] : memref<12x20x4xbf16, #tpu.memory_space<vmem>>, vector<2x20x4xbf16>
      tpu.vector_store %arg22[%c10, %c0_139, %c0_140], %146 {strides = array<i32>} : memref<12x20x4xbf16, #tpu.memory_space<vmem>>, vector<2x20x4xbf16>,
      %c0_141 = arith.constant 0 : index
      %c6 = arith.constant 6 : index
      %c0_142 = arith.constant 0 : index
      %c0_143 = arith.constant 0 : index
      %148 = vector.load %arg2[%c0_141, %c6, %c0_142, %c0_143] : memref<1x16x16x4xf32, #tpu.memory_space<vmem>>, vector<1x10x16x4xf32>
      %149 = vector.shape_cast %148 : vector<1x10x16x4xf32> to vector<10x16x4xf32>
      %150 = arith.truncf %149 : vector<10x16x4xf32> to vector<10x16x4xbf16>
      %c0_144 = arith.constant 0 : index
      %c2_145 = arith.constant 2 : index
      %c0_146 = arith.constant 0 : index
      %151 = vector.load %arg22[%c0_144, %c2_145, %c0_146] : memref<12x20x4xbf16, #tpu.memory_space<vmem>>, vector<10x16x4xbf16>
      tpu.vector_store %arg22[%c0_144, %c2_145, %c0_146], %150 {strides = array<i32>} : memref<12x20x4xbf16, #tpu.memory_space<vmem>>, vector<10x16x4xbf16>,
    } else {
    }
    %c2 = arith.constant 2 : index
    %c2_6 = arith.constant 2 : index
    %c0_7 = arith.constant 0 : index
    %9 = vector.load %arg22[%c2, %c2_6, %c0_7] : memref<12x20x4xbf16, #tpu.memory_space<vmem>>, vector<8x16x4xbf16>
    %10 = vector.shape_cast %9 : vector<8x16x4xbf16> to vector<128x4xbf16>
    %c0_8 = arith.constant 0 : index
    %c0_9 = arith.constant 0 : index
    %11 = vector.load %arg3[%c0_8, %c0_9] : memref<4x8xbf16, #tpu.memory_space<vmem>>, vector<4x8xbf16>
    %cst_10 = arith.constant dense<0.000000e+00> : vector<128x8xf32>
    %12 = tpu.matmul %10, %11, %cst_10 {dimension_numbers = #tpu.dot_dimension_numbers<[1], [0], [0], [1], [0, 0, 1, 1], [], []>} : vector<128x4xbf16>, vector<4x8xbf16>, vector<128x8xf32> -> vector<128x8xf32>
    %c0_11 = arith.constant 0 : index
    %c0_12 = arith.constant 0 : index
    %13 = vector.load %arg4[%c0_11, %c0_12] : memref<1x8xf32, #tpu.memory_space<vmem>>, vector<1x8xf32>
    %14 = vector.broadcast %13 : vector<1x8xf32> to vector<128x8xf32>
    %15 = arith.mulf %12, %14 : vector<128x8xf32>
    %c0_13 = arith.constant 0 : index
    %c0_14 = arith.constant 0 : index
    %16 = vector.load %arg5[%c0_13, %c0_14] : memref<1x8xf32, #tpu.memory_space<vmem>>, vector<1x8xf32>
    %17 = vector.broadcast %16 : vector<1x8xf32> to vector<128x8xf32>
    %18 = arith.addf %15, %17 : vector<128x8xf32>
    %cst_15 = arith.constant 0.000000e+00 : f32
    %19 = vector.broadcast %cst_15 : f32 to vector<128x8xf32>
    %20 = arith.maximumf %18, %19 : vector<128x8xf32>
    %21 = arith.truncf %20 : vector<128x8xf32> to vector<128x8xbf16>
    %c0_16 = arith.constant 0 : index
    %c0_17 = arith.constant 0 : index
    %22 = vector.load %arg6[%c0_16, %c0_17] : memref<8x8xbf16, #tpu.memory_space<vmem>>, vector<8x8xbf16>
    %cst_18 = arith.constant dense<0.000000e+00> : vector<128x8xf32>
    %23 = tpu.matmul %21, %22, %cst_18 {dimension_numbers = #tpu.dot_dimension_numbers<[1], [0], [0], [1], [0, 0, 1, 1], [], []>} : vector<128x8xbf16>, vector<8x8xbf16>, vector<128x8xf32> -> vector<128x8xf32>
    %c1 = arith.constant 1 : index
    %c1_19 = arith.constant 1 : index
    %c0_20 = arith.constant 0 : index
    %24 = vector.load %arg22[%c1, %c1_19, %c0_20] : memref<12x20x4xbf16, #tpu.memory_space<vmem>>, vector<8x16x4xbf16>
    %25 = vector.shape_cast %24 : vector<8x16x4xbf16> to vector<128x4xbf16>
    %c1_21 = arith.constant 1 : index
    %c2_22 = arith.constant 2 : index
    %c0_23 = arith.constant 0 : index
    %26 = vector.load %arg22[%c1_21, %c2_22, %c0_23] : memref<12x20x4xbf16, #tpu.memory_space<vmem>>, vector<8x16x4xbf16>
    %27 = vector.shape_cast %26 : vector<8x16x4xbf16> to vector<128x4xbf16>
    %c1_24 = arith.constant 1 : index
    %c3 = arith.constant 3 : index
    %c0_25 = arith.constant 0 : index
    %28 = vector.load %arg22[%c1_24, %c3, %c0_25] : memref<12x20x4xbf16, #tpu.memory_space<vmem>>, vector<8x16x4xbf16>
    %29 = vector.shape_cast %28 : vector<8x16x4xbf16> to vector<128x4xbf16>
    %30 = tpu.concatenate %25, %27, %29 in 1 : vector<128x4xbf16>, vector<128x4xbf16>, vector<128x4xbf16> -> vector<128x12xbf16>
    %c0_26 = arith.constant 0 : index
    %c0_27 = arith.constant 0 : index
    %c0_28 = arith.constant 0 : index
    %31 = vector.load %arg7[%c0_26, %c0_27, %c0_28] : memref<3x12x8xbf16, #tpu.memory_space<vmem>>, vector<1x12x8xbf16>
    %32 = vector.shape_cast %31 : vector<1x12x8xbf16> to vector<12x8xbf16>
    %cst_29 = arith.constant dense<0.000000e+00> : vector<128x8xf32>
    %33 = tpu.matmul %30, %32, %cst_29 {dimension_numbers = #tpu.dot_dimension_numbers<[1], [0], [0], [1], [0, 0, 1, 1], [], []>} : vector<128x12xbf16>, vector<12x8xbf16>, vector<128x8xf32> -> vector<128x8xf32>
    %c2_30 = arith.constant 2 : index
    %c1_31 = arith.constant 1 : index
    %c0_32 = arith.constant 0 : index
    %34 = vector.load %arg22[%c2_30, %c1_31, %c0_32] : memref<12x20x4xbf16, #tpu.memory_space<vmem>>, vector<8x16x4xbf16>
    %35 = vector.shape_cast %34 : vector<8x16x4xbf16> to vector<128x4xbf16>
    %c2_33 = arith.constant 2 : index
    %c2_34 = arith.constant 2 : index
    %c0_35 = arith.constant 0 : index
    %36 = vector.load %arg22[%c2_33, %c2_34, %c0_35] : memref<12x20x4xbf16, #tpu.memory_space<vmem>>, vector<8x16x4xbf16>
    %37 = vector.shape_cast %36 : vector<8x16x4xbf16> to vector<128x4xbf16>
    %c2_36 = arith.constant 2 : index
    %c3_37 = arith.constant 3 : index
    %c0_38 = arith.constant 0 : index
    %38 = vector.load %arg22[%c2_36, %c3_37, %c0_38] : memref<12x20x4xbf16, #tpu.memory_space<vmem>>, vector<8x16x4xbf16>
    %39 = vector.shape_cast %38 : vector<8x16x4xbf16> to vector<128x4xbf16>
    %40 = tpu.concatenate %35, %37, %39 in 1 : vector<128x4xbf16>, vector<128x4xbf16>, vector<128x4xbf16> -> vector<128x12xbf16>
    %c1_39 = arith.constant 1 : index
    %c0_40 = arith.constant 0 : index
    %c0_41 = arith.constant 0 : index
    %41 = vector.load %arg7[%c1_39, %c0_40, %c0_41] : memref<3x12x8xbf16, #tpu.memory_space<vmem>>, vector<1x12x8xbf16>
    %42 = vector.shape_cast %41 : vector<1x12x8xbf16> to vector<12x8xbf16>
    %cst_42 = arith.constant dense<0.000000e+00> : vector<128x8xf32>
    %43 = tpu.matmul %40, %42, %cst_42 {dimension_numbers = #tpu.dot_dimension_numbers<[1], [0], [0], [1], [0, 0, 1, 1], [], []>} : vector<128x12xbf16>, vector<12x8xbf16>, vector<128x8xf32> -> vector<128x8xf32>
    %44 = arith.addf %33, %43 : vector<128x8xf32>
    %c3_43 = arith.constant 3 : index
    %c1_44 = arith.constant 1 : index
    %c0_45 = arith.constant 0 : index
    %45 = vector.load %arg22[%c3_43, %c1_44, %c0_45] : memref<12x20x4xbf16, #tpu.memory_space<vmem>>, vector<8x16x4xbf16>
    %46 = vector.shape_cast %45 : vector<8x16x4xbf16> to vector<128x4xbf16>
    %c3_46 = arith.constant 3 : index
    %c2_47 = arith.constant 2 : index
    %c0_48 = arith.constant 0 : index
    %47 = vector.load %arg22[%c3_46, %c2_47, %c0_48] : memref<12x20x4xbf16, #tpu.memory_space<vmem>>, vector<8x16x4xbf16>
    %48 = vector.shape_cast %47 : vector<8x16x4xbf16> to vector<128x4xbf16>
    %c3_49 = arith.constant 3 : index
    %c3_50 = arith.constant 3 : index
    %c0_51 = arith.constant 0 : index
    %49 = vector.load %arg22[%c3_49, %c3_50, %c0_51] : memref<12x20x4xbf16, #tpu.memory_space<vmem>>, vector<8x16x4xbf16>
    %50 = vector.shape_cast %49 : vector<8x16x4xbf16> to vector<128x4xbf16>
    %51 = tpu.concatenate %46, %48, %50 in 1 : vector<128x4xbf16>, vector<128x4xbf16>, vector<128x4xbf16> -> vector<128x12xbf16>
    %c2_52 = arith.constant 2 : index
    %c0_53 = arith.constant 0 : index
    %c0_54 = arith.constant 0 : index
    %52 = vector.load %arg7[%c2_52, %c0_53, %c0_54] : memref<3x12x8xbf16, #tpu.memory_space<vmem>>, vector<1x12x8xbf16>
    %53 = vector.shape_cast %52 : vector<1x12x8xbf16> to vector<12x8xbf16>
    %cst_55 = arith.constant dense<0.000000e+00> : vector<128x8xf32>
    %54 = tpu.matmul %51, %53, %cst_55 {dimension_numbers = #tpu.dot_dimension_numbers<[1], [0], [0], [1], [0, 0, 1, 1], [], []>} : vector<128x12xbf16>, vector<12x8xbf16>, vector<128x8xf32> -> vector<128x8xf32>
    %55 = arith.addf %44, %54 : vector<128x8xf32>
    %c0_56 = arith.constant 0 : index
    %c0_57 = arith.constant 0 : index
    %56 = vector.load %arg8[%c0_56, %c0_57] : memref<1x8xf32, #tpu.memory_space<vmem>>, vector<1x8xf32>
    %57 = vector.broadcast %56 : vector<1x8xf32> to vector<128x8xf32>
    %58 = arith.mulf %55, %57 : vector<128x8xf32>
    %c0_58 = arith.constant 0 : index
    %c0_59 = arith.constant 0 : index
    %59 = vector.load %arg9[%c0_58, %c0_59] : memref<1x8xf32, #tpu.memory_space<vmem>>, vector<1x8xf32>
    %60 = vector.broadcast %59 : vector<1x8xf32> to vector<128x8xf32>
    %61 = arith.addf %58, %60 : vector<128x8xf32>
    %cst_60 = arith.constant 0.000000e+00 : f32
    %62 = vector.broadcast %cst_60 : f32 to vector<128x8xf32>
    %63 = arith.maximumf %61, %62 : vector<128x8xf32>
    %64 = arith.truncf %63 : vector<128x8xf32> to vector<128x8xbf16>
    %c0_61 = arith.constant 0 : index
    %c0_62 = arith.constant 0 : index
    %65 = vector.load %arg10[%c0_61, %c0_62] : memref<8x8xbf16, #tpu.memory_space<vmem>>, vector<8x8xbf16>
    %cst_63 = arith.constant dense<0.000000e+00> : vector<128x8xf32>
    %66 = tpu.matmul %64, %65, %cst_63 {dimension_numbers = #tpu.dot_dimension_numbers<[1], [0], [0], [1], [0, 0, 1, 1], [], []>} : vector<128x8xbf16>, vector<8x8xbf16>, vector<128x8xf32> -> vector<128x8xf32>
    %67 = arith.addf %23, %66 : vector<128x8xf32>
    %c0_64 = arith.constant 0 : index
    %c0_65 = arith.constant 0 : index
    %c0_66 = arith.constant 0 : index
    %68 = vector.load %arg22[%c0_64, %c0_65, %c0_66] : memref<12x20x4xbf16, #tpu.memory_space<vmem>>, vector<8x16x4xbf16>
    %69 = vector.shape_cast %68 : vector<8x16x4xbf16> to vector<128x4xbf16>
    %c0_67 = arith.constant 0 : index
    %c2_68 = arith.constant 2 : index
    %c0_69 = arith.constant 0 : index
    %70 = vector.load %arg22[%c0_67, %c2_68, %c0_69] : memref<12x20x4xbf16, #tpu.memory_space<vmem>>, vector<8x16x4xbf16>
    %71 = vector.shape_cast %70 : vector<8x16x4xbf16> to vector<128x4xbf16>
    %c0_70 = arith.constant 0 : index
    %c4 = arith.constant 4 : index
    %c0_71 = arith.constant 0 : index
    %72 = vector.load %arg22[%c0_70, %c4, %c0_71] : memref<12x20x4xbf16, #tpu.memory_space<vmem>>, vector<8x16x4xbf16>
    %73 = vector.shape_cast %72 : vector<8x16x4xbf16> to vector<128x4xbf16>
    %74 = tpu.concatenate %69, %71, %73 in 1 : vector<128x4xbf16>, vector<128x4xbf16>, vector<128x4xbf16> -> vector<128x12xbf16>
    %c0_72 = arith.constant 0 : index
    %c0_73 = arith.constant 0 : index
    %c0_74 = arith.constant 0 : index
    %75 = vector.load %arg11[%c0_72, %c0_73, %c0_74] : memref<3x12x8xbf16, #tpu.memory_space<vmem>>, vector<1x12x8xbf16>
    %76 = vector.shape_cast %75 : vector<1x12x8xbf16> to vector<12x8xbf16>
    %cst_75 = arith.constant dense<0.000000e+00> : vector<128x8xf32>
    %77 = tpu.matmul %74, %76, %cst_75 {dimension_numbers = #tpu.dot_dimension_numbers<[1], [0], [0], [1], [0, 0, 1, 1], [], []>} : vector<128x12xbf16>, vector<12x8xbf16>, vector<128x8xf32> -> vector<128x8xf32>
    %c2_76 = arith.constant 2 : index
    %c0_77 = arith.constant 0 : index
    %c0_78 = arith.constant 0 : index
    %78 = vector.load %arg22[%c2_76, %c0_77, %c0_78] : memref<12x20x4xbf16, #tpu.memory_space<vmem>>, vector<8x16x4xbf16>
    %79 = vector.shape_cast %78 : vector<8x16x4xbf16> to vector<128x4xbf16>
    %c2_79 = arith.constant 2 : index
    %c2_80 = arith.constant 2 : index
    %c0_81 = arith.constant 0 : index
    %80 = vector.load %arg22[%c2_79, %c2_80, %c0_81] : memref<12x20x4xbf16, #tpu.memory_space<vmem>>, vector<8x16x4xbf16>
    %81 = vector.shape_cast %80 : vector<8x16x4xbf16> to vector<128x4xbf16>
    %c2_82 = arith.constant 2 : index
    %c4_83 = arith.constant 4 : index
    %c0_84 = arith.constant 0 : index
    %82 = vector.load %arg22[%c2_82, %c4_83, %c0_84] : memref<12x20x4xbf16, #tpu.memory_space<vmem>>, vector<8x16x4xbf16>
    %83 = vector.shape_cast %82 : vector<8x16x4xbf16> to vector<128x4xbf16>
    %84 = tpu.concatenate %79, %81, %83 in 1 : vector<128x4xbf16>, vector<128x4xbf16>, vector<128x4xbf16> -> vector<128x12xbf16>
    %c1_85 = arith.constant 1 : index
    %c0_86 = arith.constant 0 : index
    %c0_87 = arith.constant 0 : index
    %85 = vector.load %arg11[%c1_85, %c0_86, %c0_87] : memref<3x12x8xbf16, #tpu.memory_space<vmem>>, vector<1x12x8xbf16>
    %86 = vector.shape_cast %85 : vector<1x12x8xbf16> to vector<12x8xbf16>
    %cst_88 = arith.constant dense<0.000000e+00> : vector<128x8xf32>
    %87 = tpu.matmul %84, %86, %cst_88 {dimension_numbers = #tpu.dot_dimension_numbers<[1], [0], [0], [1], [0, 0, 1, 1], [], []>} : vector<128x12xbf16>, vector<12x8xbf16>, vector<128x8xf32> -> vector<128x8xf32>
    %88 = arith.addf %77, %87 : vector<128x8xf32>
    %c4_89 = arith.constant 4 : index
    %c0_90 = arith.constant 0 : index
    %c0_91 = arith.constant 0 : index
    %89 = vector.load %arg22[%c4_89, %c0_90, %c0_91] : memref<12x20x4xbf16, #tpu.memory_space<vmem>>, vector<8x16x4xbf16>
    %90 = vector.shape_cast %89 : vector<8x16x4xbf16> to vector<128x4xbf16>
    %c4_92 = arith.constant 4 : index
    %c2_93 = arith.constant 2 : index
    %c0_94 = arith.constant 0 : index
    %91 = vector.load %arg22[%c4_92, %c2_93, %c0_94] : memref<12x20x4xbf16, #tpu.memory_space<vmem>>, vector<8x16x4xbf16>
    %92 = vector.shape_cast %91 : vector<8x16x4xbf16> to vector<128x4xbf16>
    %c4_95 = arith.constant 4 : index
    %c4_96 = arith.constant 4 : index
    %c0_97 = arith.constant 0 : index
    %93 = vector.load %arg22[%c4_95, %c4_96, %c0_97] : memref<12x20x4xbf16, #tpu.memory_space<vmem>>, vector<8x16x4xbf16>
    %94 = vector.shape_cast %93 : vector<8x16x4xbf16> to vector<128x4xbf16>
    %95 = tpu.concatenate %90, %92, %94 in 1 : vector<128x4xbf16>, vector<128x4xbf16>, vector<128x4xbf16> -> vector<128x12xbf16>
    %c2_98 = arith.constant 2 : index
    %c0_99 = arith.constant 0 : index
    %c0_100 = arith.constant 0 : index
    %96 = vector.load %arg11[%c2_98, %c0_99, %c0_100] : memref<3x12x8xbf16, #tpu.memory_space<vmem>>, vector<1x12x8xbf16>
    %97 = vector.shape_cast %96 : vector<1x12x8xbf16> to vector<12x8xbf16>
    %cst_101 = arith.constant dense<0.000000e+00> : vector<128x8xf32>
    %98 = tpu.matmul %95, %97, %cst_101 {dimension_numbers = #tpu.dot_dimension_numbers<[1], [0], [0], [1], [0, 0, 1, 1], [], []>} : vector<128x12xbf16>, vector<12x8xbf16>, vector<128x8xf32> -> vector<128x8xf32>
    %99 = arith.addf %88, %98 : vector<128x8xf32>
    %c0_102 = arith.constant 0 : index
    %c0_103 = arith.constant 0 : index
    %100 = vector.load %arg12[%c0_102, %c0_103] : memref<1x8xf32, #tpu.memory_space<vmem>>, vector<1x8xf32>
    %101 = vector.broadcast %100 : vector<1x8xf32> to vector<128x8xf32>
    %102 = arith.mulf %99, %101 : vector<128x8xf32>
    %c0_104 = arith.constant 0 : index
    %c0_105 = arith.constant 0 : index
    %103 = vector.load %arg13[%c0_104, %c0_105] : memref<1x8xf32, #tpu.memory_space<vmem>>, vector<1x8xf32>
    %104 = vector.broadcast %103 : vector<1x8xf32> to vector<128x8xf32>
    %105 = arith.addf %102, %104 : vector<128x8xf32>
    %cst_106 = arith.constant 0.000000e+00 : f32
    %106 = vector.broadcast %cst_106 : f32 to vector<128x8xf32>
    %107 = arith.maximumf %105, %106 : vector<128x8xf32>
    %108 = arith.truncf %107 : vector<128x8xf32> to vector<128x8xbf16>
    %c0_107 = arith.constant 0 : index
    %c0_108 = arith.constant 0 : index
    %109 = vector.load %arg14[%c0_107, %c0_108] : memref<8x8xbf16, #tpu.memory_space<vmem>>, vector<8x8xbf16>
    %cst_109 = arith.constant dense<0.000000e+00> : vector<128x8xf32>
    %110 = tpu.matmul %108, %109, %cst_109 {dimension_numbers = #tpu.dot_dimension_numbers<[1], [0], [0], [1], [0, 0, 1, 1], [], []>} : vector<128x8xbf16>, vector<8x8xbf16>, vector<128x8xf32> -> vector<128x8xf32>
    %111 = arith.addf %67, %110 : vector<128x8xf32>
    %c0_110 = arith.constant 0 : index
    %c0_111 = arith.constant 0 : index
    %c0_112 = arith.constant 0 : index
    %c0_113 = arith.constant 0 : index
    %112 = vector.load %arg2[%c0_110, %c0_111, %c0_112, %c0_113] : memref<1x16x16x4xf32, #tpu.memory_space<vmem>>, vector<1x16x16x4xf32>
    %113 = vector.shape_cast %112 : vector<1x16x16x4xf32> to vector<16x16x4xf32>
    %114 = vector.shape_cast %113 : vector<16x16x4xf32> to vector<256x4xf32>
    %cst_114 = arith.constant dense<0.000000e+00> : vector<4xf32>
    %115 = vector.multi_reduction <add>, %114, %cst_114 [0] : vector<256x4xf32> to vector<4xf32>
    %116 = vector.shape_cast %115 : vector<4xf32> to vector<1x4xf32>
    %cst_115 = arith.constant 2.560000e+02 : f32
    %117 = vector.broadcast %cst_115 : f32 to vector<1x4xf32>
    %118 = arith.divf %116, %117 : vector<1x4xf32>
    %119 = arith.truncf %118 : vector<1x4xf32> to vector<1x4xbf16>
    %c0_116 = arith.constant 0 : index
    %c0_117 = arith.constant 0 : index
    %120 = vector.load %arg15[%c0_116, %c0_117] : memref<4x8xbf16, #tpu.memory_space<vmem>>, vector<4x8xbf16>
    %cst_118 = arith.constant dense<0.000000e+00> : vector<1x8xf32>
    %121 = tpu.matmul %119, %120, %cst_118 {dimension_numbers = #tpu.dot_dimension_numbers<[1], [0], [0], [1], [0, 0, 1, 1], [], []>} : vector<1x4xbf16>, vector<4x8xbf16>, vector<1x8xf32> -> vector<1x8xf32>
    %c0_119 = arith.constant 0 : index
    %c0_120 = arith.constant 0 : index
    %122 = vector.load %arg16[%c0_119, %c0_120] : memref<1x8xf32, #tpu.memory_space<vmem>>, vector<1x8xf32>
    %123 = arith.mulf %121, %122 : vector<1x8xf32>
    %c0_121 = arith.constant 0 : index
    %c0_122 = arith.constant 0 : index
    %124 = vector.load %arg17[%c0_121, %c0_122] : memref<1x8xf32, #tpu.memory_space<vmem>>, vector<1x8xf32>
    %125 = arith.addf %123, %124 : vector<1x8xf32>
    %cst_123 = arith.constant 0.000000e+00 : f32
    %126 = vector.broadcast %cst_123 : f32 to vector<1x8xf32>
    %127 = arith.maximumf %125, %126 : vector<1x8xf32>
    %c0_124 = arith.constant 0 : index
    %c0_125 = arith.constant 0 : index
    %128 = vector.load %arg20[%c0_124, %c0_125] : memref<1x8xf32, #tpu.memory_space<vmem>>, vector<1x8xf32>
    %c0_126 = arith.constant 0 : index
    %c0_127 = arith.constant 0 : index
    %129 = vector.load %arg19[%c0_126, %c0_127] : memref<1x8xf32, #tpu.memory_space<vmem>>, vector<1x8xf32>
    %130 = arith.truncf %127 : vector<1x8xf32> to vector<1x8xbf16>
    %c0_128 = arith.constant 0 : index
    %c0_129 = arith.constant 0 : index
    %131 = vector.load %arg18[%c0_128, %c0_129] : memref<8x8xbf16, #tpu.memory_space<vmem>>, vector<8x8xbf16>
    %cst_130 = arith.constant dense<0.000000e+00> : vector<1x8xf32>
    %132 = tpu.matmul %130, %131, %cst_130 {dimension_numbers = #tpu.dot_dimension_numbers<[1], [0], [0], [1], [0, 0, 1, 1], [], []>} : vector<1x8xbf16>, vector<8x8xbf16>, vector<1x8xf32> -> vector<1x8xf32>
    %133 = arith.mulf %129, %132 : vector<1x8xf32>
    %134 = arith.addf %128, %133 : vector<1x8xf32>
    %c0_131 = arith.constant 0 : index
    %c0_132 = arith.constant 0 : index
    %135 = vector.load %arg19[%c0_131, %c0_132] : memref<1x8xf32, #tpu.memory_space<vmem>>, vector<1x8xf32>
    %136 = vector.broadcast %135 : vector<1x8xf32> to vector<128x8xf32>
    %137 = arith.mulf %111, %136 : vector<128x8xf32>
    %138 = vector.broadcast %134 : vector<1x8xf32> to vector<128x8xf32>
    %139 = arith.addf %137, %138 : vector<128x8xf32>
    %cst_133 = arith.constant 0.000000e+00 : f32
    %140 = vector.broadcast %cst_133 : f32 to vector<128x8xf32>
    %141 = arith.maximumf %139, %140 : vector<128x8xf32>
    %142 = vector.shape_cast %141 : vector<128x8xf32> to vector<8x16x8xf32>
    %c0_134 = arith.constant 0 : index
    %c0_135 = arith.constant 0 : index
    %c0_136 = arith.constant 0 : index
    %c0_137 = arith.constant 0 : index
    %143 = vector.load %arg21[%c0_134, %c0_135, %c0_136, %c0_137] : memref<1x8x16x8xf32, #tpu.memory_space<vmem>>, vector<1x8x16x8xf32>
    %144 = vector.shape_cast %143 : vector<1x8x16x8xf32> to vector<8x16x8xf32>
    %145 = vector.shape_cast %142 : vector<8x16x8xf32> to vector<1x8x16x8xf32>
    tpu.vector_store %arg21[%c0_134, %c0_135, %c0_136, %c0_137], %145 {strides = array<i32>} : memref<1x8x16x8xf32, #tpu.memory_space<vmem>>, vector<1x8x16x8xf32>,
    return
  }
  func.func @transform_0(%arg0: i32, %arg1: i32) -> (i32, i32, i32, i32) {
    %c0_i32 = arith.constant 0 : i32
    %c0_i32_0 = arith.constant 0 : i32
    %c0_i32_1 = arith.constant 0 : i32
    %c0_i32_2 = arith.constant 0 : i32
    return %arg0, %c0_i32, %c0_i32_0, %c0_i32_1 : i32, i32, i32, i32
  }
  func.func @transform_1(%arg0: i32, %arg1: i32) -> (i32, i32) {
    %c0_i32 = arith.constant 0 : i32
    %c0_i32_0 = arith.constant 0 : i32
    %c0_i32_1 = arith.constant 0 : i32
    return %c0_i32, %c0_i32_0 : i32, i32
  }
  func.func @transform_2(%arg0: i32, %arg1: i32) -> (i32, i32) {
    %c0_i32 = arith.constant 0 : i32
    %c0_i32_0 = arith.constant 0 : i32
    %c0_i32_1 = arith.constant 0 : i32
    return %c0_i32, %c0_i32_0 : i32, i32
  }
  func.func @transform_3(%arg0: i32, %arg1: i32) -> (i32, i32) {
    %c0_i32 = arith.constant 0 : i32
    %c0_i32_0 = arith.constant 0 : i32
    %c0_i32_1 = arith.constant 0 : i32
    return %c0_i32, %c0_i32_0 : i32, i32
  }
  func.func @transform_4(%arg0: i32, %arg1: i32) -> (i32, i32) {
    %c0_i32 = arith.constant 0 : i32
    %c0_i32_0 = arith.constant 0 : i32
    %c0_i32_1 = arith.constant 0 : i32
    return %c0_i32, %c0_i32_0 : i32, i32
  }
  func.func @transform_5(%arg0: i32, %arg1: i32) -> (i32, i32, i32) {
    %c0_i32 = arith.constant 0 : i32
    %c0_i32_0 = arith.constant 0 : i32
    %c0_i32_1 = arith.constant 0 : i32
    %c0_i32_2 = arith.constant 0 : i32
    return %c0_i32, %c0_i32_0, %c0_i32_1 : i32, i32, i32
  }
  func.func @transform_6(%arg0: i32, %arg1: i32) -> (i32, i32) {
    %c0_i32 = arith.constant 0 : i32
    %c0_i32_0 = arith.constant 0 : i32
    %c0_i32_1 = arith.constant 0 : i32
    return %c0_i32, %c0_i32_0 : i32, i32
  }
  func.func @transform_7(%arg0: i32, %arg1: i32) -> (i32, i32) {
    %c0_i32 = arith.constant 0 : i32
    %c0_i32_0 = arith.constant 0 : i32
    %c0_i32_1 = arith.constant 0 : i32
    return %c0_i32, %c0_i32_0 : i32, i32
  }
  func.func @transform_8(%arg0: i32, %arg1: i32) -> (i32, i32) {
    %c0_i32 = arith.constant 0 : i32
    %c0_i32_0 = arith.constant 0 : i32
    %c0_i32_1 = arith.constant 0 : i32
    return %c0_i32, %c0_i32_0 : i32, i32
  }
  func.func @transform_9(%arg0: i32, %arg1: i32) -> (i32, i32, i32) {
    %c0_i32 = arith.constant 0 : i32
    %c0_i32_0 = arith.constant 0 : i32
    %c0_i32_1 = arith.constant 0 : i32
    %c0_i32_2 = arith.constant 0 : i32
    return %c0_i32, %c0_i32_0, %c0_i32_1 : i32, i32, i32
  }
  func.func @transform_10(%arg0: i32, %arg1: i32) -> (i32, i32) {
    %c0_i32 = arith.constant 0 : i32
    %c0_i32_0 = arith.constant 0 : i32
    %c0_i32_1 = arith.constant 0 : i32
    return %c0_i32, %c0_i32_0 : i32, i32
  }
  func.func @transform_11(%arg0: i32, %arg1: i32) -> (i32, i32) {
    %c0_i32 = arith.constant 0 : i32
    %c0_i32_0 = arith.constant 0 : i32
    %c0_i32_1 = arith.constant 0 : i32
    return %c0_i32, %c0_i32_0 : i32, i32
  }
  func.func @transform_12(%arg0: i32, %arg1: i32) -> (i32, i32) {
    %c0_i32 = arith.constant 0 : i32
    %c0_i32_0 = arith.constant 0 : i32
    %c0_i32_1 = arith.constant 0 : i32
    return %c0_i32, %c0_i32_0 : i32, i32
  }
  func.func @transform_13(%arg0: i32, %arg1: i32) -> (i32, i32) {
    %c0_i32 = arith.constant 0 : i32
    %c0_i32_0 = arith.constant 0 : i32
    %c0_i32_1 = arith.constant 0 : i32
    return %c0_i32, %c0_i32_0 : i32, i32
  }
  func.func @transform_14(%arg0: i32, %arg1: i32) -> (i32, i32) {
    %c0_i32 = arith.constant 0 : i32
    %c0_i32_0 = arith.constant 0 : i32
    %c0_i32_1 = arith.constant 0 : i32
    return %c0_i32, %c0_i32_0 : i32, i32
  }
  func.func @transform_15(%arg0: i32, %arg1: i32) -> (i32, i32) {
    %c0_i32 = arith.constant 0 : i32
    %c0_i32_0 = arith.constant 0 : i32
    %c0_i32_1 = arith.constant 0 : i32
    return %c0_i32, %c0_i32_0 : i32, i32
  }
  func.func @transform_16(%arg0: i32, %arg1: i32) -> (i32, i32) {
    %c0_i32 = arith.constant 0 : i32
    %c0_i32_0 = arith.constant 0 : i32
    %c0_i32_1 = arith.constant 0 : i32
    return %c0_i32, %c0_i32_0 : i32, i32
  }
  func.func @transform_17(%arg0: i32, %arg1: i32) -> (i32, i32) {
    %c0_i32 = arith.constant 0 : i32
    %c0_i32_0 = arith.constant 0 : i32
    %c0_i32_1 = arith.constant 0 : i32
    return %c0_i32, %c0_i32_0 : i32, i32
  }
  func.func @transform_18(%arg0: i32, %arg1: i32) -> (i32, i32) {
    %c0_i32 = arith.constant 0 : i32
    %c0_i32_0 = arith.constant 0 : i32
    %c0_i32_1 = arith.constant 0 : i32
    return %c0_i32, %c0_i32_0 : i32, i32
  }
  func.func @transform_19(%arg0: i32, %arg1: i32) -> (i32, i32, i32, i32) {
    %c0_i32 = arith.constant 0 : i32
    %c0_i32_0 = arith.constant 0 : i32
    %c0_i32_1 = arith.constant 0 : i32
    return %arg0, %arg1, %c0_i32, %c0_i32_0 : i32, i32, i32, i32
  }
}

</mosaic_0001>

<bundles_post_ra>
// kernel: tpu_custom_call.1
= control target key start
LH: loop header
LB: loop body
LE: loop exit
PB: predicated region body
PF: predicated region fallthrough
CT: control target
= control target key end

     0   :  { %s6756_s30 = smov 0   ;;  %s6758_s20 = smov 0   ;;  %s8963_s0 = inlined_call_operand.vmem [shape: f32[2,16,16,4], index: 0, kind: input, shape index: {}]   ;;  %s8964_s1 = inlined_call_operand.vmem [shape: bf16[4,8], index: 1, kind: input, shape index: {}]   ;;  %s8965_s2 = inlined_call_operand.vmem [shape: f32[1,8], index: 2, kind: input, shape index: {}]   ;;  %s8966_s3 = inlined_call_operand.vmem [shape: f32[1,8], index: 3, kind: input, shape index: {}]   ;;  %s8967_s4 = inlined_call_operand.vmem [shape: bf16[8,8], index: 4, kind: input, shape index: {}]   ;;  %s8968_s5 = inlined_call_operand.vmem [shape: bf16[3,12,8], index: 5, kind: input, shape index: {}]   ;;  %s8969_s6 = inlined_call_operand.vmem [shape: f32[1,8], index: 6, kind: input, shape index: {}]   ;;  %s8970_s7 = inlined_call_operand.vmem [shape: f32[1,8], index: 7, kind: input, shape index: {}]   ;;  %s8971_s8 = inlined_call_operand.vmem [shape: bf16[8,8], index: 8, kind: input, shape index: {}]   ;;  %s8972_s9 = inlined_call_operand.vmem [shape: bf16[3,12,8], index: 9, kind: input, shape index: {}]   ;;  %s8973_s10 = inlined_call_operand.vmem [shape: f32[1,8], index: 10, kind: input, shape index: {}]   ;;  %s8974_s11 = inlined_call_operand.vmem [shape: f32[1,8], index: 11, kind: input, shape index: {}]   ;;  %s8975_s12 = inlined_call_operand.vmem [shape: bf16[8,8], index: 12, kind: input, shape index: {}]   ;;  %s8976_s13 = inlined_call_operand.vmem [shape: bf16[4,8], index: 13, kind: input, shape index: {}]   ;;  %s8977_s14 = inlined_call_operand.vmem [shape: f32[1,8], index: 14, kind: input, shape index: {}]   ;;  %s8978_s15 = inlined_call_operand.vmem [shape: f32[1,8], index: 15, kind: input, shape index: {}]   ;;  %s8979_s16 = inlined_call_operand.vmem [shape: bf16[8,8], index: 16, kind: input, shape index: {}]   ;;  %s8980_s17 = inlined_call_operand.vmem [shape: f32[1,8], index: 17, kind: input, shape index: {}]   ;;  %s8981_s18 = inlined_call_operand.vmem [shape: f32[1,8], index: 18, kind: input, shape index: {}]   ;;  %s8982_s19 = inlined_call_operand.vmem [shape: f32[2,16,16,8], index: 19, kind: output, shape index: {}]  }
   0x1   :  { %9077 = sst [smem:[#allocation38_spill]] %s8963_s0  ;;  %s6754_s0 = smov 0  }
   0x2   :  { %9078 = sst [smem:[#allocation39_spill]] %s8964_s1  ;;  %s6760_s21 = smov 0  }
   0x3   :  { %9079 = sst [smem:[#allocation40_spill]] %s8965_s2  ;;  %s6762_s1 = smov 0  }
   0x4   :  { %9080 = sst [smem:[#allocation41_spill]] %s8966_s3 }
   0x5   :  { %9081 = sst [smem:[#allocation42_spill]] %s8981_s18 }
   0x6 LB: > { %9082 = sst [smem:[#allocation3_spill]] %s6637_s20  ;;  %s38_s22 = sadd.s32 1, %s6637_s20  ;;  %s6645_s1 = sphi %s6762_s1, %s29_s1   ;;  %s6641_s21 = sphi %s6760_s21, %s9244_s21   ;;  %s6637_s20 = sphi %s6758_s20, %s9243_s20   ;;  %s6633_s30 = sphi %s6756_s30, %s9242_s30   ;;  %s6629_s0 = sphi %s6754_s0, %s9241_s0  }
   0x7   : > { %9083 = sst [smem:[#allocation4_spill]] %s6641_s21  ;;  %s41_s2 = sadd.s32 1, %s6641_s21 }
   0x8   : > { %9084 = sst [smem:[#allocation5_spill]] %s6645_s1  ;;  %p39_p0 = scmp.ge.s32.totalorder %s38_s22, 2 }
   0x9   : > { %p5802_p1 = scmp.ge.s32.totalorder %s6645_s1, 1  ;;  %p551_p2 = scmp.lt.s32.totalorder %s6645_s1, 5 }
   0xa   : > { %s9246_s22 = smov (%p39_p0, %s38_s22), 0  ;;  %s9248_s2 = smov (!%p39_p0, %s41_s2), %s6641_s21 }
   0xb   : > { %9085 = sst [smem:[#allocation6_spill]] %s9246_s22  ;;  %p552_p3 = pnand %p5802_p1, %p551_p2 }
   0xc   : > { %p43_p4 = scmp.ge.s32.totalorder %s9248_s2, 2 }
   0xd   : > { %555 = sbr.rel (%p552_p3) target bundleno = 1097 (0x449), region = 96 }
   0xe   : > { %s9250_s2 = smov (%p43_p4, %s9248_s2), 0 }
   0xf   : > { %9086 = sst [smem:[#allocation7_spill]] %s9250_s2 }
  0x12   : > { %p612_p5 = scmp.lt.s32.totalorder %s6633_s30, 1  ;;  %s5805_s23 = sshll.u32 %s6629_s0, 3  ;;  %vm629_vm0 = vcmask 24576   ;;  %vm642_vm1 = vcmask 25601   ;;  %v6647_v0 = vmov 0  }
  0x13   : > { %p6792_p6 = scmp.lt.s32.totalorder %s5805_s23, 15  ;;  %630 = vst.msk [vmem:[#allocation2] sm:$0x1] %vm629_vm0, %v6647_v0  ;;  %631 = vst.msk [vmem:[#allocation2 + $0xc] sm:$0x1] %vm629_vm0, %v6647_v0  ;;  %s9088_s28 = sld [smem:[#allocation38_spill]] }
  0x14   : > { %632 = vst.msk [vmem:[#allocation2 + $0x18] sm:$0x1] %vm629_vm0, %v6647_v0  ;;  %633 = vst.msk [vmem:[#allocation2 + $0x24] sm:$0x1] %vm629_vm0, %v6647_v0  ;;  %s9252_s30 = smov (!%p612_p5, %s6633_s30), 1  ;;  %p5809_p7 = scmp.ne.s32.totalorder %s6629_s0, 0 }
  0x15   : > { %634 = vst.msk [vmem:[#allocation2 + $0x30] sm:$0x1] %vm629_vm0, %v6647_v0  ;;  %635 = vst.msk [vmem:[#allocation2 + $0x3c] sm:$0x1] %vm629_vm0, %v6647_v0  ;;  %s9254_s23 = smov (!%p6792_p6, %s5805_s23), 15  ;;  %s6175_s25 = sshll.u32 %s9252_s30, 8 }
  0x16   : > { %636 = vst.msk [vmem:[#allocation2 + $0x48] sm:$0x1] %vm629_vm0, %v6647_v0  ;;  %637 = vst.msk [vmem:[#allocation2 + $0x54] sm:$0x1] %vm629_vm0, %v6647_v0  ;;  %s5807_s3 = sshll.u32 %s9252_s30, 5  ;;  %s5806_s2 = sshll.u32 %s9254_s23, 1 }
  0x17   : > { %638 = vst.msk [vmem:[#allocation2 + $0x60] sm:$0x1] %vm629_vm0, %v6647_v0  ;;  %639 = vst.msk [vmem:[#allocation2 + $0x6c] sm:$0x1] %vm629_vm0, %v6647_v0  ;;  %s624_s22 = sadd.s32 %s5807_s3, %s5806_s2 }
  0x18   : > { %640 = vst.msk [vmem:[#allocation2 + $0x78] sm:$0x1] %vm629_vm0, %v6647_v0  ;;  %641 = vst.msk [vmem:[#allocation2 + $0x84] sm:$0x1] %vm629_vm0, %v6647_v0  ;;  %s5808_s21 = sshll.u32 %s624_s22, 3 }
  0x19   : > { %643 = vst.msk [vmem:[#allocation2 + $0x8] sm:$0x2] %vm642_vm1, %v6647_v0  ;;  %644 = vst.msk [vmem:[#allocation2 + $0x14] sm:$0x2] %vm642_vm1, %v6647_v0  ;;  %s6830_s29 = scalar_lea.vmem %s9088_s28, %s6175_s25  ;;  %s6835_s18 = scalar_lea.vmem %s8982_s19, %s5808_s21 }
  0x1a   : > { %645 = vst.msk [vmem:[#allocation2 + $0x20] sm:$0x2] %vm642_vm1, %v6647_v0  ;;  %646 = vst.msk [vmem:[#allocation2 + $0x2c] sm:$0x2] %vm642_vm1, %v6647_v0  ;;  %658 = sbr.rel (%p5809_p7) target bundleno = 56 (0x38), region = 100 }
  0x1b   : > { %647 = vst.msk [vmem:[#allocation2 + $0x38] sm:$0x2] %vm642_vm1, %v6647_v0  ;;  %648 = vst.msk [vmem:[#allocation2 + $0x44] sm:$0x2] %vm642_vm1, %v6647_v0 }
  0x1c   : > { %649 = vst.msk [vmem:[#allocation2 + $0x50] sm:$0x2] %vm642_vm1, %v6647_v0  ;;  %650 = vst.msk [vmem:[#allocation2 + $0x5c] sm:$0x2] %vm642_vm1, %v6647_v0 }
  0x1d   : > { %651 = vst.msk [vmem:[#allocation2 + $0x68] sm:$0x2] %vm642_vm1, %v6647_v0  ;;  %652 = vst.msk [vmem:[#allocation2 + $0x74] sm:$0x2] %vm642_vm1, %v6647_v0 }
  0x1e   : > { %653 = vst.msk [vmem:[#allocation2 + $0x80] sm:$0x2] %vm642_vm1, %v6647_v0  ;;  %654 = vst.msk [vmem:[#allocation2 + $0x8c] sm:$0x2] %vm642_vm1, %v6647_v0 }
  0x1f   : > { %vm659_vm2 = vcmask 27648   ;;  %vm662_vm3 = vcmask 25600   ;;  %v667_v1 = vld [vmem:[%s6830_s29] sm:$0xff]  ;;  %v668_v2 = vld [vmem:[%s6830_s29 + $0x8] sm:$0xff]  ;;  %v6648_v3 = vmov 0   ;;  %vm747_vm4 = vcmask 1040384  }
  0x20   : > { %660 = vst.msk [vmem:[#allocation2] sm:$0xf] %vm659_vm2, %v6648_v3  ;;  %661 = vst.msk [vmem:[#allocation2 + $0x4] sm:$0xf] %vm659_vm2, %v6648_v3  ;;  %v6176_v4 = vpack.c.bf16 %v667_v1, %v667_v1  ;;  %v6177_v5 = vpack.c.bf16 %v668_v2, %v668_v2  ;;  %vm748_vm5 = vcmask 1044484   ;;  %v669_v6 = vld [vmem:[%s6830_s29 + $0x10] sm:$0xff] }
  0x21   : > { %664 = vst.msk [vmem:[#allocation2 + $0xc] sm:$0xf] %vm659_vm2, %v6648_v3  ;;  %665 = vst.msk [vmem:[#allocation2 + $0x10] sm:$0xf] %vm659_vm2, %v6648_v3  ;;  %v670_v7 = vld [vmem:[%s6830_s29 + $0x18] sm:$0xff]  ;;  %v671_v8 = vld [vmem:[%s6830_s29 + $0x20] sm:$0xff]  ;;  %v6178_v9 = vpack.c.bf16 %v669_v6, %v669_v6 }
  0x22   : > { %663 = vst.msk [vmem:[#allocation2 + $0x8] sm:$0x3] %vm662_vm3, %v6648_v3  ;;  %666 = vst.msk [vmem:[#allocation2 + $0x14] sm:$0x3] %vm662_vm3, %v6648_v3  ;;  %vm831_vm6 = vcmask 27649   ;;  %v6179_v10 = vpack.c.bf16 %v670_v7, %v670_v7  ;;  %v6180_v11 = vpack.c.bf16 %v671_v8, %v671_v8  ;;  %v672_v12 = vld [vmem:[%s6830_s29 + $0x28] sm:$0xff] }
  0x23   : > { %v673_v13 = vld [vmem:[%s6830_s29 + $0x30] sm:$0xff]  ;;  %v750_v14 = vrot.slane %v6176_v4, 7  ;;  %v752_v15 = vrot.slane %v6177_v5, 7  ;;  %v6181_v16 = vpack.c.bf16 %v672_v12, %v672_v12  ;;  %v674_v18 = vld [vmem:[%s6830_s29 + $0x38] sm:$0xff]  ;;  %vm6852_vm7 = vmor %vm747_vm4, %vm748_vm5  ;;  %v755_v20 = vrot.slane %v6178_v9, 7 }
  0x24   : > { %v6182_v17 = vpack.c.bf16 %v673_v13, %v673_v13  ;;  %v757_v21 = vrot.slane %v6179_v10, 7  ;;  %v760_v22 = vrot.slane %v6180_v11, 7  ;;  %v6183_v23 = vpack.c.bf16 %v674_v18, %v674_v18  ;;  %v675_v24 = vld [vmem:[%s6830_s29 + $0x40] sm:$0xff]  ;;  %v676_v29 = vld [vmem:[%s6830_s29 + $0x48] sm:$0xff]  ;;  %v677_v34 = vld [vmem:[%s6830_s29 + $0x50] sm:$0xff] }
  0x25   : > { %v751_v25 = vrot.slane %v750_v14, 4  ;;  %832 = vst.msk [vmem:[#allocation2 + $0x18] sm:$0xe] %vm831_vm6, %v750_v14  ;;  %v754_v26 = vrot.slane %v752_v15, 4  ;;  %v762_v27 = vrot.slane %v6181_v16, 7  ;;  %v756_v30 = vrot.slane %v755_v20, 4 }
  0x26   : > { %v765_v28 = vrot.slane %v6182_v17, 7  ;;  %835 = vst.msk [vmem:[#allocation2 + $0x24] sm:$0xe] %vm831_vm6, %v755_v20  ;;  %v759_v31 = vrot.slane %v757_v21, 4  ;;  %v761_v32 = vrot.slane %v760_v22, 4  ;;  %v767_v33 = vrot.slane %v6183_v23, 7 }
  0x27   : > { %838 = vst.msk [vmem:[#allocation2 + $0x30] sm:$0xe] %vm831_vm6, %v760_v22  ;;  %v678_v35 = vld [vmem:[%s6830_s29 + $0x58] sm:$0xff]  ;;  %v753_v36 = vsel %vm6852_vm7, %v751_v25, %v752_v15  ;;  %v764_v37 = vrot.slane %v762_v27, 4  ;;  %v6184_v39 = vpack.c.bf16 %v675_v24, %v675_v24  ;;  %v679_v40 = vld [vmem:[%s6830_s29 + $0x60] sm:$0xff]  ;;  %v680_v41 = vld [vmem:[%s6830_s29 + $0x68] sm:$0xff]  ;;  %v758_v43 = vsel %vm6852_vm7, %v756_v30, %v757_v21 }
  0x28   : > { %834 = vst.msk [vmem:[#allocation2 + $0x20] sm:$0x1] %vm629_vm0, %v754_v26  ;;  %v766_v38 = vrot.slane %v765_v28, 4  ;;  %v681_v42 = vld [vmem:[%s6830_s29 + $0x70] sm:$0xff]  ;;  %837 = vst.msk [vmem:[#allocation2 + $0x2c] sm:$0x1] %vm629_vm0, %v759_v31  ;;  %v763_v44 = vsel %vm6852_vm7, %v761_v32, %v762_v27  ;;  %v6185_v46 = vpack.c.bf16 %v676_v29, %v676_v29  ;;  %v6186_v50 = vpack.c.bf16 %v677_v34, %v677_v34 }
  0x29   : > { %841 = vst.msk [vmem:[#allocation2 + $0x3c] sm:$0xe] %vm831_vm6, %v765_v28  ;;  %v769_v45 = vrot.slane %v767_v33, 4  ;;  %v682_v47 = vld [vmem:[%s6830_s29 + $0x78] sm:$0xff]  ;;  %v770_v49 = vrot.slane %v6184_v39, 7  ;;  %v6187_v51 = vpack.c.bf16 %v678_v35, %v678_v35  ;;  %v6188_v53 = vpack.c.bf16 %v679_v40, %v679_v40  ;;  %v683_v60 = vld [vmem:[%s6830_s29 + $0x80] sm:$0xff] }
  0x2a   : > { %833 = vst.msk [vmem:[#allocation2 + $0x1c] sm:$0xf] %vm659_vm2, %v753_v36  ;;  %836 = vst.msk [vmem:[#allocation2 + $0x28] sm:$0xf] %vm659_vm2, %v758_v43  ;;  %v768_v48 = vsel %vm6852_vm7, %v766_v38, %v767_v33  ;;  %v772_v52 = vrot.slane %v6185_v46, 7  ;;  %v6189_v54 = vpack.c.bf16 %v680_v41, %v680_v41  ;;  %v6190_v55 = vpack.c.bf16 %v681_v42, %v681_v42  ;;  %v684_v1 = vld [vmem:[%s6830_s29 + $0x88] sm:$0xff] }
  0x2b   : > { %839 = vst.msk [vmem:[#allocation2 + $0x34] sm:$0xf] %vm659_vm2, %v763_v44  ;;  %842 = vst.msk [vmem:[#allocation2 + $0x40] sm:$0xf] %vm659_vm2, %v768_v48  ;;  %v771_v56 = vrot.slane %v770_v49, 4  ;;  %v775_v57 = vrot.slane %v6186_v50, 7  ;;  %v6191_v59 = vpack.c.bf16 %v682_v47, %v682_v47  ;;  %v6192_v11 = vpack.c.bf16 %v683_v60, %v683_v60 }
  0x2c   : > { %840 = vst.msk [vmem:[#allocation2 + $0x38] sm:$0x1] %vm629_vm0, %v764_v37  ;;  %843 = vst.msk [vmem:[#allocation2 + $0x44] sm:$0x1] %vm629_vm0, %v769_v45  ;;  %v777_v58 = vrot.slane %v6187_v51, 7  ;;  %v774_v61 = vrot.slane %v772_v52, 4  ;;  %v6193_v14 = vpack.c.bf16 %v684_v1, %v684_v1 }
  0x2d   : > { %844 = vst.msk [vmem:[#allocation2 + $0x48] sm:$0xe] %vm831_vm6, %v770_v49  ;;  %v780_v62 = vrot.slane %v6188_v53, 7  ;;  %v782_v63 = vrot.slane %v6189_v54, 7  ;;  %v785_v0 = vrot.slane %v6190_v55, 7  ;;  %v685_v2 = vld [vmem:[%s6830_s29 + $0x90] sm:$0xff]  ;;  %v773_v3 = vsel %vm6852_vm7, %v771_v56, %v772_v52 }
  0x2e   : > { %v776_v4 = vrot.slane %v775_v57, 4  ;;  %847 = vst.msk [vmem:[#allocation2 + $0x54] sm:$0xe] %vm831_vm6, %v775_v57  ;;  %v779_v5 = vrot.slane %v777_v58, 4  ;;  %v787_v6 = vrot.slane %v6191_v59, 7  ;;  %v686_v7 = vld [vmem:[%s6830_s29 + $0x98] sm:$0xff]  ;;  %v6194_v15 = vpack.c.bf16 %v685_v2, %v685_v2 }
  0x2f   : > { %845 = vst.msk [vmem:[#allocation2 + $0x4c] sm:$0xf] %vm659_vm2, %v773_v3  ;;  %v781_v8 = vrot.slane %v780_v62, 4  ;;  %v784_v9 = vrot.slane %v782_v63, 4  ;;  %v786_v10 = vrot.slane %v785_v0, 4  ;;  %v790_v18 = vrot.slane %v6192_v11, 7 }
  0x30   : > { %846 = vst.msk [vmem:[#allocation2 + $0x50] sm:$0x1] %vm629_vm0, %v774_v61  ;;  %v778_v12 = vsel %vm6852_vm7, %v776_v4, %v777_v58  ;;  %849 = vst.msk [vmem:[#allocation2 + $0x5c] sm:$0x1] %vm629_vm0, %v779_v5  ;;  %v789_v13 = vrot.slane %v787_v6, 4  ;;  %v6195_v20 = vpack.c.bf16 %v686_v7, %v686_v7  ;;  %v792_v21 = vrot.slane %v6193_v14, 7 }
  0x31   : > { %850 = vst.msk [vmem:[#allocation2 + $0x60] sm:$0xe] %vm831_vm6, %v780_v62  ;;  %853 = vst.msk [vmem:[#allocation2 + $0x6c] sm:$0xe] %vm831_vm6, %v785_v0  ;;  %v783_v16 = vsel %vm6852_vm7, %v781_v8, %v782_v63  ;;  %v788_v17 = vsel %vm6852_vm7, %v786_v10, %v787_v6  ;;  %v795_v22 = vrot.slane %v6194_v15, 7  ;;  %v791_v23 = vrot.slane %v790_v18, 4 }
  0x32   : > { %848 = vst.msk [vmem:[#allocation2 + $0x58] sm:$0xf] %vm659_vm2, %v778_v12  ;;  %851 = vst.msk [vmem:[#allocation2 + $0x64] sm:$0xf] %vm659_vm2, %v783_v16  ;;  %v797_v24 = vrot.slane %v6195_v20, 7  ;;  %v794_v25 = vrot.slane %v792_v21, 4 }
  0x33   : > { %852 = vst.msk [vmem:[#allocation2 + $0x68] sm:$0x1] %vm629_vm0, %v784_v9  ;;  %855 = vst.msk [vmem:[#allocation2 + $0x74] sm:$0x1] %vm629_vm0, %v789_v13  ;;  %v796_v26 = vrot.slane %v795_v22, 4  ;;  %v793_v27 = vsel %vm6852_vm7, %v791_v23, %v792_v21 }
  0x34   : > { %854 = vst.msk [vmem:[#allocation2 + $0x70] sm:$0xf] %vm659_vm2, %v788_v17  ;;  %v799_v28 = vrot.slane %v797_v24, 4  ;;  %857 = vst.msk [vmem:[#allocation2 + $0x7c] sm:$0xf] %vm659_vm2, %v793_v27 }
  0x35   : > { %856 = vst.msk [vmem:[#allocation2 + $0x78] sm:$0xe] %vm831_vm6, %v790_v18  ;;  %859 = vst.msk [vmem:[#allocation2 + $0x84] sm:$0xe] %vm831_vm6, %v795_v22  ;;  %v798_v29 = vsel %vm6852_vm7, %v796_v26, %v797_v24 }
  0x36   : > { %858 = vst.msk [vmem:[#allocation2 + $0x80] sm:$0x1] %vm629_vm0, %v794_v25  ;;  %861 = vst.msk [vmem:[#allocation2 + $0x8c] sm:$0x1] %vm629_vm0, %v799_v28 }
  0x37   : > { %860 = vst.msk [vmem:[#allocation2 + $0x88] sm:$0xf] %vm659_vm2, %v798_v29 }
  0x38 PF: > { %p5830_p8 = scmp.ne.s32.totalorder %s6629_s0, 1 }
  0x3a   : > { %865 = sbr.rel (%p5830_p8) target bundleno = 88 (0x58), region = 104 }
  0x3f   : > { %vm867_vm8 = vcmask 27648   ;;  %vm870_vm9 = vcmask 25600   ;;  %v5831_v30 = vld [vmem:[%s6830_s29 + $0x60] sm:$0xff]  ;;  %v5832_v31 = vld [vmem:[%s6830_s29 + $0x68] sm:$0xff]  ;;  %v6649_v32 = vmov 0   ;;  %vm956_vm10 = vcmask 1040384  }
  0x40   : > { %868 = vst.msk [vmem:[#allocation2 + $0x78] sm:$0xf] %vm867_vm8, %v6649_v32  ;;  %869 = vst.msk [vmem:[#allocation2 + $0x7c] sm:$0xf] %vm867_vm8, %v6649_v32  ;;  %v6196_v19 = vpack.c.bf16 %v5831_v30, %v5831_v30  ;;  %v6197_v33 = vpack.c.bf16 %v5832_v31, %v5832_v31  ;;  %vm957_vm11 = vcmask 1044484   ;;  %v5833_v34 = vld [vmem:[%s6830_s29 + $0x70] sm:$0xff] }
  0x41   : > { %872 = vst.msk [vmem:[#allocation2 + $0x84] sm:$0xf] %vm867_vm8, %v6649_v32  ;;  %873 = vst.msk [vmem:[#allocation2 + $0x88] sm:$0xf] %vm867_vm8, %v6649_v32  ;;  %v5834_v35 = vld [vmem:[%s6830_s29 + $0x78] sm:$0xff]  ;;  %v5835_v36 = vld [vmem:[%s6830_s29 + $0x80] sm:$0xff]  ;;  %v6198_v37 = vpack.c.bf16 %v5833_v34, %v5833_v34 }
  0x42   : > { %871 = vst.msk [vmem:[#allocation2 + $0x80] sm:$0x3] %vm870_vm9, %v6649_v32  ;;  %874 = vst.msk [vmem:[#allocation2 + $0x8c] sm:$0x3] %vm870_vm9, %v6649_v32  ;;  %vm1039_vm12 = vcmask 27649   ;;  %v6199_v38 = vpack.c.bf16 %v5834_v35, %v5834_v35  ;;  %v6200_v39 = vpack.c.bf16 %v5835_v36, %v5835_v36  ;;  %v5836_v40 = vld [vmem:[%s6830_s29 + $0x88] sm:$0xff] }
  0x43   : > { %v5837_v41 = vld [vmem:[%s6830_s29 + $0x90] sm:$0xff]  ;;  %v959_v42 = vrot.slane %v6196_v19, 7  ;;  %v961_v43 = vrot.slane %v6197_v33, 7  ;;  %v6201_v44 = vpack.c.bf16 %v5836_v40, %v5836_v40  ;;  %v5838_v46 = vld [vmem:[%s6830_s29 + $0x98] sm:$0xff]  ;;  %vm6933_vm13 = vmor %vm956_vm10, %vm957_vm11  ;;  %v964_v48 = vrot.slane %v6198_v37, 7 }
  0x44   : > { %v6202_v45 = vpack.c.bf16 %v5837_v41, %v5837_v41  ;;  %v966_v49 = vrot.slane %v6199_v38, 7  ;;  %v969_v50 = vrot.slane %v6200_v39, 7  ;;  %v6203_v51 = vpack.c.bf16 %v5838_v46, %v5838_v46  ;;  %v5839_v52 = vld [vmem:[%s6830_s29 + $0xa0] sm:$0xff]  ;;  %v5840_v57 = vld [vmem:[%s6830_s29 + $0xa8] sm:$0xff]  ;;  %v5841_v62 = vld [vmem:[%s6830_s29 + $0xb0] sm:$0xff] }
  0x45   : > { %v960_v53 = vrot.slane %v959_v42, 4  ;;  %1040 = vst.msk [vmem:[#allocation2] sm:$0xe] %vm1039_vm12, %v959_v42  ;;  %v963_v54 = vrot.slane %v961_v43, 4  ;;  %v971_v55 = vrot.slane %v6201_v44, 7  ;;  %v965_v58 = vrot.slane %v964_v48, 4 }
  0x46   : > { %v974_v56 = vrot.slane %v6202_v45, 7  ;;  %1043 = vst.msk [vmem:[#allocation2 + $0xc] sm:$0xe] %vm1039_vm12, %v964_v48  ;;  %v968_v59 = vrot.slane %v966_v49, 4  ;;  %v970_v60 = vrot.slane %v969_v50, 4  ;;  %v976_v61 = vrot.slane %v6203_v51, 7 }
  0x47   : > { %1046 = vst.msk [vmem:[#allocation2 + $0x18] sm:$0xe] %vm1039_vm12, %v969_v50  ;;  %v5842_v63 = vld [vmem:[%s6830_s29 + $0xb8] sm:$0xff]  ;;  %v962_v0 = vsel %vm6933_vm13, %v960_v53, %v961_v43  ;;  %v973_v1 = vrot.slane %v971_v55, 4  ;;  %v6204_v3 = vpack.c.bf16 %v5839_v52, %v5839_v52  ;;  %v5843_v4 = vld [vmem:[%s6830_s29 + $0xc0] sm:$0xff]  ;;  %v5844_v5 = vld [vmem:[%s6830_s29 + $0xc8] sm:$0xff]  ;;  %v967_v7 = vsel %vm6933_vm13, %v965_v58, %v966_v49 }
  0x48   : > { %1042 = vst.msk [vmem:[#allocation2 + $0x8] sm:$0x1] %vm629_vm0, %v963_v54  ;;  %v975_v2 = vrot.slane %v974_v56, 4  ;;  %v5845_v6 = vld [vmem:[%s6830_s29 + $0xd0] sm:$0xff]  ;;  %1045 = vst.msk [vmem:[#allocation2 + $0x14] sm:$0x1] %vm629_vm0, %v968_v59  ;;  %v972_v8 = vsel %vm6933_vm13, %v970_v60, %v971_v55  ;;  %v6205_v10 = vpack.c.bf16 %v5840_v57, %v5840_v57  ;;  %v6206_v14 = vpack.c.bf16 %v5841_v62, %v5841_v62 }
  0x49   : > { %1049 = vst.msk [vmem:[#allocation2 + $0x24] sm:$0xe] %vm1039_vm12, %v974_v56  ;;  %v978_v9 = vrot.slane %v976_v61, 4  ;;  %v5846_v11 = vld [vmem:[%s6830_s29 + $0xd8] sm:$0xff]  ;;  %v979_v13 = vrot.slane %v6204_v3, 7  ;;  %v6207_v15 = vpack.c.bf16 %v5842_v63, %v5842_v63  ;;  %v6208_v17 = vpack.c.bf16 %v5843_v4, %v5843_v4  ;;  %v5847_v25 = vld [vmem:[%s6830_s29 + $0xe0] sm:$0xff] }
  0x4a   : > { %1041 = vst.msk [vmem:[#allocation2 + $0x4] sm:$0xf] %vm867_vm8, %v962_v0  ;;  %1044 = vst.msk [vmem:[#allocation2 + $0x10] sm:$0xf] %vm867_vm8, %v967_v7  ;;  %v977_v12 = vsel %vm6933_vm13, %v975_v2, %v976_v61  ;;  %v981_v16 = vrot.slane %v6205_v10, 7  ;;  %v6209_v18 = vpack.c.bf16 %v5844_v5, %v5844_v5  ;;  %v6210_v20 = vpack.c.bf16 %v5845_v6, %v5845_v6  ;;  %v5848_v30 = vld [vmem:[%s6830_s29 + $0xe8] sm:$0xff] }
  0x4b   : > { %1047 = vst.msk [vmem:[#allocation2 + $0x1c] sm:$0xf] %vm867_vm8, %v972_v8  ;;  %1050 = vst.msk [vmem:[#allocation2 + $0x28] sm:$0xf] %vm867_vm8, %v977_v12  ;;  %v980_v21 = vrot.slane %v979_v13, 4  ;;  %v984_v22 = vrot.slane %v6206_v14, 7  ;;  %v6211_v24 = vpack.c.bf16 %v5846_v11, %v5846_v11  ;;  %v6212_v39 = vpack.c.bf16 %v5847_v25, %v5847_v25 }
  0x4c   : > { %1048 = vst.msk [vmem:[#allocation2 + $0x20] sm:$0x1] %vm629_vm0, %v973_v1  ;;  %1051 = vst.msk [vmem:[#allocation2 + $0x2c] sm:$0x1] %vm629_vm0, %v978_v9  ;;  %v986_v23 = vrot.slane %v6207_v15, 7  ;;  %v983_v26 = vrot.slane %v981_v16, 4  ;;  %v6213_v42 = vpack.c.bf16 %v5848_v30, %v5848_v30 }
  0x4d   : > { %1052 = vst.msk [vmem:[#allocation2 + $0x30] sm:$0xe] %vm1039_vm12, %v979_v13  ;;  %v989_v27 = vrot.slane %v6208_v17, 7  ;;  %v991_v28 = vrot.slane %v6209_v18, 7  ;;  %v994_v29 = vrot.slane %v6210_v20, 7  ;;  %v5849_v31 = vld [vmem:[%s6830_s29 + $0xf0] sm:$0xff]  ;;  %v982_v32 = vsel %vm6933_vm13, %v980_v21, %v981_v16 }
  0x4e   : > { %v985_v19 = vrot.slane %v984_v22, 4  ;;  %1055 = vst.msk [vmem:[#allocation2 + $0x3c] sm:$0xe] %vm1039_vm12, %v984_v22  ;;  %v988_v33 = vrot.slane %v986_v23, 4  ;;  %v996_v34 = vrot.slane %v6211_v24, 7  ;;  %v5850_v35 = vld [vmem:[%s6830_s29 + $0xf8] sm:$0xff]  ;;  %v6214_v43 = vpack.c.bf16 %v5849_v31, %v5849_v31 }
  0x4f   : > { %1053 = vst.msk [vmem:[#allocation2 + $0x34] sm:$0xf] %vm867_vm8, %v982_v32  ;;  %v990_v36 = vrot.slane %v989_v27, 4  ;;  %v993_v37 = vrot.slane %v991_v28, 4  ;;  %v995_v38 = vrot.slane %v994_v29, 4  ;;  %v999_v46 = vrot.slane %v6212_v39, 7 }
  0x50   : > { %1054 = vst.msk [vmem:[#allocation2 + $0x38] sm:$0x1] %vm629_vm0, %v983_v26  ;;  %v987_v40 = vsel %vm6933_vm13, %v985_v19, %v986_v23  ;;  %1057 = vst.msk [vmem:[#allocation2 + $0x44] sm:$0x1] %vm629_vm0, %v988_v33  ;;  %v998_v41 = vrot.slane %v996_v34, 4  ;;  %v6215_v48 = vpack.c.bf16 %v5850_v35, %v5850_v35  ;;  %v1001_v49 = vrot.slane %v6213_v42, 7 }
  0x51   : > { %1058 = vst.msk [vmem:[#allocation2 + $0x48] sm:$0xe] %vm1039_vm12, %v989_v27  ;;  %1061 = vst.msk [vmem:[#allocation2 + $0x54] sm:$0xe] %vm1039_vm12, %v994_v29  ;;  %v992_v44 = vsel %vm6933_vm13, %v990_v36, %v991_v28  ;;  %v997_v45 = vsel %vm6933_vm13, %v995_v38, %v996_v34  ;;  %v1004_v50 = vrot.slane %v6214_v43, 7  ;;  %v1000_v51 = vrot.slane %v999_v46, 4 }
  0x52   : > { %1056 = vst.msk [vmem:[#allocation2 + $0x40] sm:$0xf] %vm867_vm8, %v987_v40  ;;  %1059 = vst.msk [vmem:[#allocation2 + $0x4c] sm:$0xf] %vm867_vm8, %v992_v44  ;;  %v1006_v52 = vrot.slane %v6215_v48, 7  ;;  %v1003_v53 = vrot.slane %v1001_v49, 4 }
  0x53   : > { %1060 = vst.msk [vmem:[#allocation2 + $0x50] sm:$0x1] %vm629_vm0, %v993_v37  ;;  %1063 = vst.msk [vmem:[#allocation2 + $0x5c] sm:$0x1] %vm629_vm0, %v998_v41  ;;  %v1005_v54 = vrot.slane %v1004_v50, 4  ;;  %v1002_v55 = vsel %vm6933_vm13, %v1000_v51, %v1001_v49 }
  0x54   : > { %1062 = vst.msk [vmem:[#allocation2 + $0x58] sm:$0xf] %vm867_vm8, %v997_v45  ;;  %v1008_v56 = vrot.slane %v1006_v52, 4  ;;  %1065 = vst.msk [vmem:[#allocation2 + $0x64] sm:$0xf] %vm867_vm8, %v1002_v55 }
  0x55   : > { %1064 = vst.msk [vmem:[#allocation2 + $0x60] sm:$0xe] %vm1039_vm12, %v999_v46  ;;  %1067 = vst.msk [vmem:[#allocation2 + $0x6c] sm:$0xe] %vm1039_vm12, %v1004_v50  ;;  %v1007_v57 = vsel %vm6933_vm13, %v1005_v54, %v1006_v52 }
  0x56   : > { %1066 = vst.msk [vmem:[#allocation2 + $0x68] sm:$0x1] %vm629_vm0, %v1003_v53  ;;  %1069 = vst.msk [vmem:[#allocation2 + $0x74] sm:$0x1] %vm629_vm0, %v1008_v56 }
  0x57   : > { %1068 = vst.msk [vmem:[#allocation2 + $0x70] sm:$0xf] %vm867_vm8, %v1007_v57 }
  0x58 PF: > { %v6999_v58 = vld [vmem:[#allocation2 + $0x3c] sm:$0xe]  ;;  %v7003_v60 = vld [vmem:[#allocation2 + $0x44] sm:$0x1]  ;;  %vm1119_vm14 = vcmask 1042432   ;;  %vm1120_vm15 = vcmask 1046532  }
  0x59   : > { %v7001_v59 = vld [vmem:[#allocation2 + $0x40] sm:$0xf]  ;;  %v5874_v61 = vrot.slane %v6999_v58, 9  ;;  %vm7007_vm1 = vmor %vm1119_vm14, %vm1120_vm15  ;;  %v9093_v47 = vmov 0  ;;  %v1148_v63 = vrot.slane %v7003_v60, 5  ;;  %v2328_v13 = vshrl.u32 %v6999_v58, 16 }
  0x5a   : > { %v1145_v62 = vrot.slane %v7001_v59, 5  ;;  %v9094_v47 = vsel %vm7007_vm1, 4294967295, %v9093_v47  ;;  %v1071_v0 = vld [vmem:[#allocation2 + $0x18] sm:$0xe]  ;;  %v7014_v3 = vld [vmem:[#allocation2 + $0x1c] sm:$0xf] }
  0x5b   : > { %9095 = vst [vmem:[#allocation8_spill] sm:$0xff] %v9094_v47  ;;  %v7016_v4 = vld [vmem:[#allocation2 + $0x20] sm:$0x1]  ;;  %v5871_v5 = vrot.slane %v1071_v0, 9  ;;  %v1124_v6 = vrot.slane %v7014_v3, 5  ;;  %v2259_v9 = vshrl.u32 %v1071_v0, 16 }
  0x5c   : > { %v1146_v1 = vsel %vm7007_vm1, %v5874_v61, %v1145_v62  ;;  %v1147_v2 = vrot.slane %v1145_v62, 4  ;;  %v1127_v7 = vrot.slane %v7016_v4, 5  ;;  %v2262_v10 = vshll.u32 %v1071_v0, 16  ;;  %v2250_v11 = vld [vmem:[#allocation2 + $0x20] sm:$0x3]  ;;  %s6650_s0 = smov 4  }
  0x5d   : > { %vm1716_vm0 = vsmask.f32 2304  ;;  %v1125_v14 = vsel %vm7007_vm1, %v5871_v5, %v1124_v6  ;;  %v1126_v15 = vrot.slane %v1124_v6, 4  ;;  %v1074_v16 = vld [vmem:[#allocation2 + $0x24] sm:$0xe]  ;;  %v9007_v18 = vshll.u32 %v7014_v3, 16 }
  0x5e   : > { %v1149_v8 = vsel %vm7007_vm1, %v1147_v2, %v1148_v63  ;;  %v7027_v17 = vld [vmem:[#allocation2 + $0x28] sm:$0xf]  ;;  %vm1717_vm2 = vsmask.f32 6416  ;;  %v9006_v20 = vshrl.u32 %v7014_v3, 16  ;;  %v2261_v21 = vrot.slane %v2259_v9, 5 }
  0x5f   : > { %v7022_v12 = vcombine.low %v1146_v1, %v1149_v8  ;;  %v1128_v22 = vsel %vm7007_vm1, %v1126_v15, %v1127_v7  ;;  %v2264_v23 = vrot.slane %v2262_v10, 6  ;;  %v2273_v24 = vshrl.u32 %v2250_v11, 16  ;;  %v7035_v26 = vld [vmem:[#allocation2 + $0x2c] sm:$0x1]  ;;  %vm7049_vm3 = vmor %vm1716_vm0, %vm1717_vm2  ;;  %v7064_v53 = vld [vmem:[#allocation2 + $0x34] sm:$0xf] }
  0x60   : > { %v2276_v25 = vshll.u32 %v2250_v11, 16  ;;  %v7037_v27 = vcombine.low %v1125_v14, %v1128_v22  ;;  %v2267_v28 = vrot.slane %v9006_v20, 5  ;;  %v2268_v29 = vrot.slane %v9007_v18, 6  ;;  %v2251_v39 = vld [vmem:[#allocation2 + $0x2c] sm:$0x3]  ;;  %s6651_s30 = smov 8  }
  0x61   : > { %2472 = vrot.lane.b32.xlu1 %v7022_v12, %s6650_s0  ;;  %v5872_v30 = vrot.slane %v1074_v16, 9  ;;  %v2265_v31 = vor.u32 %v2264_v23, %v2261_v21  ;;  %v2275_v32 = vrot.slane %v2273_v24, 5  ;;  %v1131_v33 = vrot.slane %v7027_v17, 5  ;;  %v7066_v54 = vld [vmem:[#allocation2 + $0x38] sm:$0x1]  ;;  %s9132_s1 = sld [smem:[#allocation39_spill]] }
  0x62   : > { %v2278_v19 = vrot.slane %v2276_v25, 6  ;;  %v2331_v34 = vshll.u32 %v6999_v58, 16  ;;  %2466 = vrot.lane.b32.xlu0 %v7037_v27, %s6650_s0  ;;  %v2269_v36 = vor.u32 %v2268_v29, %v2267_v28  ;;  %v1134_v37 = vrot.slane %v7035_v26, 5  ;;  %v1077_v2 = vld [vmem:[#allocation2 + $0x30] sm:$0xe]  ;;  %s9234_s24 = sld [smem:[#allocation40_spill]] }
  0x63   : > { %v9005_v38 = vshll.u32 %v7027_v17, 16  ;;  %v2266_v40 = vrot.slane %v2265_v31, 4  ;;  %v1132_v42 = vsel %vm7007_vm1, %v5872_v30, %v1131_v33  ;;  %v1133_v43 = vrot.slane %v1131_v33, 4  ;;  %v2253_v23 = vld [vmem:[#allocation2 + $0x44] sm:$0x3]  ;;  %s9235_s3 = sld [smem:[#allocation41_spill]] }
  0x64   : > { %v2279_v41 = vor.u32 %v2278_v19, %v2275_v32  ;;  %v2271_v44 = vrot.slane %v2269_v36, 4  ;;  %v9002_v45 = vshrl.u32 %v7027_v17, 16  ;;  %v2282_v46 = vshrl.u32 %v1074_v16, 16  ;;  %v4283_v47 = vld [vmem:[#allocation2 + $0x18] sm:$0xc] }
  0x65   : > { %v2285_v48 = vshll.u32 %v1074_v16, 16  ;;  %v2270_v49 = vsel %vm7049_vm3, %v2266_v40, %v2269_v36  ;;  %v1135_v50 = vsel %vm7007_vm1, %v1133_v43, %v1134_v37  ;;  %v2291_v51 = vrot.slane %v9005_v38, 6  ;;  %v2252_v40 = vld [vmem:[#allocation2 + $0x38] sm:$0x3] }
  0x66   : > { %v2296_v52 = vshrl.u32 %v2251_v39, 16  ;;  %v2280_v55 = vsel %vm7049_vm3, %v2271_v44, %v2279_v41  ;;  %v7070_v56 = vcombine.low %v1132_v42, %v1135_v50  ;;  %v2284_v57 = vrot.slane %v2282_v46, 5  ;;  %v7102_v46 = vld [vmem:[#allocation2 + $0x58] sm:$0xf] }
  0x67   : > { %v2287_v61 = vrot.slane %v2285_v48, 6  ;;  %v5937_v62 = vcombine.low %v2270_v49, %v2280_v55  ;;  %v2290_v63 = vrot.slane %v9002_v45, 5  ;;  %v2299_v1 = vshll.u32 %v2251_v39, 16 }
  0x68   : > { %v2298_v0 = vrot.slane %v2296_v52, 5  ;;  %2468 = vrot.lane.b32.xlu0 %v7070_v56, %s6650_s0  ;;  %v5873_v6 = vrot.slane %v1077_v2, 9  ;;  %v1138_v7 = vrot.slane %v7064_v53, 5  ;;  %v1141_v8 = vrot.slane %v7066_v54, 5  ;;  %v7107_v52 = vld [vmem:[#allocation2 + $0x5c] sm:$0x1] }
  0x69   : > { %v2288_v5 = vor.u32 %v2287_v61, %v2284_v57  ;;  %v2150_v9 = vshll.u32 %v7003_v60, 16  ;;  %2506 = vrot.lane.b32.xlu1 %v5937_v62, %s6651_s30  ;;  %v2292_v10 = vor.u32 %v2291_v51, %v2290_v63  ;;  %v2301_v11 = vrot.slane %v2299_v1, 6  ;;  %v1086_v63 = vld [vmem:[#allocation2 + $0x54] sm:$0xe] }
  0x6a   : > { %v9013_v14 = vshll.u32 %v7001_v59, 16  ;;  %v1139_v16 = vsel %vm7007_vm1, %v5873_v6, %v1138_v7  ;;  %v1140_v21 = vrot.slane %v1138_v7, 4  ;;  %v9010_v22 = vshrl.u32 %v7001_v59, 16 }
  0x6b   : > { %v2289_v15 = vrot.slane %v2288_v5, 4  ;;  %v2294_v24 = vrot.slane %v2292_v10, 4  ;;  %v2302_v25 = vor.u32 %v2301_v11, %v2298_v0  ;;  %v2330_v60 = vrot.slane %v2328_v13, 5  ;;  %v7115_v11 = vld [vmem:[#allocation2 + $0x4c] sm:$0xf] }
  0x6c   : > { %v2333_v28 = vrot.slane %v2331_v34, 6  ;;  %v1142_v30 = vsel %vm7007_vm1, %v1140_v21, %v1141_v8  ;;  %v2336_v31 = vrot.slane %v9010_v22, 5  ;;  %v2337_v32 = vrot.slane %v9013_v14, 6 }
  0x6d   : > { %v2293_v29 = vsel %vm7049_vm3, %v2289_v15, %v2292_v10  ;;  %v2303_v19 = vsel %vm7049_vm3, %v2294_v24, %v2302_v25  ;;  %v7096_v33 = vcombine.low %v1139_v16, %v1142_v30  ;;  %v2342_v13 = vshrl.u32 %v2253_v23, 16  ;;  %v7121_v24 = vld [vmem:[#allocation2 + $0x50] sm:$0x1]  ;;  %v1083_v30 = vld [vmem:[#allocation2 + $0x48] sm:$0xe] }
  0x6e   : > { %v2334_v58 = vor.u32 %v2333_v28, %v2330_v60  ;;  %v5938_v34 = vcombine.low %v2293_v29, %v2303_v19  ;;  %v2338_v36 = vor.u32 %v2337_v32, %v2336_v31  ;;  %v2345_v37 = vshll.u32 %v2253_v23, 16 }
  0x6f   : > { %v8999_v39 = vshll.u32 %v7064_v53, 16  ;;  %2470 = vrot.lane.b32.xlu0 %v7096_v33, %s6650_s0  ;;  %v2344_v42 = vrot.slane %v2342_v13, 5  ;;  %v8998_v43 = vshrl.u32 %v7064_v53, 16  ;;  %v2305_v44 = vshrl.u32 %v1077_v2, 16 }
  0x70   : > { %v2335_v41 = vrot.slane %v2334_v58, 4  ;;  %2508 = vrot.lane.b32.xlu1 %v5938_v34, %s6651_s30  ;;  %v2340_v48 = vrot.slane %v2338_v36, 4  ;;  %v2347_v49 = vrot.slane %v2345_v37, 6  ;;  %v2308_v50 = vshll.u32 %v1077_v2, 16  ;;  %v2255_v37 = vld [vmem:[#allocation2 + $0x5c] sm:$0x3] }
  0x71   : > { %v2314_v51 = vrot.slane %v8999_v39, 6  ;;  %v2307_v57 = vrot.slane %v2305_v44, 5  ;;  %v2313_v61 = vrot.slane %v8998_v43, 5  ;;  %v2319_v62 = vshrl.u32 %v2252_v40, 16  ;;  %v7266_v39 = vld [vmem:[#allocation2 + $0x28] sm:$0xf] }
  0x72   : > { %v2339_v55 = vsel %vm7049_vm3, %v2335_v41, %v2338_v36  ;;  %v2348_v0 = vor.u32 %v2347_v49, %v2344_v42  ;;  %v2310_v1 = vrot.slane %v2308_v50, 6  ;;  %v2322_v5 = vshll.u32 %v2252_v40, 16  ;;  %9106 = vst [vmem:[#allocation17_spill] sm:$0xff] %v7266_v39 }
  0x73   : > { %v5876_v6 = vrot.slane %v1086_v63, 9  ;;  %v2315_v7 = vor.u32 %v2314_v51, %v2313_v61  ;;  %v2321_v2 = vrot.slane %v2319_v62, 5  ;;  %v1159_v8 = vrot.slane %v7102_v46, 5 }
  0x74   : > { %v1162_v10 = vrot.slane %v7107_v52, 5  ;;  %v7117_v15 = vrot.slane %v2150_v9, 5  ;;  %v2349_v16 = vsel %vm7049_vm3, %v2340_v48, %v2348_v0  ;;  %v2311_v21 = vor.u32 %v2310_v1, %v2307_v57 }
  0x75   : > { %v2324_v23 = vrot.slane %v2322_v5, 6  ;;  %v5940_v25 = vcombine.low %v2339_v55, %v2349_v16  ;;  %v2317_v60 = vrot.slane %v2315_v7, 4  ;;  %v1160_v28 = vsel %vm7007_vm1, %v5876_v6, %v1159_v8 }
  0x76   : > { %v1161_v29 = vrot.slane %v1159_v8, 4  ;;  %v2312_v31 = vrot.slane %v2311_v21, 4  ;;  %v5875_v19 = vrot.slane %v1083_v30, 9  ;;  %v1152_v9 = vrot.slane %v7115_v11, 5 }
  0x77   : > { %v2325_v32 = vor.u32 %v2324_v23, %v2321_v2  ;;  %v2078_v58 = vshll.u32 %v7016_v4, 16  ;;  %2512 = vrot.lane.b32.xlu1 %v5940_v25, %s6651_s30  ;;  %v1155_v34 = vrot.slane %v7121_v24, 5  ;;  %v8993_v36 = vshll.u32 %v7102_v46, 16 }
  0x78   : > { %v1163_v13 = vsel %vm7007_vm1, %v1161_v29, %v1162_v10  ;;  %v2316_v40 = vsel %vm7049_vm3, %v2312_v31, %v2315_v7  ;;  %v1153_v4 = vsel %vm7007_vm1, %v5875_v19, %v1152_v9  ;;  %v1154_v48 = vrot.slane %v1152_v9, 4  ;;  %v1092_v31 = vld [vmem:[#allocation2 + $0x6c] sm:$0xe] }
  0x79   : > { %v2326_v41 = vsel %vm7049_vm3, %v2317_v60, %v2325_v32  ;;  %v7136_v42 = vcombine.low %v1160_v28, %v1163_v13  ;;  %v8992_v49 = vshrl.u32 %v7102_v46, 16  ;;  %v2374_v50 = vshrl.u32 %v1086_v63, 16  ;;  %v7156_v32 = vld [vmem:[#allocation2 + $0x70] sm:$0xf] }
  0x7a   : > { %v5939_v44 = vcombine.low %v2316_v40, %v2326_v41  ;;  %v2377_v51 = vshll.u32 %v1086_v63, 16  ;;  %v2383_v55 = vrot.slane %v8993_v36, 6  ;;  %v2388_v57 = vshrl.u32 %v2255_v37, 16  ;;  %v2254_v63 = vld [vmem:[#allocation2 + $0x50] sm:$0x3] }
  0x7b   : > { %v2391_v61 = vshll.u32 %v2255_v37, 16  ;;  %2476 = vrot.lane.b32.xlu1 %v7136_v42, %s6650_s0  ;;  %v1156_v62 = vsel %vm7007_vm1, %v1154_v48, %v1155_v34  ;;  %v2376_v0 = vrot.slane %v2374_v50, 5  ;;  %v2382_v1 = vrot.slane %v8992_v49, 5  ;;  %v7162_v37 = vld [vmem:[#allocation2 + $0x74] sm:$0x1] }
  0x7c   : > { %2510 = vrot.lane.b32.xlu0 %v5939_v44, %s6651_s30  ;;  %v8991_v5 = vshll.u32 %v7115_v11, 16  ;;  %v7151_v6 = vcombine.low %v1153_v4, %v1156_v62  ;;  %v2379_v7 = vrot.slane %v2377_v51, 6  ;;  %v2390_v2 = vrot.slane %v2388_v57, 5 }
  0x7d   : > { %v2393_v8 = vrot.slane %v2391_v61, 6  ;;  %v2384_v10 = vor.u32 %v2383_v55, %v2382_v1  ;;  %v8990_v16 = vshrl.u32 %v7115_v11, 16  ;;  %v2351_v21 = vshrl.u32 %v1083_v30, 16  ;;  %v7167_v55 = vld [vmem:[#allocation2 + $0x64] sm:$0xf] }
  0x7e   : > { %v2354_v23 = vshll.u32 %v1083_v30, 16  ;;  %v2380_v25 = vor.u32 %v2379_v7, %v2376_v0  ;;  %v2360_v28 = vrot.slane %v8991_v5, 6  ;;  %v2365_v29 = vshrl.u32 %v2254_v63, 16  ;;  %v7174_v1 = vld [vmem:[#allocation2 + $0x68] sm:$0x1] }
  0x7f   : > { %v2394_v60 = vor.u32 %v2393_v8, %v2390_v2  ;;  %v2386_v19 = vrot.slane %v2384_v10, 4  ;;  %v2353_v9 = vrot.slane %v2351_v21, 5  ;;  %v2359_v34 = vrot.slane %v8990_v16, 5  ;;  %9098 = vst [vmem:[#allocation9_spill] sm:$0xff] %v7174_v1  ;;  %v1089_v21 = vld [vmem:[#allocation2 + $0x60] sm:$0xe] }
  0x80   : > { %2474 = vrot.lane.b32.xlu0 %v7151_v6, %s6650_s0  ;;  %v2356_v13 = vrot.slane %v2354_v23, 6  ;;  %v2381_v30 = vrot.slane %v2380_v25, 4  ;;  %v2367_v40 = vrot.slane %v2365_v29, 5  ;;  %v2368_v41 = vshll.u32 %v2254_v63, 16  ;;  %v7220_v16 = vld [vmem:[#allocation2 + $0x10] sm:$0xf] }
  0x81   : > { %v5878_v4 = vrot.slane %v1092_v31, 9  ;;  %v2395_v44 = vsel %vm7049_vm3, %v2386_v19, %v2394_v60  ;;  %v2361_v50 = vor.u32 %v2360_v28, %v2359_v34  ;;  %v1173_v51 = vrot.slane %v7156_v32, 5  ;;  %9102 = vst [vmem:[#allocation13_spill] sm:$0xff] %v7220_v16 }
  0x82   : > { %v2357_v48 = vor.u32 %v2356_v13, %v2353_v9  ;;  %v7169_v57 = vrot.slane %v2078_v58, 5  ;;  %v2385_v61 = vsel %vm7049_vm3, %v2381_v30, %v2384_v10  ;;  %v2370_v62 = vrot.slane %v2368_v41, 6  ;;  %v2257_v9 = vld [vmem:[#allocation2 + $0x74] sm:$0x3] }
  0x83   : > { %v1176_v0 = vrot.slane %v7162_v37, 5  ;;  %v5942_v63 = vcombine.low %v2385_v61, %v2395_v44  ;;  %v2363_v2 = vrot.slane %v2361_v50, 4  ;;  %v1174_v8 = vsel %vm7007_vm1, %v5878_v4, %v1173_v51 }
  0x84   : > { %v2358_v7 = vrot.slane %v2357_v48, 4  ;;  %v2371_v23 = vor.u32 %v2370_v62, %v2367_v40  ;;  %v1175_v25 = vrot.slane %v1173_v51, 4  ;;  %v5877_v60 = vrot.slane %v1089_v21, 9 }
  0x85   : > { %v1166_v58 = vrot.slane %v7167_v55, 5  ;;  %2516 = vrot.lane.b32.xlu1 %v5942_v63, %s6651_s30  ;;  %v1169_v29 = vrot.slane %v7174_v1, 5  ;;  %v8989_v19 = vshll.u32 %v7156_v32, 16  ;;  %v8988_v44 = vshrl.u32 %v7156_v32, 16 }
  0x86   : > { %v2362_v10 = vsel %vm7049_vm3, %v2358_v7, %v2361_v50  ;;  %v2372_v13 = vsel %vm7049_vm3, %v2363_v2, %v2371_v23  ;;  %v1177_v34 = vsel %vm7007_vm1, %v1175_v25, %v1176_v0  ;;  %v2420_v48 = vshrl.u32 %v1092_v31, 16 }
  0x87   : > { %v1167_v30 = vsel %vm7007_vm1, %v5877_v60, %v1166_v58  ;;  %v1168_v40 = vrot.slane %v1166_v58, 4  ;;  %v5941_v41 = vcombine.low %v2362_v10, %v2372_v13  ;;  %v7191_v4 = vcombine.low %v1174_v8, %v1177_v34  ;;  %v2256_v8 = vld [vmem:[#allocation2 + $0x68] sm:$0x3] }
  0x88   : > { %v2423_v51 = vshll.u32 %v1092_v31, 16  ;;  %v2429_v61 = vrot.slane %v8989_v19, 6  ;;  %v2434_v62 = vshrl.u32 %v2257_v9, 16  ;;  %v2422_v63 = vrot.slane %v2420_v48, 5 }
  0x89   : > { %9099 = vst [vmem:[#allocation10_spill] sm:$0xff] %v7191_v4  ;;  %v1170_v50 = vsel %vm7007_vm1, %v1168_v40, %v1169_v29  ;;  %2514 = vrot.lane.b32.xlu0 %v5941_v41, %s6651_s30  ;;  %2480 = vrot.lane.b32.xlu1 %v7191_v4, %s6650_s0  ;;  %v2428_v7 = vrot.slane %v8988_v44, 5  ;;  %v2437_v2 = vshll.u32 %v2257_v9, 16  ;;  %v8987_v31 = vshll.u32 %v7167_v55, 16  ;;  %v7211_v9 = vld [vmem:[#allocation2 + $0x1c] sm:$0xf] }
  0x8a   : > { %v7201_v0 = vcombine.low %v1167_v30, %v1170_v50  ;;  %v2425_v23 = vrot.slane %v2423_v51, 6  ;;  %v2436_v25 = vrot.slane %v2434_v62, 5  ;;  %v8986_v60 = vshrl.u32 %v7167_v55, 16  ;;  %9100 = vst [vmem:[#allocation11_spill] sm:$0xff] %v7211_v9  ;;  %v7215_v62 = vld [vmem:[#allocation2 + $0x20] sm:$0x1] }
  0x8b   : > { %v2430_v58 = vor.u32 %v2429_v61, %v2428_v7  ;;  %v2439_v10 = vrot.slane %v2437_v2, 6  ;;  %v2397_v29 = vshrl.u32 %v1089_v21, 16  ;;  %v2400_v13 = vshll.u32 %v1089_v21, 16  ;;  %9101 = vst [vmem:[#allocation12_spill] sm:$0xff] %v7215_v62 }
  0x8c   : > { %v2426_v34 = vor.u32 %v2425_v23, %v2422_v63  ;;  %v2405_v30 = vrot.slane %v8986_v60, 5  ;;  %v2406_v40 = vrot.slane %v8987_v31, 6  ;;  %v2411_v41 = vshrl.u32 %v2256_v8, 16  ;;  %v1621_v23 = vld [vmem:[#allocation2 + $0x18] sm:$0xe] }
  0x8d   : > { %2478 = vrot.lane.b32.xlu0 %v7201_v0, %s6650_s0  ;;  %v2432_v48 = vrot.slane %v2430_v58, 4  ;;  %v2440_v50 = vor.u32 %v2439_v10, %v2436_v25  ;;  %v2399_v51 = vrot.slane %v2397_v29, 5  ;;  %v2402_v61 = vrot.slane %v2400_v13, 6 }
  0x8e   : > { %v2427_v21 = vrot.slane %v2426_v34, 4  ;;  %v2407_v63 = vor.u32 %v2406_v40, %v2405_v30  ;;  %v2413_v7 = vrot.slane %v2411_v41, 5  ;;  %v2414_v2 = vshll.u32 %v2256_v8, 16  ;;  %v7225_v34 = vld [vmem:[#allocation2 + $0x14] sm:$0x1] }
  0x8f   : > { %v2441_v31 = vsel %vm7049_vm3, %v2432_v48, %v2440_v50  ;;  %v2403_v44 = vor.u32 %v2402_v61, %v2399_v51  ;;  %v5898_v19 = vrot.slane %v1621_v23, 9  ;;  %v1661_v13 = vrot.slane %v7211_v9, 5  ;;  %9103 = vst [vmem:[#allocation14_spill] sm:$0xff] %v7225_v34  ;;  %v1620_v48 = vld [vmem:[#allocation2 + $0xc] sm:$0xe] }
  0x90   : > { %v2431_v25 = vsel %vm7049_vm3, %v2427_v21, %v2430_v58  ;;  %v2409_v10 = vrot.slane %v2407_v63, 4  ;;  %v2416_v29 = vrot.slane %v2414_v2, 6  ;;  %v1664_v41 = vrot.slane %v7215_v62, 5 }
  0x91   : > { %v5944_v30 = vcombine.low %v2431_v25, %v2441_v31  ;;  %v2404_v40 = vrot.slane %v2403_v44, 4  ;;  %v1662_v51 = vsel %vm7007_vm1, %v5898_v19, %v1661_v13  ;;  %v1663_v61 = vrot.slane %v1661_v13, 4  ;;  %v1709_v25 = vld [vmem:[#allocation2 + $0x20] sm:$0x3] }
  0x92   : > { %v2417_v50 = vor.u32 %v2416_v29, %v2413_v7  ;;  %v5897_v5 = vrot.slane %v1620_v48, 9  ;;  %v1654_v21 = vrot.slane %v7220_v16, 5  ;;  %v1657_v2 = vrot.slane %v7225_v34, 5 }
  0x93   : > { %2520 = vrot.lane.b32.xlu1 %v5944_v30, %s6651_s30  ;;  %v2408_v58 = vsel %vm7049_vm3, %v2404_v40, %v2407_v63  ;;  %v8995_v44 = vshll.u32 %v7211_v9, 16  ;;  %v1665_v7 = vsel %vm7007_vm1, %v1663_v61, %v1664_v41  ;;  %v8994_v19 = vshrl.u32 %v7211_v9, 16  ;;  %v4285_v9 = vld [vmem:[#allocation2 + $0x30] sm:$0xc] }
  0x94   : > { %v2418_v31 = vsel %vm7049_vm3, %v2409_v10, %v2417_v50  ;;  %v1743_v29 = vshrl.u32 %v1621_v23, 16  ;;  %v5914_v30 = vcombine.low %v1662_v51, %v1665_v7  ;;  %v1655_v63 = vsel %vm7007_vm1, %v5897_v5, %v1654_v21 }
  0x95   : > { %v5943_v13 = vcombine.low %v2408_v58, %v2418_v31  ;;  %v1656_v40 = vrot.slane %v1654_v21, 4  ;;  %v1746_v49 = vshll.u32 %v1621_v23, 16  ;;  %v1751_v36 = vrot.slane %v8994_v19, 5  ;;  %v1708_v31 = vld [vmem:[#allocation2 + $0x14] sm:$0x3] }
  0x96   : > { %v1745_v8 = vrot.slane %v1743_v29, 5  ;;  %v1752_v10 = vrot.slane %v8995_v44, 6  ;;  %v1757_v50 = vshrl.u32 %v1709_v25, 16  ;;  %v1760_v51 = vshll.u32 %v1709_v25, 16  ;;  %v7258_v25 = vld [vmem:[#allocation2 + $0x34] sm:$0xf] }
  0x97   : > { %2518 = vrot.lane.b32.xlu0 %v5943_v13, %s6651_s30  ;;  %1953 = vrot.lane.b32.xlu1 %v5914_v30, %s6650_s0  ;;  %v1658_v41 = vsel %vm7007_vm1, %v1656_v40, %v1657_v2  ;;  %v8997_v5 = vshll.u32 %v7220_v16, 16  ;;  %v1748_v58 = vrot.slane %v1746_v49, 6  ;;  %v8996_v21 = vshrl.u32 %v7220_v16, 16  ;;  %9104 = vst [vmem:[#allocation15_spill] sm:$0xff] %v7258_v25 }
  0x98   : > { %v5913_v61 = vcombine.low %v1655_v63, %v1658_v41  ;;  %v1753_v23 = vor.u32 %v1752_v10, %v1751_v36  ;;  %v1759_v7 = vrot.slane %v1757_v50, 5  ;;  %v1762_v29 = vrot.slane %v1760_v51, 6  ;;  %v7261_v10 = vld [vmem:[#allocation2 + $0x38] sm:$0x1]  ;;  %v3027_v51 = vld [vmem:[#allocation2 + $0x30] sm:$0xe] }
  0x99   : > { %v1720_v19 = vshrl.u32 %v1620_v48, 16  ;;  %v1723_v44 = vshll.u32 %v1620_v48, 16  ;;  %v1749_v13 = vor.u32 %v1748_v58, %v1745_v8  ;;  %v1728_v30 = vrot.slane %v8996_v21, 5  ;;  %9105 = vst [vmem:[#allocation16_spill] sm:$0xff] %v7261_v10 }
  0x9a   : > { %v1755_v60 = vrot.slane %v1753_v23, 4  ;;  %v1729_v2 = vrot.slane %v8997_v5, 6  ;;  %v1763_v36 = vor.u32 %v1762_v29, %v1759_v7  ;;  %v1734_v40 = vshrl.u32 %v1708_v31, 16  ;;  %v7271_v29 = vld [vmem:[#allocation2 + $0x2c] sm:$0x1] }
  0x9b   : > { %1951 = vrot.lane.b32.xlu0 %v5913_v61, %s6650_s0  ;;  %v1722_v49 = vrot.slane %v1720_v19, 5  ;;  %v1725_v63 = vrot.slane %v1723_v44, 6  ;;  %v1750_v8 = vrot.slane %v1749_v13, 4  ;;  %v1737_v50 = vshll.u32 %v1708_v31, 16  ;;  %9107 = vst [vmem:[#allocation18_spill] sm:$0xff] %v7271_v29 }
  0x9c   : > { %v1730_v41 = vor.u32 %v1729_v2, %v1728_v30  ;;  %v1764_v58 = vsel %vm7049_vm3, %v1755_v60, %v1763_v36  ;;  %v1736_v5 = vrot.slane %v1734_v40, 5  ;;  %v5966_v43 = vrot.slane %v3027_v51, 9  ;;  %v3026_v2 = vld [vmem:[#allocation2 + $0x24] sm:$0xe] }
  0x9d   : > { %v1726_v21 = vor.u32 %v1725_v63, %v1722_v49  ;;  %v1754_v44 = vsel %vm7049_vm3, %v1750_v8, %v1753_v23  ;;  %v1739_v61 = vrot.slane %v1737_v50, 6  ;;  %v3067_v7 = vrot.slane %v7258_v25, 5 }
  0x9e   : > { %v1732_v19 = vrot.slane %v1730_v41, 4  ;;  %v5922_v13 = vcombine.low %v1754_v44, %v1764_v58  ;;  %v3070_v60 = vrot.slane %v7261_v10, 5  ;;  %v5965_v40 = vrot.slane %v3026_v2, 9  ;;  %v3115_v44 = vld [vmem:[#allocation2 + $0x38] sm:$0x3] }
  0x9f   : > { %v1727_v30 = vrot.slane %v1726_v21, 4  ;;  %v1740_v36 = vor.u32 %v1739_v61, %v1736_v5  ;;  %v3068_v49 = vsel %vm7007_vm1, %v5966_v43, %v3067_v7  ;;  %v3069_v63 = vrot.slane %v3067_v7, 4 }
  0xa0   : > { %1993 = vrot.lane.b32.xlu1 %v5922_v13, %s6651_s30  ;;  %v3060_v8 = vrot.slane %v7266_v39, 5  ;;  %v3063_v50 = vrot.slane %v7271_v29, 5  ;;  %v9001_v21 = vshll.u32 %v7258_v25, 16  ;;  %v9000_v43 = vshrl.u32 %v7258_v25, 16  ;;  %v7450_v29 = vld [vmem:[#allocation2 + $0x58] sm:$0xf] }
  0xa1   : > { %v1731_v23 = vsel %vm7049_vm3, %v1727_v30, %v1730_v41  ;;  %v1741_v58 = vsel %vm7049_vm3, %v1732_v19, %v1740_v36  ;;  %v3071_v5 = vsel %vm7007_vm1, %v3069_v63, %v3070_v60  ;;  %v3146_v61 = vshrl.u32 %v3027_v51, 16  ;;  %9124 = vst [vmem:[#allocation33_spill] sm:$0xff] %v7450_v29 }
  0xa2   : > { %v5921_v7 = vcombine.low %v1731_v23, %v1741_v58  ;;  %v5982_v13 = vcombine.low %v3068_v49, %v3071_v5  ;;  %v3061_v41 = vsel %vm7007_vm1, %v5965_v40, %v3060_v8  ;;  %v3062_v30 = vrot.slane %v3060_v8, 4  ;;  %v3114_v40 = vld [vmem:[#allocation2 + $0x2c] sm:$0x3] }
  0xa3   : > { %v3148_v31 = vrot.slane %v3146_v61, 5  ;;  %v3149_v48 = vshll.u32 %v3027_v51, 16  ;;  %v3154_v28 = vrot.slane %v9000_v43, 5  ;;  %v3155_v19 = vrot.slane %v9001_v21, 6 }
  0xa4   : > { %1991 = vrot.lane.b32.xlu0 %v5921_v7, %s6651_s30  ;;  %3356 = vrot.lane.b32.xlu1 %v5982_v13, %s6650_s0  ;;  %v3064_v60 = vsel %vm7007_vm1, %v3062_v30, %v3063_v50  ;;  %v3160_v36 = vshrl.u32 %v3115_v44, 16  ;;  %v3163_v49 = vshll.u32 %v3115_v44, 16  ;;  %v9004_v63 = vshll.u32 %v7266_v39, 16  ;;  %v7300_v7 = vld [vmem:[#allocation2 + $0x34] sm:$0xf] }
  0xa5   : > { %v5981_v23 = vcombine.low %v3061_v41, %v3064_v60  ;;  %v3151_v51 = vrot.slane %v3149_v48, 6  ;;  %v3156_v8 = vor.u32 %v3155_v19, %v3154_v28  ;;  %v9003_v58 = vshrl.u32 %v7266_v39, 16  ;;  %9108 = vst [vmem:[#allocation19_spill] sm:$0xff] %v7300_v7  ;;  %v7306_v30 = vld [vmem:[#allocation2 + $0x38] sm:$0x1] }
  0xa6   : > { %v3162_v5 = vrot.slane %v3160_v36, 5  ;;  %v3165_v61 = vrot.slane %v3163_v49, 6  ;;  %v3123_v43 = vshrl.u32 %v3026_v2, 16  ;;  %v3126_v21 = vshll.u32 %v3026_v2, 16  ;;  %9109 = vst [vmem:[#allocation20_spill] sm:$0xff] %v7306_v30 }
  0xa7   : > { %v3152_v13 = vor.u32 %v3151_v51, %v3148_v31  ;;  %v3158_v45 = vrot.slane %v3156_v8, 4  ;;  %v3131_v50 = vrot.slane %v9003_v58, 5  ;;  %v3132_v44 = vrot.slane %v9004_v63, 6  ;;  %v1623_v48 = vld [vmem:[#allocation2 + $0x30] sm:$0xe] }
  0xa8   : > { %3354 = vrot.lane.b32.xlu0 %v5981_v23, %s6650_s0  ;;  %v3166_v28 = vor.u32 %v3165_v61, %v3162_v5  ;;  %v3125_v41 = vrot.slane %v3123_v43, 5  ;;  %v3128_v19 = vrot.slane %v3126_v21, 6  ;;  %v3137_v60 = vshrl.u32 %v3114_v40, 16  ;;  %v7310_v51 = vld [vmem:[#allocation2 + $0x28] sm:$0xf] }
  0xa9   : > { %v3153_v36 = vrot.slane %v3152_v13, 4  ;;  %v3133_v31 = vor.u32 %v3132_v44, %v3131_v50  ;;  %v3140_v49 = vshll.u32 %v3114_v40, 16  ;;  %9110 = vst [vmem:[#allocation21_spill] sm:$0xff] %v7310_v51  ;;  %v7312_v58 = vld [vmem:[#allocation2 + $0x2c] sm:$0x1]  ;;  %v5900_v18 = vrot.slane %v1623_v48, 9 }
  0xaa   : > { %9111 = vst [vmem:[#allocation22_spill] sm:$0xff] %v7312_v58  ;;  %v3167_v63 = vsel %vm7049_vm3, %v3158_v45, %v3166_v28  ;;  %v3129_v38 = vor.u32 %v3128_v19, %v3125_v41  ;;  %v3139_v20 = vrot.slane %v3137_v60, 5  ;;  %v1622_v23 = vld [vmem:[#allocation2 + $0x24] sm:$0xe]  ;;  %v1675_v61 = vrot.slane %v7300_v7, 5 }
  0xab   : > { %v3157_v21 = vsel %vm7049_vm3, %v3153_v36, %v3156_v8  ;;  %v3135_v43 = vrot.slane %v3133_v31, 4  ;;  %v3142_v5 = vrot.slane %v3140_v49, 6  ;;  %v1678_v44 = vrot.slane %v7306_v30, 5  ;;  %v7404_v39 = vld [vmem:[#allocation2 + $0x40] sm:$0xf] }
  0xac   : > { %v5990_v13 = vcombine.low %v3157_v21, %v3167_v63  ;;  %v3130_v50 = vrot.slane %v3129_v38, 4  ;;  %v1676_v45 = vsel %vm7007_vm1, %v5900_v18, %v1675_v61  ;;  %v1677_v28 = vrot.slane %v1675_v61, 4  ;;  %v1711_v38 = vld [vmem:[#allocation2 + $0x38] sm:$0x3]  ;;  %9119 = vst [vmem:[#allocation29_spill] sm:$0xff] %v7404_v39 }
  0xad   : > { %v3143_v2 = vor.u32 %v3142_v5, %v3139_v20  ;;  %v5899_v41 = vrot.slane %v1622_v23, 9  ;;  %v1668_v19 = vrot.slane %v7310_v51, 5  ;;  %v1671_v60 = vrot.slane %v7312_v58, 5  ;;  %v7496_v58 = vld [vmem:[#allocation2 + $0x58] sm:$0xf] }
  0xae   : > { %3396 = vrot.lane.b32.xlu1 %v5990_v13, %s6651_s30  ;;  %v3134_v8 = vsel %vm7049_vm3, %v3130_v50, %v3133_v31  ;;  %v9009_v63 = vshll.u32 %v7300_v7, 16  ;;  %v1679_v18 = vsel %vm7007_vm1, %v1677_v28, %v1678_v44  ;;  %v9008_v36 = vshrl.u32 %v7300_v7, 16  ;;  %9127 = vst [vmem:[#allocation35_spill] sm:$0xff] %v7496_v58 }
  0xaf   : > { %v3144_v20 = vsel %vm7049_vm3, %v3135_v43, %v3143_v2  ;;  %v1789_v49 = vshrl.u32 %v1623_v48, 16  ;;  %v5916_v5 = vcombine.low %v1676_v45, %v1679_v18  ;;  %v1669_v31 = vsel %vm7007_vm1, %v5899_v41, %v1668_v19  ;;  %v1710_v41 = vld [vmem:[#allocation2 + $0x2c] sm:$0x3] }
  0xb0   : > { %v5989_v21 = vcombine.low %v3134_v8, %v3144_v20  ;;  %v1670_v61 = vrot.slane %v1668_v19, 4  ;;  %v1792_v50 = vshll.u32 %v1623_v48, 16  ;;  %v1797_v40 = vrot.slane %v9008_v36, 5 }
  0xb1   : > { %v1791_v13 = vrot.slane %v1789_v49, 5  ;;  %v1798_v2 = vrot.slane %v9009_v63, 6  ;;  %v1803_v44 = vshrl.u32 %v1711_v38, 16  ;;  %v1806_v45 = vshll.u32 %v1711_v38, 16 }
  0xb2   : > { %3394 = vrot.lane.b32.xlu0 %v5989_v21, %s6651_s30  ;;  %1957 = vrot.lane.b32.xlu1 %v5916_v5, %s6650_s0  ;;  %v1672_v43 = vsel %vm7007_vm1, %v1670_v61, %v1671_v60  ;;  %v9012_v28 = vshll.u32 %v7310_v51, 16  ;;  %v1794_v48 = vrot.slane %v1792_v50, 6  ;;  %v9011_v20 = vshrl.u32 %v7310_v51, 16  ;;  %v7346_v21 = vld [vmem:[#allocation2 + $0x4c] sm:$0xf] }
  0xb3   : > { %v5915_v8 = vcombine.low %v1669_v31, %v1672_v43  ;;  %v1799_v19 = vor.u32 %v1798_v2, %v1797_v40  ;;  %v1805_v18 = vrot.slane %v1803_v44, 5  ;;  %v1808_v49 = vrot.slane %v1806_v45, 6  ;;  %9112 = vst [vmem:[#allocation23_spill] sm:$0xff] %v7346_v21  ;;  %v7352_v61 = vld [vmem:[#allocation2 + $0x50] sm:$0x1] }
  0xb4   : > { %v1766_v36 = vshrl.u32 %v1622_v23, 16  ;;  %v1769_v63 = vshll.u32 %v1622_v23, 16  ;;  %v1795_v5 = vor.u32 %v1794_v48, %v1791_v13  ;;  %v1774_v60 = vrot.slane %v9011_v20, 5  ;;  %9113 = vst [vmem:[#allocation24_spill] sm:$0xff] %v7352_v61  ;;  %v3029_v31 = vld [vmem:[#allocation2 + $0x48] sm:$0xe] }
  0xb5   : > { %v1801_v22 = vrot.slane %v1799_v19, 4  ;;  %v1775_v38 = vrot.slane %v9012_v28, 6  ;;  %v1809_v40 = vor.u32 %v1808_v49, %v1805_v18  ;;  %v1780_v43 = vshrl.u32 %v1710_v41, 16  ;;  %v7356_v48 = vld [vmem:[#allocation2 + $0x40] sm:$0xf] }
  0xb6   : > { %1955 = vrot.lane.b32.xlu0 %v5915_v8, %s6650_s0  ;;  %v1768_v50 = vrot.slane %v1766_v36, 5  ;;  %v1771_v2 = vrot.slane %v1769_v63, 6  ;;  %v1796_v44 = vrot.slane %v1795_v5, 4  ;;  %v1783_v45 = vshll.u32 %v1710_v41, 16  ;;  %9114 = vst [vmem:[#allocation25_spill] sm:$0xff] %v7356_v48 }
  0xb7   : > { %v1776_v13 = vor.u32 %v1775_v38, %v1774_v60  ;;  %v1810_v20 = vsel %vm7049_vm3, %v1801_v22, %v1809_v40  ;;  %v1782_v14 = vrot.slane %v1780_v43, 5  ;;  %v5968_v51 = vrot.slane %v3029_v31, 9  ;;  %v7363_v49 = vld [vmem:[#allocation2 + $0x44] sm:$0x1]  ;;  %v3028_v23 = vld [vmem:[#allocation2 + $0x3c] sm:$0xe] }
  0xb8   : > { %v1772_v28 = vor.u32 %v1771_v2, %v1768_v50  ;;  %v1800_v8 = vsel %vm7049_vm3, %v1796_v44, %v1799_v19  ;;  %v1785_v36 = vrot.slane %v1783_v45, 6  ;;  %v3081_v63 = vrot.slane %v7346_v21, 5  ;;  %9115 = vst [vmem:[#allocation26_spill] sm:$0xff] %v7363_v49  ;;  %v3117_v45 = vld [vmem:[#allocation2 + $0x50] sm:$0x3] }
  0xb9   : > { %v1778_v18 = vrot.slane %v1776_v13, 4  ;;  %v5924_v41 = vcombine.low %v1800_v8, %v1810_v20  ;;  %v3084_v38 = vrot.slane %v7352_v61, 5  ;;  %v5967_v2 = vrot.slane %v3028_v23, 9 }
  0xba   : > { %v1773_v60 = vrot.slane %v1772_v28, 4  ;;  %v1786_v22 = vor.u32 %v1785_v36, %v1782_v14  ;;  %v3082_v40 = vsel %vm7007_vm1, %v5968_v51, %v3081_v63  ;;  %v3083_v50 = vrot.slane %v3081_v63, 4 }
  0xbb   : > { %1997 = vrot.lane.b32.xlu1 %v5924_v41, %s6651_s30  ;;  %v3074_v43 = vrot.slane %v7356_v48, 5  ;;  %v3077_v44 = vrot.slane %v7363_v49, 5  ;;  %v9016_v51 = vshrl.u32 %v7346_v21, 16  ;;  %v3192_v8 = vshrl.u32 %v3029_v31, 16 }
  0xbc   : > { %v1777_v19 = vsel %vm7049_vm3, %v1773_v60, %v1776_v13  ;;  %v1787_v20 = vsel %vm7049_vm3, %v1778_v18, %v1786_v22  ;;  %v3085_v14 = vsel %vm7007_vm1, %v3083_v50, %v3084_v38  ;;  %v3195_v5 = vshll.u32 %v3029_v31, 16 }
  0xbd   : > { %v5923_v36 = vcombine.low %v1777_v19, %v1787_v20  ;;  %v5984_v63 = vcombine.low %v3082_v40, %v3085_v14  ;;  %v3075_v13 = vsel %vm7007_vm1, %v5967_v2, %v3074_v43  ;;  %v3076_v41 = vrot.slane %v3074_v43, 4  ;;  %v3116_v14 = vld [vmem:[#allocation2 + $0x44] sm:$0x3] }
  0xbe   : > { %v3194_v60 = vrot.slane %v3192_v8, 5  ;;  %v3200_v28 = vrot.slane %v9016_v51, 5  ;;  %v9116_v18 = vshll.u32 %v7346_v21, 16  ;;  %v3206_v40 = vshrl.u32 %v3117_v45, 16 }
  0xbf   : > { %1995 = vrot.lane.b32.xlu0 %v5923_v36, %s6651_s30  ;;  %3360 = vrot.lane.b32.xlu1 %v5984_v63, %s6650_s0  ;;  %v3078_v38 = vsel %vm7007_vm1, %v3076_v41, %v3077_v44  ;;  %v3209_v50 = vshll.u32 %v3117_v45, 16  ;;  %v9024_v2 = vshll.u32 %v7356_v48, 16  ;;  %v3197_v43 = vrot.slane %v3195_v5, 6  ;;  %v7392_v36 = vld [vmem:[#allocation2 + $0x4c] sm:$0xf] }
  0xc0   : > { %v3201_v22 = vrot.slane %v9116_v18, 6  ;;  %v5983_v19 = vcombine.low %v3075_v13, %v3078_v38  ;;  %v9021_v20 = vshrl.u32 %v7356_v48, 16  ;;  %v3208_v8 = vrot.slane %v3206_v40, 5  ;;  %9117 = vst [vmem:[#allocation27_spill] sm:$0xff] %v7392_v36  ;;  %v7398_v13 = vld [vmem:[#allocation2 + $0x50] sm:$0x1] }
  0xc1   : > { %v3211_v51 = vrot.slane %v3209_v50, 6  ;;  %v3169_v18 = vshrl.u32 %v3028_v23, 16  ;;  %v3172_v21 = vshll.u32 %v3028_v23, 16  ;;  %v3198_v63 = vor.u32 %v3197_v43, %v3194_v60  ;;  %9118 = vst [vmem:[#allocation28_spill] sm:$0xff] %v7398_v13  ;;  %v1625_v38 = vld [vmem:[#allocation2 + $0x48] sm:$0xe] }
  0xc2   : > { %v3202_v31 = vor.u32 %v3201_v22, %v3200_v28  ;;  %v3177_v44 = vrot.slane %v9021_v20, 5  ;;  %v3178_v45 = vrot.slane %v9024_v2, 6  ;;  %v3183_v22 = vshrl.u32 %v3116_v14, 16 }
  0xc3   : > { %3358 = vrot.lane.b32.xlu0 %v5983_v19, %s6650_s0  ;;  %v3212_v5 = vor.u32 %v3211_v51, %v3208_v8  ;;  %v3171_v28 = vrot.slane %v3169_v18, 5  ;;  %v3174_v41 = vrot.slane %v3172_v21, 6  ;;  %v3199_v40 = vrot.slane %v3198_v63, 4  ;;  %v7409_v18 = vld [vmem:[#allocation2 + $0x44] sm:$0x1] }
  0xc4   : > { %v3204_v7 = vrot.slane %v3202_v31, 4  ;;  %v3179_v60 = vor.u32 %v3178_v45, %v3177_v44  ;;  %v3186_v50 = vshll.u32 %v3116_v14, 16  ;;  %v3185_v48 = vrot.slane %v3183_v22, 5  ;;  %9120 = vst [vmem:[#allocation30_spill] sm:$0xff] %v7409_v18  ;;  %v1624_v45 = vld [vmem:[#allocation2 + $0x3c] sm:$0xe] }
  0xc5   : > { %v3175_v20 = vor.u32 %v3174_v41, %v3171_v28  ;;  %v5902_v2 = vrot.slane %v1625_v38, 9  ;;  %v3203_v51 = vsel %vm7049_vm3, %v3199_v40, %v3202_v31  ;;  %v1689_v8 = vrot.slane %v7392_v36, 5 }
  0xc6   : > { %v3213_v43 = vsel %vm7049_vm3, %v3204_v7, %v3212_v5  ;;  %v3181_v19 = vrot.slane %v3179_v60, 4  ;;  %v3188_v21 = vrot.slane %v3186_v50, 6  ;;  %v1692_v7 = vrot.slane %v7398_v13, 5 }
  0xc7   : > { %v5992_v14 = vcombine.low %v3203_v51, %v3213_v43  ;;  %v3176_v44 = vrot.slane %v3175_v20, 4  ;;  %v1690_v28 = vsel %vm7007_vm1, %v5902_v2, %v1689_v8  ;;  %v1691_v41 = vrot.slane %v1689_v8, 4  ;;  %v1713_v51 = vld [vmem:[#allocation2 + $0x50] sm:$0x3] }
  0xc8   : > { %v3189_v5 = vor.u32 %v3188_v21, %v3185_v48  ;;  %v5901_v22 = vrot.slane %v1624_v45, 9  ;;  %v1682_v40 = vrot.slane %v7404_v39, 5  ;;  %v1685_v50 = vrot.slane %v7409_v18, 5 }
  0xc9   : > { %3400 = vrot.lane.b32.xlu1 %v5992_v14, %s6651_s30  ;;  %v3180_v31 = vsel %vm7049_vm3, %v3176_v44, %v3179_v60  ;;  %v1693_v48 = vsel %vm7007_vm1, %v1691_v41, %v1692_v7  ;;  %v9027_v2 = vshrl.u32 %v7392_v36, 16  ;;  %v1835_v21 = vshrl.u32 %v1625_v38, 16 }
  0xca   : > { %v3190_v43 = vsel %vm7049_vm3, %v3181_v19, %v3189_v5  ;;  %v5918_v14 = vcombine.low %v1690_v28, %v1693_v48  ;;  %v1683_v60 = vsel %vm7007_vm1, %v5901_v22, %v1682_v40  ;;  %v1684_v44 = vrot.slane %v1682_v40, 4  ;;  %v1712_v48 = vld [vmem:[#allocation2 + $0x44] sm:$0x3] }
  0xcb   : > { %v5991_v8 = vcombine.low %v3180_v31, %v3190_v43  ;;  %v1837_v63 = vrot.slane %v1835_v21, 5  ;;  %v1838_v23 = vshll.u32 %v1625_v38, 16  ;;  %v1843_v20 = vrot.slane %v9027_v2, 5 }
  0xcc   : > { %v9121_v19 = vshll.u32 %v7392_v36, 16  ;;  %v1686_v7 = vsel %vm7007_vm1, %v1684_v44, %v1685_v50  ;;  %v1849_v28 = vshrl.u32 %v1713_v51, 16  ;;  %v1852_v41 = vshll.u32 %v1713_v51, 16  ;;  %v7442_v51 = vld [vmem:[#allocation2 + $0x64] sm:$0xf] }
  0xcd   : > { %3398 = vrot.lane.b32.xlu0 %v5991_v8, %s6651_s30  ;;  %1961 = vrot.lane.b32.xlu1 %v5918_v14, %s6650_s0  ;;  %v9032_v22 = vshll.u32 %v7404_v39, 16  ;;  %v5917_v31 = vcombine.low %v1683_v60, %v1686_v7  ;;  %v1840_v40 = vrot.slane %v1838_v23, 6  ;;  %v9031_v43 = vshrl.u32 %v7404_v39, 16  ;;  %9122 = vst [vmem:[#allocation31_spill] sm:$0xff] %v7442_v51 }
  0xce   : > { %v1844_v5 = vrot.slane %v9121_v19, 6  ;;  %v1851_v21 = vrot.slane %v1849_v28, 5  ;;  %v1854_v2 = vrot.slane %v1852_v41, 6  ;;  %v1812_v19 = vshrl.u32 %v1624_v45, 16  ;;  %v3031_v41 = vld [vmem:[#allocation2 + $0x60] sm:$0xe] }
  0xcf   : > { %v1815_v36 = vshll.u32 %v1624_v45, 16  ;;  %v1841_v8 = vor.u32 %v1840_v40, %v1837_v63  ;;  %v1820_v14 = vrot.slane %v9031_v43, 5  ;;  %v1821_v50 = vrot.slane %v9032_v22, 6 }
  0xd0   : > { %v1845_v38 = vor.u32 %v1844_v5, %v1843_v20  ;;  %v1855_v23 = vor.u32 %v1854_v2, %v1851_v21  ;;  %v1814_v20 = vrot.slane %v1812_v19, 5  ;;  %v1826_v44 = vshrl.u32 %v1712_v48, 16  ;;  %v7445_v5 = vld [vmem:[#allocation2 + $0x68] sm:$0x1]  ;;  %v7455_v19 = vld [vmem:[#allocation2 + $0x5c] sm:$0x1] }
  0xd1   : > { %1959 = vrot.lane.b32.xlu0 %v5917_v31, %s6650_s0  ;;  %v1817_v60 = vrot.slane %v1815_v36, 6  ;;  %9123 = vst [vmem:[#allocation32_spill] sm:$0xff] %v7445_v5  ;;  %v1842_v63 = vrot.slane %v1841_v8, 4  ;;  %v1822_v7 = vor.u32 %v1821_v50, %v1820_v14  ;;  %v1829_v28 = vshll.u32 %v1712_v48, 16  ;;  %v3030_v50 = vld [vmem:[#allocation2 + $0x54] sm:$0xe] }
  0xd2   : > { %v1847_v30 = vrot.slane %v1845_v38, 4  ;;  %v1828_v22 = vrot.slane %v1826_v44, 5  ;;  %v5970_v39 = vrot.slane %v3031_v41, 9  ;;  %v3095_v21 = vrot.slane %v7442_v51, 5 }
  0xd3   : > { %v1818_v43 = vor.u32 %v1817_v60, %v1814_v20  ;;  %v1846_v36 = vsel %vm7049_vm3, %v1842_v63, %v1845_v38  ;;  %v1824_v2 = vrot.slane %v1822_v7, 4  ;;  %v1831_v31 = vrot.slane %v1829_v28, 6 }
  0xd4   : > { %v1856_v40 = vsel %vm7049_vm3, %v1847_v30, %v1855_v23  ;;  %v3098_v30 = vrot.slane %v7445_v5, 5  ;;  %v3096_v20 = vsel %vm7007_vm1, %v5970_v39, %v3095_v21  ;;  %v3097_v60 = vrot.slane %v3095_v21, 4 }
  0xd5   : > { %v5926_v8 = vcombine.low %v1846_v36, %v1856_v40  ;;  %v1819_v14 = vrot.slane %v1818_v43, 4  ;;  %v1832_v23 = vor.u32 %v1831_v31, %v1828_v22  ;;  %v5969_v44 = vrot.slane %v3030_v50, 9  ;;  %v3119_v36 = vld [vmem:[#allocation2 + $0x68] sm:$0x3] }
  0xd6   : > { %v3088_v63 = vrot.slane %v7450_v29, 5  ;;  %v3091_v28 = vrot.slane %v7455_v19, 5  ;;  %v3099_v22 = vsel %vm7007_vm1, %v3097_v60, %v3098_v30  ;;  %v9036_v39 = vshrl.u32 %v7442_v51, 16 }
  0xd7   : > { %2001 = vrot.lane.b32.xlu1 %v5926_v8, %s6651_s30  ;;  %v1823_v38 = vsel %vm7049_vm3, %v1819_v14, %v1822_v7  ;;  %v1833_v40 = vsel %vm7049_vm3, %v1824_v2, %v1832_v23  ;;  %v3238_v31 = vshrl.u32 %v3031_v41, 16  ;;  %v5986_v8 = vcombine.low %v3096_v20, %v3099_v22  ;;  %v3118_v22 = vld [vmem:[#allocation2 + $0x5c] sm:$0x3] }
  0xd8   : > { %v5925_v21 = vcombine.low %v1823_v38, %v1833_v40  ;;  %v3089_v7 = vsel %vm7007_vm1, %v5969_v44, %v3088_v63  ;;  %v3090_v14 = vrot.slane %v3088_v63, 4  ;;  %v3241_v45 = vshll.u32 %v3031_v41, 16 }
  0xd9   : > { %v3240_v48 = vrot.slane %v3238_v31, 5  ;;  %v3246_v43 = vrot.slane %v9036_v39, 5  ;;  %v9125_v2 = vshll.u32 %v7442_v51, 16  ;;  %v3252_v20 = vshrl.u32 %v3119_v36, 16 }
  0xda   : > { %1999 = vrot.lane.b32.xlu0 %v5925_v21, %s6651_s30  ;;  %v3092_v30 = vsel %vm7007_vm1, %v3090_v14, %v3091_v28  ;;  %v3255_v60 = vshll.u32 %v3119_v36, 16  ;;  %v9041_v44 = vshll.u32 %v7450_v29, 16  ;;  %v3243_v63 = vrot.slane %v3241_v45, 6  ;;  %v7488_v36 = vld [vmem:[#allocation2 + $0x64] sm:$0xf] }
  0xdb   : > { %v3247_v23 = vrot.slane %v9125_v2, 6  ;;  %3364 = vrot.lane.b32.xlu1 %v5986_v8, %s6650_s0  ;;  %v5985_v38 = vcombine.low %v3089_v7, %v3092_v30  ;;  %v9040_v40 = vshrl.u32 %v7450_v29, 16  ;;  %v3254_v31 = vrot.slane %v3252_v20, 5  ;;  %9126 = vst [vmem:[#allocation34_spill] sm:$0xff] %v7488_v36 }
  0xdc   : > { %v3257_v39 = vrot.slane %v3255_v60, 6  ;;  %v3215_v2 = vshrl.u32 %v3030_v50, 16  ;;  %v3218_v51 = vshll.u32 %v3030_v50, 16  ;;  %v3244_v21 = vor.u32 %v3243_v63, %v3240_v48  ;;  %v1627_v60 = vld [vmem:[#allocation2 + $0x60] sm:$0xe] }
  0xdd   : > { %v3248_v41 = vor.u32 %v3247_v23, %v3246_v43  ;;  %v3223_v8 = vrot.slane %v9040_v40, 5  ;;  %v3224_v28 = vrot.slane %v9041_v44, 6  ;;  %v3229_v14 = vshrl.u32 %v3118_v22, 16  ;;  %v7491_v23 = vld [vmem:[#allocation2 + $0x68] sm:$0x1] }
  0xde   : > { %3362 = vrot.lane.b32.xlu0 %v5985_v38, %s6650_s0  ;;  %v3258_v45 = vor.u32 %v3257_v39, %v3254_v31  ;;  %v3217_v43 = vrot.slane %v3215_v2, 5  ;;  %v3220_v7 = vrot.slane %v3218_v51, 6  ;;  %v3245_v48 = vrot.slane %v3244_v21, 4  ;;  %v7501_v2 = vld [vmem:[#allocation2 + $0x5c] sm:$0x1] }
  0xdf   : > { %v3250_v61 = vrot.slane %v3248_v41, 4  ;;  %v3225_v30 = vor.u32 %v3224_v28, %v3223_v8  ;;  %v3232_v20 = vshll.u32 %v3118_v22, 16  ;;  %v3231_v44 = vrot.slane %v3229_v14, 5  ;;  %v1626_v28 = vld [vmem:[#allocation2 + $0x54] sm:$0xe] }
  0xe0   : > { %v3221_v40 = vor.u32 %v3220_v7, %v3217_v43  ;;  %v5904_v29 = vrot.slane %v1627_v60, 9  ;;  %v3249_v51 = vsel %vm7049_vm3, %v3245_v48, %v3248_v41  ;;  %v1703_v31 = vrot.slane %v7488_v36, 5 }
  0xe1   : > { %v3259_v63 = vsel %vm7049_vm3, %v3250_v61, %v3258_v45  ;;  %v3227_v39 = vrot.slane %v3225_v30, 4  ;;  %v3234_v38 = vrot.slane %v3232_v20, 6  ;;  %v1706_v61 = vrot.slane %v7491_v23, 5 }
  0xe2   : > { %v5994_v21 = vcombine.low %v3249_v51, %v3259_v63  ;;  %v3222_v8 = vrot.slane %v3221_v40, 4  ;;  %v1704_v43 = vsel %vm7007_vm1, %v5904_v29, %v1703_v31  ;;  %v1705_v7 = vrot.slane %v1703_v31, 4  ;;  %v1715_v51 = vld [vmem:[#allocation2 + $0x68] sm:$0x3] }
  0xe3   : > { %v3235_v45 = vor.u32 %v3234_v38, %v3231_v44  ;;  %v5903_v14 = vrot.slane %v1626_v28, 9  ;;  %v1696_v48 = vrot.slane %v7496_v58, 5  ;;  %v1699_v20 = vrot.slane %v7501_v2, 5 }
  0xe4   : > { %3404 = vrot.lane.b32.xlu1 %v5994_v21, %s6651_s30  ;;  %v3226_v41 = vsel %vm7049_vm3, %v3222_v8, %v3225_v30  ;;  %v1707_v44 = vsel %vm7007_vm1, %v1705_v7, %v1706_v61  ;;  %v9045_v29 = vshrl.u32 %v7488_v36, 16  ;;  %v1881_v38 = vshrl.u32 %v1627_v60, 16 }
  0xe5   : > { %v3236_v63 = vsel %vm7049_vm3, %v3227_v39, %v3235_v45  ;;  %v5920_v21 = vcombine.low %v1704_v43, %v1707_v44  ;;  %v1697_v30 = vsel %vm7007_vm1, %v5903_v14, %v1696_v48  ;;  %v1698_v8 = vrot.slane %v1696_v48, 4 }
  0xe6   : > { %v5993_v31 = vcombine.low %v3226_v41, %v3236_v63  ;;  %v1883_v22 = vrot.slane %v1881_v38, 5  ;;  %v1884_v50 = vshll.u32 %v1627_v60, 16  ;;  %v1889_v40 = vrot.slane %v9045_v29, 5  ;;  %v7529_v41 = vpop.permute.xlu1 %2472  ;;  %v1714_v38 = vld [vmem:[#allocation2 + $0x5c] sm:$0x3] }
  0xe7   : > { %v9128_v39 = vshll.u32 %v7488_v36, 16  ;;  %v1700_v61 = vsel %vm7007_vm1, %v1698_v8, %v1699_v20  ;;  %v1895_v43 = vshrl.u32 %v1715_v51, 16  ;;  %v1898_v7 = vshll.u32 %v1715_v51, 16  ;;  %v7536_v8 = vld [vmem:[#allocation2 + $0x7c] sm:$0xf] }
  0xe8   : > { %3402 = vrot.lane.b32.xlu0 %v5993_v31, %s6651_s30  ;;  %1965 = vrot.lane.b32.xlu1 %v5920_v21, %s6650_s0  ;;  %v9050_v14 = vshll.u32 %v7496_v58, 16  ;;  %v5919_v60 = vcombine.low %v1697_v30, %v1700_v61  ;;  %v1886_v48 = vrot.slane %v1884_v50, 6  ;;  %v9049_v44 = vshrl.u32 %v7496_v58, 16  ;;  %9129 = vst [vmem:[#allocation36_spill] sm:$0xff] %v7536_v8  ;;  %v7539_v61 = vld [vmem:[#allocation2 + $0x80] sm:$0x1] }
  0xe9   : > { %v1890_v45 = vrot.slane %v9128_v39, 6  ;;  %v1897_v39 = vrot.slane %v1895_v43, 5  ;;  %v1900_v29 = vrot.slane %v1898_v7, 6  ;;  %v1858_v31 = vshrl.u32 %v1626_v28, 16  ;;  %v7541_v43 = vpop.permute.xlu0 %2466 }
  0xea   : > { %v1861_v36 = vshll.u32 %v1626_v28, 16  ;;  %v1887_v21 = vor.u32 %v1886_v48, %v1883_v22  ;;  %v1866_v20 = vrot.slane %v9049_v44, 5  ;;  %v1867_v51 = vrot.slane %v9050_v14, 6  ;;  %v3033_v44 = vld [vmem:[#allocation2 + $0x78] sm:$0xe] }
  0xeb   : > { %v1891_v63 = vor.u32 %v1890_v45, %v1889_v40  ;;  %v1901_v50 = vor.u32 %v1900_v29, %v1897_v39  ;;  %v1860_v40 = vrot.slane %v1858_v31, 5  ;;  %v1872_v45 = vshrl.u32 %v1714_v38, 16  ;;  %v7546_v29 = vld [vmem:[#allocation2 + $0x70] sm:$0xf] }
  0xec   : > { %1963 = vrot.lane.b32.xlu0 %v5919_v60, %s6650_s0  ;;  %v1863_v30 = vrot.slane %v1861_v36, 6  ;;  %v1888_v28 = vrot.slane %v1887_v21, 4  ;;  %v1868_v7 = vor.u32 %v1867_v51, %v1866_v20  ;;  %v1875_v48 = vshll.u32 %v1714_v38, 16  ;;  %9130 = vst [vmem:[#allocation37_spill] sm:$0xff] %v7546_v29  ;;  %v7548_v36 = vpop.permute.xlu1 %2506  ;;  %v7553_v20 = vld [vmem:[#allocation2 + $0x74] sm:$0x1] }
  0xed   : > { %v1893_v13 = vrot.slane %v1891_v63, 4  ;;  %v1874_v49 = vrot.slane %v1872_v45, 5  ;;  %v5972_v60 = vrot.slane %v3033_v44, 9  ;;  %v3109_v21 = vrot.slane %v7536_v8, 5 }
  0xee   : > { %v1864_v58 = vor.u32 %v1863_v30, %v1860_v40  ;;  %v1892_v39 = vsel %vm7049_vm3, %v1888_v28, %v1891_v63  ;;  %v1870_v31 = vrot.slane %v1868_v7, 4  ;;  %v1877_v10 = vrot.slane %v1875_v48, 6  ;;  %v3032_v40 = vld [vmem:[#allocation2 + $0x6c] sm:$0xe] }
  0xef   : > { %v1902_v14 = vsel %vm7049_vm3, %v1893_v13, %v1901_v50  ;;  %v3112_v50 = vrot.slane %v7539_v61, 5  ;;  %v3110_v45 = vsel %vm7007_vm1, %v5972_v60, %v3109_v21  ;;  %v3111_v22 = vrot.slane %v3109_v21, 4 }
  0xf0   : > { %v5928_v51 = vcombine.low %v1892_v39, %v1902_v14  ;;  %v1865_v13 = vrot.slane %v1864_v58, 4  ;;  %v1878_v30 = vor.u32 %v1877_v10, %v1874_v49  ;;  %v5971_v18 = vrot.slane %v3032_v40, 9  ;;  %v7565_v14 = vpop.permute.xlu0 %2468  ;;  %v3121_v39 = vld [vmem:[#allocation2 + $0x80] sm:$0x3]  ;;  %v7574_v5 = vpop.permute.xlu1 %2508 }
  0xf1   : > { %v3102_v28 = vrot.slane %v7546_v29, 5  ;;  %v3105_v48 = vrot.slane %v7553_v20, 5  ;;  %v3113_v49 = vsel %vm7007_vm1, %v3111_v22, %v3112_v50  ;;  %v9059_v60 = vshrl.u32 %v7536_v8, 16 }
  0xf2   : > { %2005 = vrot.lane.b32.xlu1 %v5928_v51, %s6651_s30  ;;  %v1869_v63 = vsel %vm7049_vm3, %v1865_v13, %v1868_v7  ;;  %v1879_v10 = vsel %vm7049_vm3, %v1870_v31, %v1878_v30  ;;  %v3284_v21 = vshrl.u32 %v3033_v44, 16  ;;  %v5988_v7 = vcombine.low %v3110_v45, %v3113_v49 }
  0xf3   : > { %v5927_v51 = vcombine.low %v1869_v63, %v1879_v10  ;;  %v3103_v13 = vsel %vm7007_vm1, %v5971_v18, %v3102_v28  ;;  %v3104_v38 = vrot.slane %v3102_v28, 4  ;;  %v3287_v25 = vshll.u32 %v3033_v44, 16 }
  0xf4   : > { %v3286_v58 = vrot.slane %v3284_v21, 5  ;;  %v3292_v31 = vrot.slane %v9059_v60, 5  ;;  %v9131_v30 = vshll.u32 %v7536_v8, 16  ;;  %v3298_v45 = vshrl.u32 %v3121_v39, 16  ;;  %v3120_v21 = vld [vmem:[#allocation2 + $0x74] sm:$0x3] }
  0xf5   : > { %2003 = vrot.lane.b32.xlu0 %v5927_v51, %s6651_s30  ;;  %v3106_v50 = vsel %vm7007_vm1, %v3104_v38, %v3105_v48  ;;  %v3301_v18 = vshll.u32 %v3121_v39, 16  ;;  %v9066_v63 = vshll.u32 %v7546_v29, 16  ;;  %v3289_v10 = vrot.slane %v3287_v25, 6  ;;  %v7586_v51 = vpop.permute.xlu0 %2470  ;;  %v7595_v25 = vld [vmem:[%s9132_s1] sm:$0x3] }
  0xf6   : > { %v3293_v22 = vrot.slane %v9131_v30, 6  ;;  %3368 = vrot.lane.b32.xlu1 %v5988_v7, %s6650_s0  ;;  %v5987_v28 = vcombine.low %v3103_v13, %v3106_v50  ;;  %v9065_v49 = vshrl.u32 %v7546_v29, 16  ;;  %v3300_v60 = vrot.slane %v3298_v45, 5 }
  0xf7   : > { %v3303_v8 = vrot.slane %v3301_v18, 6  ;;  %v3261_v30 = vshrl.u32 %v3032_v40, 16  ;;  %v3264_v34 = vshll.u32 %v3032_v40, 16  ;;  %v3290_v7 = vor.u32 %v3289_v10, %v3286_v58  ;;  %v7598_v58 = vpop.permute.xlu1 %2512 }
  0xf8   : > { %v3294_v44 = vor.u32 %v3293_v22, %v3292_v31  ;;  %v3269_v38 = vrot.slane %v9065_v49, 5  ;;  %v3270_v48 = vrot.slane %v9066_v63, 6  ;;  %v3275_v31 = vshrl.u32 %v3120_v21, 16  ;;  %v4284_v22 = vld [vmem:[#allocation2 + $0x24] sm:$0xc] }
  0xf9   : > { %3366 = vrot.lane.b32.xlu0 %v5987_v28, %s6650_s0  ;;  %v3304_v39 = vor.u32 %v3303_v8, %v3300_v60  ;;  %v3263_v13 = vrot.slane %v3261_v30, 5  ;;  %v3266_v40 = vrot.slane %v3264_v34, 6  ;;  %v3291_v50 = vrot.slane %v3290_v7, 4  ;;  %v4286_v30 = vld [vmem:[#allocation2 + $0x3c] sm:$0xc] }
  0xfa   : > { %v3296_v16 = vrot.slane %v3294_v44, 4  ;;  %v3271_v45 = vor.u32 %v3270_v48, %v3269_v38  ;;  %v3278_v18 = vshll.u32 %v3120_v21, 16  ;;  %vm1228_vm4 = vcmask 1041408   ;;  %v6589_v38 = vld [vmem:[#allocation2 + $0x28] sm:$0xf] }
  0xfb   : > { %v3267_v49 = vor.u32 %v3266_v40, %v3263_v13  ;;  %v3277_v63 = vrot.slane %v3275_v31, 5  ;;  %vm4055_vm5 = vcmask 1045508   ;;  %6502 = vmatprep.subr.msk.bf16.mxu0 %vm1228_vm4, %v7595_v25  ;;  %v3295_v34 = vsel %vm7049_vm3, %v3291_v50, %v3294_v44  ;;  %v7611_v40 = vpop.permute.xlu0 %2510  ;;  %v6591_v44 = vld [vmem:[#allocation2 + $0x1c] sm:$0xf]  ;;  %v6577_v28 = vld [vmem:[%s8972_s9] sm:$0x3f]  }
  0xfc   : > { %v3305_v10 = vsel %vm7049_vm3, %v3296_v16, %v3304_v39  ;;  %v3273_v8 = vrot.slane %v3271_v45, 4  ;;  %v3280_v60 = vrot.slane %v3278_v18, 6  ;;  %vm7607_vm6 = vmor %vm1228_vm4, %vm4055_vm5  ;;  %v6067_v21 = vrot.slane %v4284_v22, 10  ;;  %v6590_v39 = vld [vmem:[#allocation2 + $0x2c] sm:$0x3] }
  0xfd   : > { %v5996_v16 = vcombine.low %v3295_v34, %v3305_v10  ;;  %v3268_v7 = vrot.slane %v3267_v49, 4  ;;  %v4316_v48 = vrot.slane %v6589_v38, 6  ;;  %v4319_v13 = vrot.slane %v6590_v39, 6  ;;  %v6592_v18 = vld [vmem:[#allocation2 + $0x20] sm:$0x3]  ;;  %v7618_v38 = vpop.permute.xlu1 %2476 }
  0xfe   : > { %v3281_v31 = vor.u32 %v3280_v60, %v3277_v63  ;;  %v6066_v29 = vrot.slane %v4283_v47, 10  ;;  %v4309_v50 = vrot.slane %v6591_v44, 6  ;;  %v4312_v62 = vrot.slane %v6592_v18, 6  ;;  %v6593_v39 = vld [vmem:[#allocation2 + $0x40] sm:$0xf] }
  0xff   : > { %3408 = vrot.lane.b32.xlu1 %v5996_v16, %s6651_s30  ;;  %v3272_v22 = vsel %vm7049_vm3, %v3268_v7, %v3271_v45  ;;  %v4317_v49 = vsel %vm7607_vm6, %v6067_v21, %v4316_v48  ;;  %v4318_v10 = vrot.slane %v4316_v48, 4  ;;  %v6069_v34 = vrot.slane %v4286_v30, 10  ;;  %v4288_v16 = vld [vmem:[#allocation2 + $0x54] sm:$0xc]  ;;  %v6594_v7 = vld [vmem:[#allocation2 + $0x44] sm:$0x3] }
 0x100   : > { %v3282_v47 = vsel %vm7049_vm3, %v3273_v8, %v3281_v31  ;;  %v4310_v63 = vsel %vm7607_vm6, %v6066_v29, %v4309_v50  ;;  %v4311_v60 = vrot.slane %v4309_v50, 4  ;;  %v4330_v44 = vrot.slane %v6593_v39, 6  ;;  %v4287_v30 = vld [vmem:[#allocation2 + $0x48] sm:$0xc]  ;;  %v6595_v50 = vld [vmem:[#allocation2 + $0x34] sm:$0xf] }
 0x101   : > { %v5995_v18 = vcombine.low %v3272_v22, %v3282_v47  ;;  %v4320_v45 = vsel %vm7607_vm6, %v4318_v10, %v4319_v13  ;;  %v4333_v21 = vrot.slane %v6594_v7, 6  ;;  %v6068_v48 = vrot.slane %v4285_v9, 10  ;;  %v6596_v47 = vld [vmem:[#allocation2 + $0x38] sm:$0x3]  ;;  %v4290_v10 = vld [vmem:[#allocation2 + $0x6c] sm:$0xc]  ;;  %v7631_v7 = vpop.permute.xlu0 %2474 }
 0x102   : > { %v6083_v4 = vcombine.low %v4317_v49, %v4320_v45  ;;  %v4313_v35 = vsel %vm7607_vm6, %v4311_v60, %v4312_v62  ;;  %v4331_v8 = vsel %vm7607_vm6, %v6069_v34, %v4330_v44  ;;  %v4332_v29 = vrot.slane %v4330_v44, 4  ;;  %v6597_v62 = vld [vmem:[#allocation2 + $0x58] sm:$0xf]  ;;  %v6598_v34 = vld [vmem:[#allocation2 + $0x5c] sm:$0x3] }
 0x103   : > { %3406 = vrot.lane.b32.xlu0 %v5995_v18, %s6651_s30  ;;  %v6082_v31 = vcombine.low %v4310_v63, %v4313_v35  ;;  %v4323_v22 = vrot.slane %v6595_v50, 6  ;;  %v4326_v39 = vrot.slane %v6596_v47, 6  ;;  %v6071_v13 = vrot.slane %v4288_v16, 10  ;;  %v6599_v35 = vld [vmem:[#allocation2 + $0x4c] sm:$0xf]  ;;  %v7638_v47 = vpop.permute.xlu1 %2516 }
 0x104   : > { %4429 = vrot.lane.b32.xlu1 %v6083_v4, %s6651_s30  ;;  %v4334_v9 = vsel %vm7607_vm6, %v4332_v29, %v4333_v21  ;;  %v4344_v49 = vrot.slane %v6597_v62, 6  ;;  %v4347_v60 = vrot.slane %v6598_v34, 6  ;;  %v6070_v44 = vrot.slane %v4287_v30, 10  ;;  %v4289_v50 = vld [vmem:[#allocation2 + $0x60] sm:$0xc] }
 0x105   : > { %v6085_v18 = vcombine.low %v4331_v8, %v4334_v9  ;;  %v4324_v63 = vsel %vm7607_vm6, %v6068_v48, %v4323_v22  ;;  %v4325_v45 = vrot.slane %v4323_v22, 4  ;;  %v4337_v16 = vrot.slane %v6599_v35, 6  ;;  %v6600_v21 = vld [vmem:[#allocation2 + $0x50] sm:$0x3] }
 0x106   : > { %v4345_v4 = vsel %vm7607_vm6, %v6071_v13, %v4344_v49  ;;  %v4346_v1 = vrot.slane %v4344_v49, 4  ;;  %v4340_v29 = vrot.slane %v6600_v21, 6  ;;  %v6073_v62 = vrot.slane %v4290_v10, 10  ;;  %v6601_v22 = vld [vmem:[#allocation2 + $0x70] sm:$0xf] }
 0x107   : > { %4427 = vrot.lane.b32.xlu0 %v6082_v31, %s6651_s30  ;;  %v4327_v30 = vsel %vm7607_vm6, %v4325_v45, %v4326_v39  ;;  %v4338_v48 = vsel %vm7607_vm6, %v6070_v44, %v4337_v16  ;;  %v4339_v8 = vrot.slane %v4337_v16, 4  ;;  %v4358_v9 = vrot.slane %v6601_v22, 6  ;;  %v6602_v49 = vld [vmem:[#allocation2 + $0x74] sm:$0x3]  ;;  %v2053_v21 = vld [vmem:[#allocation2 + $0x3c] sm:$0xf]  ;;  %v7654_v16 = vpop.permute.xlu0 %2514 }
 0x108   : > { %4433 = vrot.lane.b32.xlu1 %v6085_v18, %s6651_s30  ;;  %v6084_v34 = vcombine.low %v4324_v63, %v4327_v30  ;;  %v4348_v13 = vsel %vm7607_vm6, %v4346_v1, %v4347_v60  ;;  %v4361_v35 = vrot.slane %v6602_v49, 6  ;;  %v6072_v10 = vrot.slane %v4289_v50, 10  ;;  %v6603_v63 = vld [vmem:[#allocation2 + $0x64] sm:$0xf]  ;;  %v6604_v22 = vld [vmem:[#allocation2 + $0x68] sm:$0x3] }
 0x109   : > { %v6087_v31 = vcombine.low %v4345_v4, %v4348_v13  ;;  %v4341_v39 = vsel %vm7607_vm6, %v4339_v8, %v4340_v29  ;;  %v4359_v44 = vsel %vm7607_vm6, %v6073_v62, %v4358_v9  ;;  %v4360_v45 = vrot.slane %v4358_v9, 4  ;;  %v2050_v29 = vld [vmem:[#allocation2 + $0x18] sm:$0xf]  ;;  %v7662_v62 = vpop.permute.xlu1 %2480 }
 0x10a   : > { %v2950_v18 = vshll.u32 %v7455_v19, 16  ;;  %v4351_v30 = vrot.slane %v6603_v63, 6  ;;  %v4354_v1 = vrot.slane %v6604_v22, 6  ;;  %vm1203_vm7 = vcmask 31744   ;;  %v2051_v22 = vld [vmem:[#allocation2 + $0x24] sm:$0xf] }
 0x10b   : > { %4431 = vrot.lane.b32.xlu0 %v6084_v34, %s6651_s30  ;;  %v6086_v60 = vcombine.low %v4338_v48, %v4341_v39  ;;  %v4362_v50 = vsel %vm7607_vm6, %v4360_v45, %v4361_v35  ;;  %vm1425_vm8 = vsmask.f32 3328  ;;  %v2131_v4 = vshrl.u32 %v2053_v21, 16  ;;  %6312 = vmatprep.mubr.msk.bf16.mxu0 %vm1203_vm7, %v7037_v27 }
 0x10c   : > { %4437 = vrot.lane.b32.xlu1 %v6087_v31, %s6651_s30  ;;  %v6089_v8 = vcombine.low %v4359_v44, %v4362_v50  ;;  %v4352_v9 = vsel %vm7607_vm6, %v6072_v10, %v4351_v30  ;;  %v4353_v13 = vrot.slane %v4351_v30, 4  ;;  %v2134_v34 = vshll.u32 %v2053_v21, 16 }
 0x10d   : > { %vm1426_vm9 = vsmask.f32 7440  ;;  %v2133_v48 = vrot.slane %v2131_v4, 4  ;;  %v9135_v49 = vshll.u32 %v7001_v59, 16  ;;  %v9136_v39 = vshrl.u32 %v7001_v59, 16  ;;  %v7681_v59 = vpop.permute.xlu0 %2478 }
 0x10e   : > { %v4355_v27 = vsel %vm7607_vm6, %v4353_v13, %v4354_v1  ;;  %v2136_v63 = vrot.slane %v2134_v34, 5  ;;  %v2059_v31 = vshrl.u32 %v2050_v29, 16  ;;  %v2062_v44 = vshll.u32 %v2050_v29, 16  ;;  %vm7693_vm10 = vmor %vm1425_vm8, %vm1426_vm9 }
 0x10f   : > { %v7669_v35 = vrot.slane %v9135_v49, 5  ;;  %v2146_v45 = vrot.slane %v9136_v39, 4  ;;  %4435 = vrot.lane.b32.xlu0 %v6086_v60, %s6651_s30  ;;  %v6088_v10 = vcombine.low %v4352_v9, %v4355_v27  ;;  %v9137_v30 = vshll.u32 %v7014_v3, 16  ;;  %v7689_v27 = vpop.permute.xlu1 %2520 }
 0x110   : > { %v9138_v4 = vshrl.u32 %v7014_v3, 16  ;;  %4441 = vrot.lane.b32.xlu1 %v6089_v8, %s6651_s30  ;;  %v2137_v1 = vor.u32 %v2136_v63, %v2133_v48  ;;  %v2061_v29 = vrot.slane %v2059_v31, 4  ;;  %v2064_v13 = vrot.slane %v2062_v44, 5  ;;  %v4737_v3 = vld [vmem:[#allocation2 + $0x30] sm:$0xe] }
 0x111   : > { %v2147_v21 = vor.u32 %v2146_v45, %v7669_v35  ;;  %v2070_v50 = vrot.slane %v9137_v30, 5  ;;  %v1230_v9 = vsel %vm1228_vm4, %v7595_v25, 0  ;;  %v2083_v45 = vshrl.u32 %v2051_v22, 16  ;;  %v6562_v25 = vld [vmem:[%s8968_s5 + $0x8] sm:$0x3f]  }
 0x112   : > { %v2074_v49 = vrot.slane %v9138_v4, 4  ;;  %v2138_v30 = vrot.slane %v2137_v1, 4  ;;  %v2065_v8 = vor.u32 %v2064_v13, %v2061_v29  ;;  %6311 = vmatpush3.bf16.msra.mxu0 %v1230_v9  ;;  %v2086_v48 = vshll.u32 %v2051_v22, 16  ;;  %v7709_v22 = vld [vmem:[%s8968_s5] sm:$0x3f]   ;;  %v7724_v29 = vpop.permute.xlu0 %2518 }
 0x113   : > { %v7685_v34 = vrot.slane %v2147_v21, 4  ;;  %v9141_v63 = vshll.u32 %v7027_v17, 16  ;;  %v1592_v44 = vshll.u32 %v7501_v2, 16  ;;  %4439 = vrot.lane.b32.xlu0 %v6088_v10, %s6651_s30  ;;  %v2085_v4 = vrot.slane %v2083_v45, 4 }
 0x114   : > { %v2075_v60 = vor.u32 %v2074_v49, %v2070_v50  ;;  %v9142_v49 = vshrl.u32 %v7027_v17, 16  ;;  %v3022_v1 = vshll.u32 %v7539_v61, 16  ;;  %v2066_v13 = vrot.slane %v2065_v8, 4 }
 0x115   : > { %v2094_v31 = vrot.slane %v9141_v63, 5  ;;  %v2088_v9 = vrot.slane %v2086_v48, 5  ;;  %v2153_v10 = vsel %vm7693_vm10, %v7685_v34, %v7117_v15  ;;  %v9143_v45 = vshll.u32 %v7035_v26, 16  ;;  %6313 = vmatmul.mubr.msk.bf16.vlgmr.msra.gmra.mxu0 %vm1203_vm7, %v7070_v56  ;;  %v7736_v26 = vld [vmem:[%s8968_s5 + $0x10] sm:$0x3f]   ;;  %v6559_v56 = vld [vmem:[#allocation2 + $0x3c] sm:$0xff]  }
 0x116   : > { %v2076_v21 = vrot.slane %v2075_v60, 4  ;;  %v2098_v39 = vrot.slane %v9142_v49, 4  ;;  %v2052_v49 = vld [vmem:[#allocation2 + $0x30] sm:$0xf]  ;;  %v2143_v8 = vsel %vm7693_vm10, %v2138_v30, %v7669_v35  ;;  %v2071_v15 = vsel %vm7693_vm10, %v2066_v13, %v2070_v50  ;;  %6316 = vmatprep.mubr.msk.bf16.mxu0 %vm1203_vm7, %v7096_v33  ;;  %v7739_v35 = vpop.permute.xlu1 %1953 }
 0x117   : > { %v2104_v63 = vrot.slane %v9143_v45, 5  ;;  %v2089_v34 = vor.u32 %v2088_v9, %v2085_v4  ;;  %vm2587_vm11 = vcmask 1045504   ;;  %vm2031_vm12 = vcmask 64512   ;;  %v2055_v45 = vld [vmem:[#allocation2 + $0x54] sm:$0xf] }
 0x118   : > { %v2081_v17 = vsel %vm7693_vm10, %v2076_v21, %v7169_v57  ;;  %v2099_v60 = vor.u32 %v2098_v39, %v2094_v31  ;;  %6503 = vmatprep.subr.msk.bf16.mxu1 %vm2587_vm11, %v6562_v25  ;;  %vm2570_vm13 = vcmask 97280   ;;  %6504 = vmatprep.subr.msk.bf16.mxu0 %vm2587_vm11, %v7709_v22  ;;  %v2589_v33 = vsel %vm2587_vm11, %v6562_v25, 0 }
 0x119   : > { %v5929_v57 = vcombine.low %v2071_v15, %v2081_v17  ;;  %v2090_v50 = vrot.slane %v2089_v34, 4  ;;  %v2107_v30 = vshrl.u32 %v2052_v49, 16  ;;  %v2110_v48 = vshll.u32 %v2052_v49, 16  ;;  %6329 = vmatpush3.bf16.msra.mxu1 %v2589_v33 }
 0x11a   : > { %v2100_v39 = vrot.slane %v2099_v60, 4  ;;  %v9144_v13 = vshll.u32 %v7064_v53, 16  ;;  %v9145_v17 = vshrl.u32 %v7064_v53, 16  ;;  %6505 = vmatprep.subr.msk.bf16.mxu1 %vm2587_vm11, %v7736_v26  ;;  %v9146_v33 = vshll.u32 %v7066_v54, 16 }
 0x11b   : > { %v2524_v21 = vsel %vm1203_vm7, %v5929_v57, %v7541_v43  ;;  %v2095_v15 = vsel %vm7693_vm10, %v2090_v50, %v2094_v31  ;;  %v2109_v49 = vrot.slane %v2107_v30, 4  ;;  %v2112_v34 = vrot.slane %v2110_v48, 5  ;;  %v7765_v50 = vpop.permute.xlu0 %1951 }
 0x11c   : > { %v2105_v4 = vsel %vm7693_vm10, %v2100_v39, %v2104_v63  ;;  %v2118_v9 = vrot.slane %v9144_v13, 5  ;;  %v2122_v60 = vrot.slane %v9145_v17, 4  ;;  %v2547_v25 = vsel %vm2031_vm12, %v2524_v21, %v7548_v36  ;;  %v6561_v39 = vld [vmem:[#allocation2 + $0x24] sm:$0xff]  }
 0x11d   : > { %v7760_v63 = vsel %vm1203_vm7, %v6559_v56, %v7529_v41  ;;  %v5930_v57 = vcombine.low %v2095_v15, %v2105_v4  ;;  %6330 = vmatprep.mubr.msk.bf16.mxu1 %vm2570_vm13, %v2547_v25  ;;  %v2128_v31 = vrot.slane %v9146_v33, 5  ;;  %v5932_v36 = vcombine.low %v2143_v8, %v2153_v10  ;;  %6317 = vmatmul.mubr.msk.bf16.gmra.mxu0 %vm1203_vm7, %v7022_v12  ;;  %v2054_v15 = vld [vmem:[#allocation2 + $0x48] sm:$0xf]  ;;  %v7775_v25 = vpop.permute.xlu1 %1993 }
 0x11e   : > { %v2123_v53 = vor.u32 %v2122_v60, %v2118_v9  ;;  %v2113_v30 = vor.u32 %v2112_v34, %v2109_v49  ;;  %v2179_v48 = vshrl.u32 %v2055_v45, 16  ;;  %v2182_v21 = vshll.u32 %v2055_v45, 16  ;;  %6320 = vmatprep.mubr.msk.bf16.mxu0 %vm1203_vm7, %v7151_v6 }
 0x11f   : > { %v2527_v13 = vsel %vm1203_vm7, %v5930_v57, %v7565_v14  ;;  %v9147_v56 = vshll.u32 %v7102_v46, 16  ;;  %v9148_v60 = vshrl.u32 %v7102_v46, 16  ;;  %v7783_v12 = vsel %vm1203_vm7, %v6561_v39, %v7565_v14 }
 0x120   : > { %v2124_v17 = vrot.slane %v2123_v53, 4  ;;  %v2549_v10 = vsel %vm2031_vm12, %v2527_v13, %v7574_v5  ;;  %v2114_v8 = vrot.slane %v2113_v30, 4  ;;  %v2181_v45 = vrot.slane %v2179_v48, 4 }
 0x121   : > { %v2190_v4 = vrot.slane %v9147_v56, 5  ;;  %v2194_v54 = vrot.slane %v9148_v60, 4  ;;  %v2184_v49 = vrot.slane %v2182_v21, 5  ;;  %6331 = vmatmul.mubr.msk.bf16.vlgmr.msra.gmra.mxu1 %vm2570_vm13, %v2549_v10  ;;  %v9149_v57 = vshll.u32 %v7107_v52, 16  ;;  %v7796_v56 = vpop.permute.xlu0 %1991  ;;  %v6563_v10 = vld [vmem:[#allocation2 + $0x30] sm:$0xff]  }
 0x122   : > { %v2129_v46 = vsel %vm7693_vm10, %v2124_v17, %v2128_v31  ;;  %v2119_v5 = vsel %vm7693_vm10, %v2114_v8, %v2118_v9  ;;  %v2155_v30 = vshrl.u32 %v2054_v15, 16  ;;  %v2158_v48 = vshll.u32 %v2054_v15, 16  ;;  %v2057_v17 = vld [vmem:[#allocation2 + $0x6c] sm:$0xf] }
 0x123   : > { %v2195_v34 = vor.u32 %v2194_v54, %v2190_v4  ;;  %v2200_v53 = vrot.slane %v9149_v57, 5  ;;  %v2185_v33 = vor.u32 %v2184_v49, %v2181_v45  ;;  %v5931_v6 = vcombine.low %v2119_v5, %v2129_v46  ;;  %v7806_v46 = vpop.permute.xlu1 %3356 }
 0x124   : > { %v9150_v14 = vshll.u32 %v7115_v11, 16  ;;  %v9151_v13 = vshrl.u32 %v7115_v11, 16  ;;  %v2533_v52 = vsel %vm1203_vm7, %v5932_v36, %v7529_v41  ;;  %v2157_v54 = vrot.slane %v2155_v30, 4 }
 0x125   : > { %v2196_v21 = vrot.slane %v2195_v34, 4  ;;  %v2186_v60 = vrot.slane %v2185_v33, 4  ;;  %v2160_v9 = vrot.slane %v2158_v48, 5  ;;  %v2530_v15 = vsel %vm1203_vm7, %v5931_v6, %v7586_v51  ;;  %6321 = vmatmul.mubr.msk.bf16.gmra.mxu0 %vm1203_vm7, %v7136_v42  ;;  %v2056_v48 = vld [vmem:[#allocation2 + $0x60] sm:$0xf] }
 0x126   : > { %v2166_v39 = vrot.slane %v9150_v14, 5  ;;  %v2170_v31 = vrot.slane %v9151_v13, 4  ;;  %v9152_v11 = vshll.u32 %v7121_v24, 16  ;;  %v2551_v34 = vsel %vm2031_vm12, %v2530_v15, %v7611_v40  ;;  %6324 = vmatprep.mubr.msk.bf16.mxu0 %vm1203_vm7, %v7201_v0 }
 0x127   : > { %v2201_v8 = vsel %vm7693_vm10, %v2196_v21, %v2200_v53  ;;  %v2191_v41 = vsel %vm7693_vm10, %v2186_v60, %v2190_v4  ;;  %v2161_v36 = vor.u32 %v2160_v9, %v2157_v54  ;;  %v2227_v57 = vshrl.u32 %v2057_v17, 16  ;;  %6334 = vmatprep.mubr.msk.bf16.mxu1 %vm2570_vm13, %v2551_v34 }
 0x128   : > { %v2171_v45 = vor.u32 %v2170_v31, %v2166_v39  ;;  %v2176_v49 = vrot.slane %v9152_v11, 5  ;;  %v5934_v5 = vcombine.low %v2191_v41, %v2201_v8  ;;  %v2230_v53 = vshll.u32 %v2057_v17, 16  ;;  %v7840_v11 = vpop.permute.xlu1 %3396 }
 0x129   : > { %v9153_v24 = vshll.u32 %v7156_v32, 16  ;;  %v2553_v40 = vsel %vm2031_vm12, %v2533_v52, %v7598_v58  ;;  %v2162_v6 = vrot.slane %v2161_v36, 4  ;;  %v2229_v21 = vrot.slane %v2227_v57, 4  ;;  %v7832_v52 = vpop.permute.xlu0 %3354 }
 0x12a   : > { %v2172_v33 = vrot.slane %v2171_v45, 4  ;;  %v9154_v4 = vshrl.u32 %v7156_v32, 16  ;;  %v7825_v13 = vsel %vm1203_vm7, %v6563_v10, %v7586_v51  ;;  %6335 = vmatmul.mubr.msk.bf16.gmra.mxu1 %vm2570_vm13, %v2553_v40  ;;  %v2232_v31 = vrot.slane %v2230_v53, 5  ;;  %v1404_v45 = vld [vmem:[#allocation2 + $0x18] sm:$0xf] }
 0x12b   : > { %v2238_v30 = vrot.slane %v9153_v24, 5  ;;  %v9155_v58 = vshll.u32 %v7162_v37, 16  ;;  %v2539_v32 = vsel %vm1203_vm7, %v5934_v5, %v7618_v38  ;;  %v2167_v0 = vsel %vm7693_vm10, %v2162_v6, %v2166_v39 }
 0x12c   : > { %v2242_v14 = vrot.slane %v9154_v4, 4  ;;  %v2177_v42 = vsel %vm7693_vm10, %v2172_v33, %v2176_v49  ;;  %v2203_v51 = vshrl.u32 %v2056_v48, 16  ;;  %v2233_v9 = vor.u32 %v2232_v31, %v2229_v21  ;;  %v9158_v33 = vld [vmem:[#allocation9_spill] sm:$0xff]  ;;  %v1401_v21 = vld [vmem:[#allocation2 + $0xc] sm:$0xf] }
 0x12d   : > { %v2248_v17 = vrot.slane %v9155_v58, 5  ;;  %v5933_v54 = vcombine.low %v2167_v0, %v2177_v42  ;;  %v2206_v10 = vshll.u32 %v2056_v48, 16  ;;  %v9156_v15 = vshll.u32 %v7167_v55, 16  ;;  %v9161_v31 = vld [vmem:[#allocation11_spill] sm:$0xff] }
 0x12e   : > { %v2243_v60 = vor.u32 %v2242_v14, %v2238_v30  ;;  %v2557_v37 = vsel %vm2031_vm12, %v2539_v32, %v7638_v47  ;;  %v2205_v34 = vrot.slane %v2203_v51, 4  ;;  %v9157_v41 = vshrl.u32 %v7167_v55, 16  ;;  %v9160_v14 = vld [vmem:[#allocation10_spill] sm:$0xff] }
 0x12f   : > { %v2214_v8 = vrot.slane %v9156_v15, 5  ;;  %v2536_v39 = vsel %vm1203_vm7, %v5933_v54, %v7631_v7  ;;  %v2234_v57 = vrot.slane %v2233_v9, 4  ;;  %v2208_v5 = vrot.slane %v2206_v10, 5  ;;  %6325 = vmatmul.mubr.msk.bf16.gmra.mxu0 %vm1203_vm7, %v9160_v14  ;;  %v9164_v10 = vld [vmem:[#allocation12_spill] sm:$0xff] }
 0x130   : > { %v2244_v49 = vrot.slane %v2243_v60, 4  ;;  %v2218_v36 = vrot.slane %v9157_v41, 4  ;;  %v9159_v53 = vshll.u32 %v9158_v33, 16  ;;  %v2555_v48 = vsel %vm2031_vm12, %v2536_v39, %v7654_v16  ;;  %v7861_v16 = vpop.permute.xlu0 %3394  ;;  %v2813_v14 = vld [vmem:[#allocation2 + $0x30] sm:$0xf] }
 0x131   : > { %v1453_v6 = vshrl.u32 %v1404_v45, 16  ;;  %6338 = vmatprep.mubr.msk.bf16.mxu1 %vm2570_vm13, %v2555_v48  ;;  %v2239_v55 = vsel %vm7693_vm10, %v2234_v57, %v2238_v30  ;;  %v2209_v4 = vor.u32 %v2208_v5, %v2205_v34  ;;  %v1456_v42 = vshll.u32 %v1404_v45, 16  ;;  %v7868_v45 = vpop.permute.xlu1 %1957 }
 0x132   : > { %v2224_v24 = vrot.slane %v9159_v53, 5  ;;  %v2249_v40 = vsel %vm7693_vm10, %v2244_v49, %v2248_v17  ;;  %v2219_v47 = vor.u32 %v2218_v36, %v2214_v8  ;;  %v9162_v58 = vshll.u32 %v9161_v31, 16  ;;  %6339 = vmatmul.mubr.msk.bf16.gmra.mxu1 %vm2570_vm13, %v2557_v37 }
 0x133   : > { %v5936_v0 = vcombine.low %v2239_v55, %v2249_v40  ;;  %v1455_v60 = vrot.slane %v1453_v6, 4  ;;  %v9163_v51 = vshrl.u32 %v9161_v31, 16  ;;  %v2210_v9 = vrot.slane %v2209_v4, 4  ;;  %v9166_v6 = vld [vmem:[#allocation13_spill] sm:$0xff] }
 0x134   : > { %v1464_v32 = vrot.slane %v9162_v58, 5  ;;  %v2220_v17 = vrot.slane %v2219_v47, 4  ;;  %v1458_v30 = vrot.slane %v1456_v42, 5  ;;  %v9165_v15 = vshll.u32 %v9164_v10, 16 }
 0x135   : > { %v1468_v54 = vrot.slane %v9163_v51, 4  ;;  %v1429_v34 = vshrl.u32 %v1401_v21, 16  ;;  %v2545_v41 = vsel %vm1203_vm7, %v5936_v0, %v7662_v62  ;;  %v1432_v57 = vshll.u32 %v1401_v21, 16  ;;  %v9169_v21 = vld [vmem:[#allocation14_spill] sm:$0xff] }
 0x136   : > { %v1474_v49 = vrot.slane %v9165_v15, 5  ;;  %v2225_v36 = vsel %vm7693_vm10, %v2220_v17, %v2224_v24  ;;  %v2215_v5 = vsel %vm7693_vm10, %v2210_v9, %v2214_v8  ;;  %v2561_v37 = vsel %vm2031_vm12, %v2545_v41, %v7689_v27  ;;  %v7886_v27 = vpop.permute.xlu0 %1955  ;;  %v2810_v15 = vld [vmem:[#allocation2 + $0x24] sm:$0xf] }
 0x137   : > { %v1469_v39 = vor.u32 %v1468_v54, %v1464_v32  ;;  %v1459_v33 = vor.u32 %v1458_v30, %v1455_v60  ;;  %v1431_v53 = vrot.slane %v1429_v34, 4  ;;  %v5935_v48 = vcombine.low %v2215_v5, %v2225_v36  ;;  %v7898_v34 = vpop.permute.xlu1 %1997 }
 0x138   : > { %v1434_v47 = vrot.slane %v1432_v57, 5  ;;  %v9167_v55 = vshll.u32 %v9166_v6, 16  ;;  %v9168_v24 = vshrl.u32 %v9166_v6, 16  ;;  %v9170_v58 = vshll.u32 %v9169_v21, 16  ;;  %v1410_v21 = vld [vmem:[#allocation2 + $0x30] sm:$0xf] }
 0x139   : > { %v1470_v40 = vrot.slane %v1469_v39, 4  ;;  %v1460_v42 = vrot.slane %v1459_v33, 4  ;;  %v2710_v8 = vsel %vm2587_vm11, %v7709_v22, 0  ;;  %v2542_v17 = vsel %vm1203_vm7, %v5935_v48, %v7681_v59  ;;  %v9171_v39 = vld [vmem:[#allocation15_spill] sm:$0xff] }
 0x13a   : > { %v1440_v4 = vrot.slane %v9167_v55, 5  ;;  %v1444_v31 = vrot.slane %v9168_v24, 4  ;;  %v1450_v0 = vrot.slane %v9170_v58, 5  ;;  %v1435_v51 = vor.u32 %v1434_v47, %v1431_v53  ;;  %6347 = vmatpush3.bf16.msra.mxu0 %v2710_v8  ;;  %v9174_v53 = vld [vmem:[#allocation16_spill] sm:$0xff]  ;;  %v7916_v58 = vpop.permute.xlu0 %1995 }
 0x13b   : > { %v1475_v60 = vsel %vm7693_vm10, %v1470_v40, %v1474_v49  ;;  %v3475_v54 = vsel %vm2587_vm11, %v7736_v26, 0  ;;  %v2559_v9 = vsel %vm2031_vm12, %v2542_v17, %v7724_v29  ;;  %v1465_v30 = vsel %vm7693_vm10, %v1460_v42, %v1464_v32 }
 0x13c   : > { %v1445_v22 = vor.u32 %v1444_v31, %v1440_v4  ;;  %6365 = vmatpush3.bf16.msra.mxu1 %v3475_v54  ;;  %v2859_v10 = vshrl.u32 %v2813_v14, 16  ;;  %6342 = vmatprep.mubr.msk.bf16.mxu1 %vm2570_vm13, %v2559_v9  ;;  %v5906_v49 = vcombine.low %v1465_v30, %v1475_v60  ;;  %v1436_v41 = vrot.slane %v1435_v51, 4 }
 0x13d   : > { %v2862_v36 = vshll.u32 %v2813_v14, 16  ;;  %v9172_v57 = vshll.u32 %v9171_v39, 16  ;;  %6343 = vmatmul.mubr.msk.bf16.gmra.mxu1 %vm2570_vm13, %v2561_v37  ;;  %v9173_v32 = vshrl.u32 %v9171_v39, 16  ;;  %v9175_v48 = vshll.u32 %v9174_v53, 16 }
 0x13e   : > { %v1446_v5 = vrot.slane %v1445_v22, 4  ;;  %v2861_v29 = vrot.slane %v2859_v10, 4  ;;  %v2012_v47 = vsel %vm1203_vm7, %v5906_v49, %v7739_v35  ;;  %v1441_v6 = vsel %vm7693_vm10, %v1436_v41, %v1440_v4  ;;  %v9176_v35 = vld [vmem:[#allocation17_spill] sm:$0xff] }
 0x13f   : > { %v2870_v26 = vrot.slane %v9172_v57, 5  ;;  %v2874_v33 = vrot.slane %v9173_v32, 4  ;;  %v2880_v40 = vrot.slane %v9175_v48, 5  ;;  %v2864_v55 = vrot.slane %v2862_v36, 5 }
 0x140   : > { %v2835_v14 = vshrl.u32 %v2810_v15, 16  ;;  %v1451_v42 = vsel %vm7693_vm10, %v1446_v5, %v1450_v0  ;;  %v2035_v37 = vsel %vm2031_vm12, %v2012_v47, %v7775_v25  ;;  %v2838_v31 = vshll.u32 %v2810_v15, 16  ;;  %v9179_v0 = vld [vmem:[#allocation18_spill] sm:$0xff]  ;;  %v7924_v25 = vpop.permute.xlu1 %3360 }
 0x141   : > { %v2875_v24 = vor.u32 %v2874_v33, %v2870_v26  ;;  %v5905_v8 = vcombine.low %v1441_v6, %v1451_v42  ;;  %v2865_v17 = vor.u32 %v2864_v55, %v2861_v29  ;;  %v9177_v51 = vshll.u32 %v9176_v35, 16  ;;  %v1407_v33 = vld [vmem:[#allocation2 + $0x24] sm:$0xf] }
 0x142   : > { %v2837_v60 = vrot.slane %v2835_v14, 4  ;;  %v2840_v9 = vrot.slane %v2838_v31, 5  ;;  %v9178_v30 = vshrl.u32 %v9176_v35, 16  ;;  %v9180_v10 = vshll.u32 %v9179_v0, 16  ;;  %v7940_v31 = vpop.permute.xlu0 %3358 }
 0x143   : > { %v2846_v54 = vrot.slane %v9177_v51, 5  ;;  %v2876_v4 = vrot.slane %v2875_v24, 4  ;;  %v2009_v15 = vsel %vm1203_vm7, %v5905_v8, %v7765_v50  ;;  %v2866_v41 = vrot.slane %v2865_v17, 4  ;;  %v9181_v50 = vld [vmem:[#allocation19_spill] sm:$0xff]  ;;  %v9184_v8 = vld [vmem:[#allocation20_spill] sm:$0xff] }
 0x144   : > { %v2850_v22 = vrot.slane %v9178_v30, 4  ;;  %v2856_v49 = vrot.slane %v9180_v10, 5  ;;  %v1501_v36 = vshrl.u32 %v1410_v21, 16  ;;  %v1504_v39 = vshll.u32 %v1410_v21, 16  ;;  %v2819_v30 = vld [vmem:[#allocation2 + $0x48] sm:$0xf] }
 0x145   : > { %v2033_v57 = vsel %vm2031_vm12, %v2009_v15, %v7796_v56  ;;  %v2881_v5 = vsel %vm7693_vm10, %v2876_v4, %v2880_v40  ;;  %v2841_v29 = vor.u32 %v2840_v9, %v2837_v60  ;;  %v2871_v53 = vsel %vm7693_vm10, %v2866_v41, %v2870_v26 }
 0x146   : > { %v2851_v32 = vor.u32 %v2850_v22, %v2846_v54  ;;  %6348 = vmatprep.mubr.msk.bf16.mxu0 %vm2570_vm13, %v2033_v57  ;;  %v1503_v48 = vrot.slane %v1501_v36, 4  ;;  %v1506_v47 = vrot.slane %v1504_v39, 5  ;;  %v9182_v6 = vshll.u32 %v9181_v50, 16  ;;  %v7950_v22 = vpop.permute.xlu1 %3400  ;;  %v9186_v57 = vld [vmem:[#allocation21_spill] sm:$0xff] }
 0x147   : > { %6349 = vmatmul.mubr.msk.bf16.vlgmr.msra.gmra.mxu0 %vm2570_vm13, %v2035_v37  ;;  %v5974_v14 = vcombine.low %v2871_v53, %v2881_v5  ;;  %v2842_v56 = vrot.slane %v2841_v29, 4  ;;  %v9183_v40 = vshrl.u32 %v9181_v50, 16  ;;  %v9185_v17 = vshll.u32 %v9184_v8, 16 }
 0x148   : > { %v1512_v55 = vrot.slane %v9182_v6, 5  ;;  %v2852_v42 = vrot.slane %v2851_v32, 4  ;;  %v1507_v21 = vor.u32 %v1506_v47, %v1503_v48  ;;  %v1477_v26 = vshrl.u32 %v1407_v33, 16 }
 0x149   : > { %v1516_v24 = vrot.slane %v9183_v40, 4  ;;  %v1522_v60 = vrot.slane %v9185_v17, 5  ;;  %v1480_v35 = vshll.u32 %v1407_v33, 16  ;;  %v3415_v51 = vsel %vm1203_vm7, %v5974_v14, %v7806_v46  ;;  %v9189_v33 = vld [vmem:[#allocation22_spill] sm:$0xff] }
 0x14a   : > { %v2847_v37 = vsel %vm7693_vm10, %v2842_v56, %v2846_v54  ;;  %v2857_v4 = vsel %vm7693_vm10, %v2852_v42, %v2856_v49  ;;  %v3437_v10 = vsel %vm2031_vm12, %v3415_v51, %v7840_v11  ;;  %v1508_v15 = vrot.slane %v1507_v21, 4  ;;  %v2816_v56 = vld [vmem:[#allocation2 + $0x3c] sm:$0xf]  ;;  %v7968_v42 = vpop.permute.xlu0 %3398 }
 0x14b   : > { %v1517_v9 = vor.u32 %v1516_v24, %v1512_v55  ;;  %v5973_v0 = vcombine.low %v2847_v37, %v2857_v4  ;;  %v1479_v41 = vrot.slane %v1477_v26, 4  ;;  %v1482_v39 = vrot.slane %v1480_v35, 5  ;;  %v9191_v24 = vld [vmem:[#allocation23_spill] sm:$0xff]  ;;  %v9194_v35 = vld [vmem:[#allocation24_spill] sm:$0xff]  ;;  %v7978_v4 = vpop.permute.xlu1 %1961 }
 0x14c   : > { %v9187_v46 = vshll.u32 %v9186_v57, 16  ;;  %v9188_v54 = vshrl.u32 %v9186_v57, 16  ;;  %v1513_v32 = vsel %vm7693_vm10, %v1508_v15, %v1512_v55  ;;  %v9190_v53 = vshll.u32 %v9189_v33, 16  ;;  %v1416_v57 = vld [vmem:[#allocation2 + $0x48] sm:$0xf] }
 0x14d   : > { %v1518_v36 = vrot.slane %v1517_v9, 4  ;;  %v3412_v49 = vsel %vm1203_vm7, %v5973_v0, %v7832_v52  ;;  %v2907_v11 = vshrl.u32 %v2819_v30, 16  ;;  %v1483_v6 = vor.u32 %v1482_v39, %v1479_v41 }
 0x14e   : > { %v1488_v5 = vrot.slane %v9187_v46, 5  ;;  %v1492_v29 = vrot.slane %v9188_v54, 4  ;;  %v1498_v48 = vrot.slane %v9190_v53, 5  ;;  %v3435_v47 = vsel %vm2031_vm12, %v3412_v49, %v7861_v16 }
 0x14f   : > { %v1523_v50 = vsel %vm7693_vm10, %v1518_v36, %v1522_v60  ;;  %6366 = vmatprep.mubr.msk.bf16.mxu1 %vm2570_vm13, %v3435_v47  ;;  %v2909_v40 = vrot.slane %v2907_v11, 4  ;;  %v2910_v55 = vshll.u32 %v2819_v30, 16  ;;  %v9192_v21 = vshll.u32 %v9191_v24, 16 }
 0x150   : > { %v1493_v14 = vor.u32 %v1492_v29, %v1488_v5  ;;  %v5908_v52 = vcombine.low %v1513_v32, %v1523_v50  ;;  %6367 = vmatmul.mubr.msk.bf16.vlgmr.msra.gmra.mxu1 %vm2570_vm13, %v3437_v10  ;;  %v1484_v17 = vrot.slane %v1483_v6, 4  ;;  %v9193_v26 = vshrl.u32 %v9191_v24, 16 }
 0x151   : > { %v2918_v8 = vrot.slane %v9192_v21, 5  ;;  %v9195_v51 = vshll.u32 %v9194_v35, 16  ;;  %v2912_v0 = vrot.slane %v2910_v55, 5  ;;  %v2883_v30 = vshrl.u32 %v2816_v56, 16  ;;  %v9201_v35 = vld [vmem:[#allocation27_spill] sm:$0xff] }
 0x152   : > { %v1494_v16 = vrot.slane %v1493_v14, 4  ;;  %v2922_v60 = vrot.slane %v9193_v26, 4  ;;  %v2018_v9 = vsel %vm1203_vm7, %v5908_v52, %v7868_v45  ;;  %v2886_v15 = vshll.u32 %v2816_v56, 16  ;;  %v9196_v45 = vld [vmem:[#allocation25_spill] sm:$0xff] }
 0x153   : > { %v2928_v37 = vrot.slane %v9195_v51, 5  ;;  %v1489_v41 = vsel %vm7693_vm10, %v1484_v17, %v1488_v5  ;;  %v2039_v36 = vsel %vm2031_vm12, %v2018_v9, %v7898_v34  ;;  %v2913_v54 = vor.u32 %v2912_v0, %v2909_v40  ;;  %v9199_v5 = vld [vmem:[#allocation26_spill] sm:$0xff]  ;;  %v1413_v17 = vld [vmem:[#allocation2 + $0x3c] sm:$0xf] }
 0x154   : > { %v1499_v10 = vsel %vm7693_vm10, %v1494_v16, %v1498_v48  ;;  %v2923_v39 = vor.u32 %v2922_v60, %v2918_v8  ;;  %v2885_v29 = vrot.slane %v2883_v30, 4  ;;  %v2888_v49 = vrot.slane %v2886_v15, 5  ;;  %v7994_v48 = vpop.permute.xlu0 %1959  ;;  %v2002_v16 = vpop.permute.xlu1 %2001 }
 0x155   : > { %v5907_v46 = vcombine.low %v1489_v41, %v1499_v10  ;;  %v9197_v33 = vshll.u32 %v9196_v45, 16  ;;  %v9198_v11 = vshrl.u32 %v9196_v45, 16  ;;  %v9200_v50 = vshll.u32 %v9199_v5, 16  ;;  %v9204_v10 = vld [vmem:[#allocation28_spill] sm:$0xff]  ;;  %v2825_v45 = vld [vmem:[#allocation2 + $0x60] sm:$0xf] }
 0x156   : > { %v2924_v32 = vrot.slane %v2923_v39, 4  ;;  %v2914_v14 = vrot.slane %v2913_v54, 4  ;;  %v2889_v56 = vor.u32 %v2888_v49, %v2885_v29  ;;  %v1549_v52 = vshrl.u32 %v1416_v57, 16 }
 0x157   : > { %v2894_v53 = vrot.slane %v9197_v33, 5  ;;  %v2898_v47 = vrot.slane %v9198_v11, 4  ;;  %v2904_v6 = vrot.slane %v9200_v50, 5  ;;  %v2015_v34 = vsel %vm1203_vm7, %v5907_v46, %v7886_v27 }
 0x158   : > { %v2037_v40 = vsel %vm2031_vm12, %v2015_v34, %v7916_v58  ;;  %v2929_v55 = vsel %vm7693_vm10, %v2924_v32, %v2928_v37  ;;  %v1552_v21 = vshll.u32 %v1416_v57, 16  ;;  %v2919_v26 = vsel %vm7693_vm10, %v2914_v14, %v2918_v8  ;;  %v2000_v32 = vpop.permute.xlu0 %1999  ;;  %v9206_v34 = vld [vmem:[#allocation29_spill] sm:$0xff] }
 0x159   : > { %v2899_v24 = vor.u32 %v2898_v47, %v2894_v53  ;;  %6352 = vmatprep.mubr.msk.bf16.mxu0 %vm2570_vm13, %v2037_v40  ;;  %v2890_v60 = vrot.slane %v2889_v56, 4  ;;  %v1551_v27 = vrot.slane %v1549_v52, 4  ;;  %v9202_v51 = vshll.u32 %v9201_v35, 16  ;;  %v8024_v40 = vpop.permute.xlu1 %3364 }
 0x15a   : > { %6353 = vmatmul.mubr.msk.bf16.gmra.mxu0 %vm2570_vm13, %v2039_v36  ;;  %v5976_v58 = vcombine.low %v2919_v26, %v2929_v55  ;;  %v1554_v30 = vrot.slane %v1552_v21, 5  ;;  %v9203_v37 = vshrl.u32 %v9201_v35, 16  ;;  %v9205_v39 = vshll.u32 %v9204_v10, 16 }
 0x15b   : > { %v1560_v9 = vrot.slane %v9202_v51, 5  ;;  %v2900_v0 = vrot.slane %v2899_v24, 4  ;;  %v2895_v41 = vsel %vm7693_vm10, %v2890_v60, %v2894_v53  ;;  %v1525_v8 = vshrl.u32 %v1413_v17, 16  ;;  %v9209_v24 = vld [vmem:[#allocation30_spill] sm:$0xff]  ;;  %v2822_v51 = vld [vmem:[#allocation2 + $0x54] sm:$0xf] }
 0x15c   : > { %v1564_v15 = vrot.slane %v9203_v37, 4  ;;  %v1570_v57 = vrot.slane %v9205_v39, 5  ;;  %v1528_v46 = vshll.u32 %v1413_v17, 16  ;;  %v3421_v54 = vsel %vm1203_vm7, %v5976_v58, %v7924_v25  ;;  %v9214_v39 = vld [vmem:[#allocation32_spill] sm:$0xff] }
 0x15d   : > { %v2905_v36 = vsel %vm7693_vm10, %v2900_v0, %v2904_v6  ;;  %v1555_v29 = vor.u32 %v1554_v30, %v1551_v27  ;;  %v3441_v11 = vsel %vm2031_vm12, %v3421_v54, %v7950_v22  ;;  %v1527_v53 = vrot.slane %v1525_v8, 4 }
 0x15e   : > { %v1565_v49 = vor.u32 %v1564_v15, %v1560_v9  ;;  %v5975_v33 = vcombine.low %v2895_v41, %v2905_v36  ;;  %v1530_v47 = vrot.slane %v1528_v46, 5  ;;  %v9207_v14 = vshll.u32 %v9206_v34, 16  ;;  %v9211_v15 = vld [vmem:[#allocation31_spill] sm:$0xff]  ;;  %v3363_v46 = vpop.permute.xlu0 %3362 }
 0x15f   : > { %v1556_v5 = vrot.slane %v1555_v29, 4  ;;  %v9208_v25 = vshrl.u32 %v9206_v34, 16  ;;  %v9210_v21 = vshll.u32 %v9209_v24, 16  ;;  %v2955_v22 = vshrl.u32 %v2825_v45, 16 }
 0x160   : > { %v1566_v50 = vrot.slane %v1565_v49, 4  ;;  %v1536_v56 = vrot.slane %v9207_v14, 5  ;;  %v3418_v6 = vsel %vm1203_vm7, %v5975_v33, %v7940_v31  ;;  %v1531_v55 = vor.u32 %v1530_v47, %v1527_v53  ;;  %v3405_v47 = vpop.permute.xlu1 %3404 }
 0x161   : > { %v1540_v52 = vrot.slane %v9208_v25, 4  ;;  %v1546_v17 = vrot.slane %v9210_v21, 5  ;;  %v3439_v26 = vsel %vm2031_vm12, %v3418_v6, %v7968_v42  ;;  %v1561_v60 = vsel %vm7693_vm10, %v1556_v5, %v1560_v9  ;;  %v1422_v5 = vld [vmem:[#allocation2 + $0x60] sm:$0xf]  ;;  %v9216_v25 = vld [vmem:[#allocation33_spill] sm:$0xff] }
 0x162   : > { %v1571_v27 = vsel %vm7693_vm10, %v1566_v50, %v1570_v57  ;;  %6370 = vmatprep.mubr.msk.bf16.mxu1 %vm2570_vm13, %v3439_v26  ;;  %v1532_v31 = vrot.slane %v1531_v55, 4  ;;  %v2957_v0 = vrot.slane %v2955_v22, 4  ;;  %v2958_v30 = vshll.u32 %v2825_v45, 16 }
 0x163   : > { %v1541_v35 = vor.u32 %v1540_v52, %v1536_v56  ;;  %v5910_v58 = vcombine.low %v1561_v60, %v1571_v27  ;;  %6371 = vmatmul.mubr.msk.bf16.gmra.mxu1 %vm2570_vm13, %v3441_v11  ;;  %v9212_v41 = vshll.u32 %v9211_v15, 16  ;;  %v9213_v10 = vshrl.u32 %v9211_v15, 16 }
 0x164   : > { %v9215_v8 = vshll.u32 %v9214_v39, 16  ;;  %v1537_v36 = vsel %vm7693_vm10, %v1532_v31, %v1536_v56  ;;  %v2960_v29 = vrot.slane %v2958_v30, 5  ;;  %v2931_v49 = vshrl.u32 %v2822_v51, 16  ;;  %v1419_v31 = vld [vmem:[#allocation2 + $0x54] sm:$0xf]  ;;  %v1966_v39 = vpop.permute.xlu1 %1965 }
 0x165   : > { %v1542_v37 = vrot.slane %v1541_v35, 4  ;;  %v2966_v42 = vrot.slane %v9212_v41, 5  ;;  %v2970_v9 = vrot.slane %v9213_v10, 4  ;;  %v2024_v54 = vsel %vm1203_vm7, %v5910_v58, %v7978_v4  ;;  %v3403_v58 = vpop.permute.xlu0 %3402 }
 0x166   : > { %v2976_v57 = vrot.slane %v9215_v8, 5  ;;  %v2043_v33 = vsel %vm2031_vm12, %v2024_v54, %v2002_v16  ;;  %v2934_v53 = vshll.u32 %v2822_v51, 16  ;;  %v2961_v34 = vor.u32 %v2960_v29, %v2957_v0 }
 0x167   : > { %v1547_v45 = vsel %vm7693_vm10, %v1542_v37, %v1546_v17  ;;  %v2971_v11 = vor.u32 %v2970_v9, %v2966_v42  ;;  %v2933_v14 = vrot.slane %v2931_v49, 4  ;;  %v9217_v52 = vshll.u32 %v9216_v25, 16 }
 0x168   : > { %v5909_v50 = vcombine.low %v1537_v36, %v1547_v45  ;;  %v2936_v55 = vrot.slane %v2934_v53, 5  ;;  %v9218_v56 = vshrl.u32 %v9216_v25, 16  ;;  %v2952_v21 = vrot.slane %v2950_v18, 5  ;;  %v9223_v25 = vld [vmem:[#allocation35_spill] sm:$0xff] }
 0x169   : > { %v2942_v4 = vrot.slane %v9217_v52, 5  ;;  %v2972_v6 = vrot.slane %v2971_v11, 4  ;;  %v2962_v17 = vrot.slane %v2961_v34, 4  ;;  %v1597_v22 = vshrl.u32 %v1422_v5, 16  ;;  %v2831_v11 = vld [vmem:[#allocation2 + $0x78] sm:$0xf] }
 0x16a   : > { %v2946_v24 = vrot.slane %v9218_v56, 4  ;;  %v2021_v16 = vsel %vm1203_vm7, %v5909_v50, %v7994_v48  ;;  %v1600_v26 = vshll.u32 %v1422_v5, 16  ;;  %v2937_v35 = vor.u32 %v2936_v55, %v2933_v14  ;;  %v9219_v48 = vld [vmem:[#allocation34_spill] sm:$0xff]  ;;  %v1964_v56 = vpop.permute.xlu0 %1963 }
 0x16b   : > { %v2041_v60 = vsel %vm2031_vm12, %v2021_v16, %v2000_v32  ;;  %v2977_v27 = vsel %vm7693_vm10, %v2972_v6, %v2976_v57  ;;  %v2967_v19 = vsel %vm7693_vm10, %v2962_v17, %v2966_v42  ;;  %v1599_v18 = vrot.slane %v1597_v22, 4 }
 0x16c   : > { %v2947_v51 = vor.u32 %v2946_v24, %v2942_v4  ;;  %6356 = vmatprep.mubr.msk.bf16.mxu0 %vm2570_vm13, %v2041_v60  ;;  %v1602_v0 = vrot.slane %v1600_v26, 5  ;;  %v9220_v30 = vshll.u32 %v9219_v48, 16  ;;  %v5978_v32 = vcombine.low %v2967_v19, %v2977_v27  ;;  %v2006_v60 = vpop.permute.xlu1 %2005  ;;  %v2828_v27 = vld [vmem:[#allocation2 + $0x6c] sm:$0xf] }
 0x16d   : > { %6357 = vmatmul.mubr.msk.bf16.gmra.mxu0 %vm2570_vm13, %v2043_v33  ;;  %v2938_v15 = vrot.slane %v2937_v35, 4  ;;  %v9221_v10 = vshrl.u32 %v9219_v48, 16  ;;  %v9222_v57 = vshll.u32 %v7491_v23, 16  ;;  %v1573_v36 = vshrl.u32 %v1419_v31, 16 }
 0x16e   : > { %v1608_v37 = vrot.slane %v9220_v30, 5  ;;  %v2948_v41 = vrot.slane %v2947_v51, 4  ;;  %v1603_v8 = vor.u32 %v1602_v0, %v1599_v18  ;;  %v1576_v42 = vshll.u32 %v1419_v31, 16  ;;  %v9226_v31 = vld [vmem:[#allocation36_spill] sm:$0xff] }
 0x16f   : > { %v1612_v9 = vrot.slane %v9221_v10, 4  ;;  %v1618_v54 = vrot.slane %v9222_v57, 5  ;;  %v3427_v29 = vsel %vm1203_vm7, %v5978_v32, %v8024_v40  ;;  %v2943_v49 = vsel %vm7693_vm10, %v2938_v15, %v2942_v4 }
 0x170   : > { %v2953_v45 = vsel %vm7693_vm10, %v2948_v41, %v2952_v21  ;;  %v3445_v5 = vsel %vm2031_vm12, %v3427_v29, %v3405_v47  ;;  %v1604_v50 = vrot.slane %v1603_v8, 4  ;;  %v1575_v34 = vrot.slane %v1573_v36, 4  ;;  %v2004_v8 = vpop.permute.xlu0 %2003  ;;  %v8105_v29 = vld [vmem:[#allocation2 + $0x4] sm:$0xf] }
 0x171   : > { %v1613_v33 = vor.u32 %v1612_v9, %v1608_v37  ;;  %v5977_v53 = vcombine.low %v2943_v49, %v2953_v45  ;;  %v1578_v14 = vrot.slane %v1576_v42, 5  ;;  %v9224_v52 = vshll.u32 %v9223_v25, 16  ;;  %v3369_v45 = vpop.permute.xlu1 %3368 }
 0x172   : > { %v9225_v40 = vshrl.u32 %v9223_v25, 16  ;;  %v1609_v24 = vsel %vm7693_vm10, %v1604_v50, %v1608_v37  ;;  %v1594_v21 = vrot.slane %v1592_v44, 5  ;;  %v3003_v47 = vshrl.u32 %v2831_v11, 16 }
 0x173   : > { %v1614_v23 = vrot.slane %v1613_v33, 4  ;;  %v1584_v6 = vrot.slane %v9224_v52, 5  ;;  %v3424_v4 = vsel %vm1203_vm7, %v5977_v53, %v3363_v46  ;;  %v1579_v22 = vor.u32 %v1578_v14, %v1575_v34  ;;  %v9229_v33 = vld [vmem:[#allocation37_spill] sm:$0xff]  ;;  %v3928_v14 = vld [vmem:[#allocation2 + $0xc] sm:$0xe] }
 0x174   : > { %v1588_v55 = vrot.slane %v9225_v40, 4  ;;  %v3443_v16 = vsel %vm2031_vm12, %v3424_v4, %v3403_v58  ;;  %v3005_v46 = vrot.slane %v3003_v47, 4  ;;  %v3006_v51 = vshll.u32 %v2831_v11, 16 }
 0x175   : > { %v1619_v17 = vsel %vm7693_vm10, %v1614_v23, %v1618_v54  ;;  %6374 = vmatprep.mubr.msk.bf16.mxu1 %vm2570_vm13, %v3443_v16  ;;  %v9227_v19 = vshll.u32 %v9226_v31, 16  ;;  %v1580_v2 = vrot.slane %v1579_v22, 4  ;;  %v9228_v58 = vshrl.u32 %v9226_v31, 16  ;;  %v3926_v54 = vld [vmem:[#allocation2] sm:$0xe] }
 0x176   : > { %v1589_v26 = vor.u32 %v1588_v55, %v1584_v6  ;;  %v5912_v35 = vcombine.low %v1609_v24, %v1619_v17  ;;  %6375 = vmatmul.mubr.msk.bf16.gmra.mxu1 %vm2570_vm13, %v3445_v5  ;;  %v3024_v48 = vrot.slane %v3022_v1, 5  ;;  %v3008_v37 = vrot.slane %v3006_v51, 5  ;;  %v8114_v55 = vld [vmem:[#allocation2 + $0x10] sm:$0xf]  ;;  %v3929_v16 = vld [vmem:[#allocation2 + $0x14] sm:$0x1] }
 0x177   : > { %v3014_v18 = vrot.slane %v9227_v19, 5  ;;  %v3018_v0 = vrot.slane %v9228_v58, 4  ;;  %v2979_v32 = vshrl.u32 %v2828_v27, 16  ;;  %v2982_v15 = vshll.u32 %v2828_v27, 16  ;;  %v4022_v17 = vld [vmem:[#allocation2] sm:$0xc] }
 0x178   : > { %v1590_v44 = vrot.slane %v1589_v26, 4  ;;  %v2030_v30 = vsel %vm1203_vm7, %v5912_v35, %v1966_v39  ;;  %v1585_v41 = vsel %vm7693_vm10, %v1580_v2, %v1584_v6  ;;  %v3009_v42 = vor.u32 %v3008_v37, %v3005_v46  ;;  %v3927_v39 = vld [vmem:[#allocation2 + $0x8] sm:$0x1]  ;;  %v3367_v35 = vpop.permute.xlu0 %3366 }
 0x179   : > { %v2047_v9 = vsel %vm2031_vm12, %v2030_v30, %v2006_v60  ;;  %v3019_v57 = vor.u32 %v3018_v0, %v3014_v18  ;;  %v2981_v61 = vrot.slane %v2979_v32, 4  ;;  %v2984_v1 = vrot.slane %v2982_v15, 5  ;;  %v4023_v58 = vld [vmem:[#allocation2 + $0x8] sm:$0x3]  ;;  %v3409_v30 = vpop.permute.xlu1 %3408  ;;  %v4024_v15 = vld [vmem:[#allocation2 + $0xc] sm:$0xc] }
 0x17a   : > { %v1595_v10 = vsel %vm7693_vm10, %v1590_v44, %v1594_v21  ;;  %v9230_v11 = vshll.u32 %v9229_v33, 16  ;;  %v9231_v5 = vshrl.u32 %v9229_v33, 16  ;;  %v9232_v34 = vshll.u32 %v7553_v20, 16 }
 0x17b   : > { %v5911_v36 = vcombine.low %v1585_v41, %v1595_v10  ;;  %v3020_v49 = vrot.slane %v3019_v57, 4  ;;  %v3010_v52 = vrot.slane %v3009_v42, 4  ;;  %v2985_v6 = vor.u32 %v2984_v1, %v2981_v61  ;;  %v4025_v41 = vld [vmem:[#allocation2 + $0x14] sm:$0x3] }
 0x17c   : > { %v2990_v53 = vrot.slane %v9230_v11, 5  ;;  %v2994_v50 = vrot.slane %v9231_v5, 4  ;;  %v3000_v23 = vrot.slane %v9232_v34, 5  ;;  %v6026_v40 = vrot.slane %v3926_v54, 9  ;;  %v6564_v10 = vld [vmem:[#allocation2 + $0x54] sm:$0xff]   ;;  %v3407_v5 = vpop.permute.xlu0 %3406 }
 0x17d   : > { %v2027_v25 = vsel %vm1203_vm7, %v5911_v36, %v1964_v56  ;;  %v3025_v24 = vsel %vm7693_vm10, %v3020_v49, %v3024_v48  ;;  %v3968_v47 = vrot.slane %v8105_v29, 5  ;;  %v3015_v20 = vsel %vm7693_vm10, %v3010_v52, %v3014_v18  ;;  %v8138_v36 = vld [vmem:[#allocation2 + $0x34] sm:$0xf]  ;;  %v4739_v52 = vld [vmem:[#allocation2 + $0x3c] sm:$0xe] }
 0x17e   : > { %v2045_v4 = vsel %vm2031_vm12, %v2027_v25, %v2004_v8  ;;  %v2995_v21 = vor.u32 %v2994_v50, %v2990_v53  ;;  %v2986_v56 = vrot.slane %v2985_v6, 4  ;;  %v3971_v22 = vrot.slane %v3927_v39, 5  ;;  %v8150_v25 = vld [vmem:[#allocation2 + $0x40] sm:$0xf] }
 0x17f   : > { %6360 = vmatprep.mubr.msk.bf16.mxu0 %vm2570_vm13, %v2045_v4  ;;  %v6027_v26 = vrot.slane %v3928_v14, 9  ;;  %v5980_v60 = vcombine.low %v3015_v20, %v3025_v24  ;;  %v3969_v51 = vsel %vm7007_vm1, %v6026_v40, %v3968_v47  ;;  %v3970_v31 = vrot.slane %v3968_v47, 4  ;;  %v6565_v40 = vld [vmem:[#allocation2 + $0x48] sm:$0xff]   ;;  %v4430_v24 = vpop.permute.xlu1 %4429 }
 0x180   : > { %6361 = vmatmul.mubr.msk.bf16.gmra.mxu0 %vm2570_vm13, %v2047_v9  ;;  %v2996_v27 = vrot.slane %v2995_v21, 4  ;;  %v2991_v19 = vsel %vm7693_vm10, %v2986_v56, %v2990_v53  ;;  %v3975_v2 = vrot.slane %v8114_v55, 5  ;;  %v3978_v44 = vrot.slane %v3929_v16, 5  ;;  %v4738_v53 = vld [vmem:[#allocation2 + $0x38] sm:$0x1] }
 0x181   : > { %v6034_v18 = vrot.slane %v4022_v17, 10  ;;  %v3433_v0 = vsel %vm1203_vm7, %v5980_v60, %v3369_v45  ;;  %v3972_v37 = vsel %vm7007_vm1, %v3970_v31, %v3971_v22  ;;  %v4059_v32 = vrot.slane %v8105_v29, 6  ;;  %v4740_v16 = vld [vmem:[#allocation2 + $0x44] sm:$0x1]  ;;  %v4833_v17 = vld [vmem:[#allocation2 + $0x30] sm:$0xc] }
 0x182   : > { %v3001_v48 = vsel %vm7693_vm10, %v2996_v27, %v3000_v23  ;;  %v3449_v8 = vsel %vm2031_vm12, %v3433_v0, %v3409_v30  ;;  %v6050_v57 = vcombine.low %v3969_v51, %v3972_v37  ;;  %v3976_v54 = vsel %vm7007_vm1, %v6027_v26, %v3975_v2  ;;  %v4835_v31 = vld [vmem:[#allocation2 + $0x3c] sm:$0xc] }
 0x183   : > { %v5979_v9 = vcombine.low %v2991_v19, %v3001_v48  ;;  %v3977_v42 = vrot.slane %v3975_v2, 4  ;;  %v4060_v61 = vsel %vm7607_vm6, %v6034_v18, %v4059_v32  ;;  %v4061_v1 = vrot.slane %v4059_v32, 4  ;;  %v4836_v18 = vld [vmem:[#allocation2 + $0x44] sm:$0x3]  ;;  %v4434_v48 = vpop.permute.xlu1 %4433 }
 0x184   : > { %v4062_v39 = vrot.slane %v4023_v58, 6  ;;  %4169 = vrot.lane.b32.xlu0 %v6050_v57, %s6650_s0  ;;  %v6035_v45 = vrot.slane %v4024_v15, 10  ;;  %v4066_v33 = vrot.slane %v8114_v55, 6  ;;  %v4069_v11 = vrot.slane %v4025_v41, 6  ;;  %v8177_v15 = vld [vmem:[#allocation2 + $0x1c] sm:$0xf] }
 0x185   : > { %v3430_v49 = vsel %vm1203_vm7, %v5979_v9, %v3367_v35  ;;  %v3979_v50 = vsel %vm7007_vm1, %v3977_v42, %v3978_v44  ;;  %v6110_v23 = vrot.slane %v4737_v3, 9  ;;  %v4779_v14 = vrot.slane %v8138_v36, 5  ;;  %v3930_v41 = vld [vmem:[#allocation2 + $0x18] sm:$0xe] }
 0x186   : > { %v4063_v34 = vsel %vm7607_vm6, %v4061_v1, %v4062_v39  ;;  %v4454_v6 = vsel %vm1203_vm7, %v6564_v10, %v7618_v38  ;;  %v3447_v4 = vsel %vm2031_vm12, %v3430_v49, %v3407_v5  ;;  %v6051_v21 = vcombine.low %v3976_v54, %v3979_v50  ;;  %v4834_v38 = vld [vmem:[#allocation2 + $0x38] sm:$0x3]  ;;  %v3931_v54 = vld [vmem:[#allocation2 + $0x20] sm:$0x1]  ;;  %v8189_v1 = vld [vmem:[#allocation2 + $0x28] sm:$0xf] }
 0x187   : > { %v6058_v47 = vcombine.low %v4060_v61, %v4063_v34  ;;  %6378 = vmatprep.mubr.msk.bf16.mxu1 %vm2570_vm13, %v3447_v4  ;;  %v8158_v20 = vsel %vm2031_vm12, %v7783_v12, %v4430_v24  ;;  %v4067_v56 = vsel %vm7607_vm6, %v6035_v45, %v4066_v33  ;;  %v4068_v22 = vrot.slane %v4066_v33, 4  ;;  %v8167_v12 = vpop.permute.xlu0 %4427  ;;  %v4438_v5 = vpop.permute.xlu1 %4437 }
 0x188   : > { %v4781_v26 = vrot.slane %v4779_v14, 4  ;;  %6379 = vmatmul.mubr.msk.bf16.gmra.mxu1 %vm2570_vm13, %v3449_v8  ;;  %4171 = vrot.lane.b32.xlu1 %v6051_v21, %s6650_s0  ;;  %v4780_v60 = vsel %vm7007_vm1, %v6110_v23, %v4779_v14  ;;  %v4782_v27 = vrot.slane %v4738_v53, 5  ;;  %v6111_v35 = vrot.slane %v4739_v52, 9  ;;  %v3933_v14 = vld [vmem:[#allocation2 + $0x2c] sm:$0x1] }
 0x189   : > { %v4786_v51 = vrot.slane %v8150_v25, 5  ;;  %4209 = vrot.lane.b32.xlu0 %v6058_v47, %s6651_s30  ;;  %v4070_v19 = vsel %vm7607_vm6, %v4068_v22, %v4069_v11  ;;  %v4789_v2 = vrot.slane %v4740_v16, 5  ;;  %v6118_v44 = vrot.slane %v4833_v17, 10  ;;  %v3932_v11 = vld [vmem:[#allocation2 + $0x24] sm:$0xe] }
 0x18a   : > { %v4867_v58 = vrot.slane %v8138_v36, 6  ;;  %v4452_v0 = vsel %vm1203_vm7, %v6565_v40, %v7631_v7  ;;  %v6059_v30 = vcombine.low %v4067_v56, %v4070_v19  ;;  %v4783_v37 = vsel %vm7007_vm1, %v4781_v26, %v4782_v27  ;;  %v4026_v52 = vld [vmem:[#allocation2 + $0x18] sm:$0xc]  ;;  %v4027_v47 = vld [vmem:[#allocation2 + $0x20] sm:$0x3] }
 0x18b   : > { %v4870_v32 = vrot.slane %v4834_v38, 6  ;;  %v8181_v10 = vsel %vm2031_vm12, %v7760_v63, %v4434_v48  ;;  %v6134_v9 = vcombine.low %v4780_v60, %v4783_v37  ;;  %v4787_v8 = vsel %vm7007_vm1, %v6111_v35, %v4786_v51  ;;  %v4432_v39 = vpop.permute.xlu0 %4431  ;;  %v4028_v16 = vld [vmem:[#allocation2 + $0x24] sm:$0xc]  ;;  %v4029_v26 = vld [vmem:[#allocation2 + $0x2c] sm:$0x3] }
 0x18c   : > { %v4788_v57 = vrot.slane %v4786_v51, 4  ;;  %4211 = vrot.lane.b32.xlu1 %v6059_v30, %s6651_s30  ;;  %v4868_v7 = vsel %vm7607_vm6, %v6118_v44, %v4867_v58  ;;  %v4869_v3 = vrot.slane %v4867_v58, 4  ;;  %v6119_v42 = vrot.slane %v4835_v31, 10  ;;  %v8214_v51 = vld [vmem:[#allocation2 + $0x4c] sm:$0xf] }
 0x18d   : > { %v4874_v61 = vrot.slane %v8150_v25, 6  ;;  %4977 = vrot.lane.b32.xlu0 %v6134_v9, %s6650_s0  ;;  %v4877_v49 = vrot.slane %v4836_v18, 6  ;;  %v6028_v45 = vrot.slane %v3930_v41, 9  ;;  %v3982_v33 = vrot.slane %v8177_v15, 5  ;;  %v4741_v58 = vld [vmem:[#allocation2 + $0x48] sm:$0xe] }
 0x18e   : > { %v4790_v63 = vsel %vm7007_vm1, %v4788_v57, %v4789_v2  ;;  %v8197_v53 = vsel %vm2031_vm12, %v7825_v13, %v4432_v39  ;;  %v4871_v34 = vsel %vm7607_vm6, %v4869_v3, %v4870_v32  ;;  %v3985_v23 = vrot.slane %v3931_v54, 5  ;;  %v4742_v18 = vld [vmem:[#allocation2 + $0x50] sm:$0x1]  ;;  %v8225_v41 = vld [vmem:[#allocation2 + $0x58] sm:$0xf] }
 0x18f   : > { %v6135_v50 = vcombine.low %v4787_v8, %v4790_v63  ;;  %v8202_v40 = vsel %vm2031_vm12, %v4454_v6, %v4438_v5  ;;  %v6142_v4 = vcombine.low %v4868_v7, %v4871_v34  ;;  %v4875_v24 = vsel %vm7607_vm6, %v6119_v42, %v4874_v61  ;;  %v4436_v38 = vpop.permute.xlu0 %4435  ;;  %v4743_v9 = vld [vmem:[#allocation2 + $0x54] sm:$0xe]  ;;  %v4744_v7 = vld [vmem:[#allocation2 + $0x5c] sm:$0x1]  ;;  %v4837_v63 = vld [vmem:[#allocation2 + $0x48] sm:$0xc] }
 0x190   : > { %v4876_v21 = vrot.slane %v4874_v61, 4  ;;  %v3983_v13 = vsel %vm7007_vm1, %v6028_v45, %v3982_v33  ;;  %v3984_v17 = vrot.slane %v3982_v33, 4  ;;  %v6029_v56 = vrot.slane %v3932_v11, 9  ;;  %v4838_v11 = vld [vmem:[#allocation2 + $0x50] sm:$0x3] }
 0x191   : > { %4979 = vrot.lane.b32.xlu1 %v6135_v50, %s6650_s0  ;;  %v3989_v22 = vrot.slane %v8189_v1, 5  ;;  %5017 = vrot.lane.b32.xlu0 %v6142_v4, %s6651_s30  ;;  %v3992_v60 = vrot.slane %v3933_v14, 5  ;;  %v6036_v27 = vrot.slane %v4026_v52, 10  ;;  %v4073_v35 = vrot.slane %v8177_v15, 6  ;;  %v4839_v14 = vld [vmem:[#allocation2 + $0x54] sm:$0xc] }
 0x192   : > { %v4878_v6 = vsel %vm7607_vm6, %v4876_v21, %v4877_v49  ;;  %v8217_v31 = vsel %vm2031_vm12, %v4452_v0, %v4436_v38  ;;  %v3986_v2 = vsel %vm7007_vm1, %v3984_v17, %v3985_v23  ;;  %v4076_v44 = vrot.slane %v4027_v47, 6  ;;  %v4840_v47 = vld [vmem:[#allocation2 + $0x5c] sm:$0x3] }
 0x193   : > { %v6143_v19 = vcombine.low %v4875_v24, %v4878_v6  ;;  %v6052_v48 = vcombine.low %v3983_v13, %v3986_v2  ;;  %v3990_v30 = vsel %vm7007_vm1, %v6029_v56, %v3989_v22  ;;  %v3991_v37 = vrot.slane %v3989_v22, 4  ;;  %v8247_v22 = vld [vmem:[#allocation2 + $0x34] sm:$0xf] }
 0x194   : > { %v4074_v32 = vsel %vm7607_vm6, %v6036_v27, %v4073_v35  ;;  %v4075_v0 = vrot.slane %v4073_v35, 4  ;;  %v6037_v8 = vrot.slane %v4028_v16, 10  ;;  %v4080_v57 = vrot.slane %v8189_v1, 6  ;;  %v3935_v35 = vld [vmem:[#allocation2 + $0x38] sm:$0x1] }
 0x195   : > { %5019 = vrot.lane.b32.xlu1 %v6143_v19, %s6651_s30  ;;  %v4083_v54 = vrot.slane %v4029_v26, 6  ;;  %4173 = vrot.lane.b32.xlu0 %v6052_v48, %s6650_s0  ;;  %v3993_v3 = vsel %vm7007_vm1, %v3991_v37, %v3992_v60  ;;  %v6112_v42 = vrot.slane %v4741_v58, 9  ;;  %v4793_v61 = vrot.slane %v8214_v51, 5  ;;  %v3934_v26 = vld [vmem:[#allocation2 + $0x30] sm:$0xe] }
 0x196   : > { %v4796_v39 = vrot.slane %v4742_v18, 5  ;;  %v6053_v49 = vcombine.low %v3990_v30, %v3993_v3  ;;  %v4077_v45 = vsel %vm7607_vm6, %v4075_v0, %v4076_v44  ;;  %v4081_v33 = vsel %vm7607_vm6, %v6037_v8, %v4080_v57  ;;  %v8251_v19 = vld [vmem:[#allocation2 + $0x40] sm:$0xf]  ;;  %v3936_v48 = vld [vmem:[#allocation2 + $0x3c] sm:$0xe] }
 0x197   : > { %v6060_v5 = vcombine.low %v4074_v32, %v4077_v45  ;;  %v4082_v50 = vrot.slane %v4080_v57, 4  ;;  %v4794_v34 = vsel %vm7007_vm1, %v6112_v42, %v4793_v61  ;;  %v4795_v23 = vrot.slane %v4793_v61, 4  ;;  %v3937_v0 = vld [vmem:[#allocation2 + $0x44] sm:$0x1]  ;;  %v4030_v3 = vld [vmem:[#allocation2 + $0x30] sm:$0xc] }
 0x198   : > { %v6113_v52 = vrot.slane %v4743_v9, 9  ;;  %v4800_v4 = vrot.slane %v8225_v41, 5  ;;  %v4803_v24 = vrot.slane %v4744_v7, 5  ;;  %v6120_v21 = vrot.slane %v4837_v63, 10  ;;  %v4032_v45 = vld [vmem:[#allocation2 + $0x3c] sm:$0xc] }
 0x199   : > { %4175 = vrot.lane.b32.xlu1 %v6053_v49, %s6650_s0  ;;  %4213 = vrot.lane.b32.xlu0 %v6060_v5, %s6651_s30  ;;  %v4084_v16 = vsel %vm7607_vm6, %v4082_v50, %v4083_v54  ;;  %v4797_v13 = vsel %vm7007_vm1, %v4795_v23, %v4796_v39  ;;  %v4881_v17 = vrot.slane %v8214_v51, 6  ;;  %v4884_v56 = vrot.slane %v4838_v11, 6  ;;  %v4031_v49 = vld [vmem:[#allocation2 + $0x38] sm:$0x3] }
 0x19a   : > { %v6061_v38 = vcombine.low %v4081_v33, %v4084_v16  ;;  %v6136_v6 = vcombine.low %v4794_v34, %v4797_v13  ;;  %v4801_v60 = vsel %vm7007_vm1, %v6113_v52, %v4800_v4  ;;  %v4802_v27 = vrot.slane %v4800_v4, 4  ;;  %v4033_v34 = vld [vmem:[#allocation2 + $0x44] sm:$0x3] }
 0x19b   : > { %v4882_v2 = vsel %vm7607_vm6, %v6120_v21, %v4881_v17  ;;  %v4883_v44 = vrot.slane %v4881_v17, 4  ;;  %v6121_v58 = vrot.slane %v4839_v14, 10  ;;  %v4888_v18 = vrot.slane %v8225_v41, 6  ;;  %v4745_v21 = vld [vmem:[#allocation2 + $0x60] sm:$0xe] }
 0x19c   : > { %v4804_v30 = vsel %vm7007_vm1, %v4802_v27, %v4803_v24  ;;  %v4891_v37 = vrot.slane %v4840_v47, 6  ;;  %v6030_v32 = vrot.slane %v3934_v26, 9  ;;  %v3996_v9 = vrot.slane %v8247_v22, 5  ;;  %v8274_v24 = vld [vmem:[#allocation2 + $0x64] sm:$0xf] }
 0x19d   : > { %4215 = vrot.lane.b32.xlu1 %v6061_v38, %s6651_s30  ;;  %4981 = vrot.lane.b32.xlu0 %v6136_v6, %s6650_s0  ;;  %v6137_v8 = vcombine.low %v4801_v60, %v4804_v30  ;;  %v4885_v57 = vsel %vm7607_vm6, %v4883_v44, %v4884_v56  ;;  %v4889_v54 = vsel %vm7607_vm6, %v6121_v58, %v4888_v18  ;;  %v4890_v7 = vrot.slane %v4888_v18, 4  ;;  %v4746_v56 = vld [vmem:[#allocation2 + $0x68] sm:$0x1]  ;;  %v8279_v26 = vld [vmem:[#allocation2 + $0x70] sm:$0xf] }
 0x19e   : > { %v6144_v42 = vcombine.low %v4882_v2, %v4885_v57  ;;  %v3997_v61 = vsel %vm7007_vm1, %v6030_v32, %v3996_v9  ;;  %v3998_v39 = vrot.slane %v3996_v9, 4  ;;  %v3999_v63 = vrot.slane %v3935_v35, 5  ;;  %v4747_v35 = vld [vmem:[#allocation2 + $0x6c] sm:$0xe] }
 0x19f   : > { %v4892_v33 = vsel %vm7607_vm6, %v4890_v7, %v4891_v37  ;;  %v6031_v11 = vrot.slane %v3936_v48, 9  ;;  %v4003_v5 = vrot.slane %v8251_v19, 5  ;;  %v4006_v50 = vrot.slane %v3937_v0, 5  ;;  %v4748_v48 = vld [vmem:[#allocation2 + $0x74] sm:$0x1] }
 0x1a0   : > { %v6145_v23 = vcombine.low %v4889_v54, %v4892_v33  ;;  %v4000_v14 = vsel %vm7007_vm1, %v3998_v39, %v3999_v63  ;;  %v6038_v52 = vrot.slane %v4030_v3, 10  ;;  %v4087_v4 = vrot.slane %v8247_v22, 6  ;;  %v4841_v0 = vld [vmem:[#allocation2 + $0x60] sm:$0xc]  ;;  %v4842_v3 = vld [vmem:[#allocation2 + $0x68] sm:$0x3] }
 0x1a1   : > { %4983 = vrot.lane.b32.xlu1 %v6137_v8, %s6650_s0  ;;  %5021 = vrot.lane.b32.xlu0 %v6144_v42, %s6651_s30  ;;  %v6054_v47 = vcombine.low %v3997_v61, %v4000_v14  ;;  %v4004_v16 = vsel %vm7007_vm1, %v6031_v11, %v4003_v5  ;;  %v4005_v13 = vrot.slane %v4003_v5, 4  ;;  %v4090_v17 = vrot.slane %v4031_v49, 6  ;;  %v4843_v42 = vld [vmem:[#allocation2 + $0x6c] sm:$0xc] }
 0x1a2   : > { %v4088_v38 = vsel %vm7607_vm6, %v6038_v52, %v4087_v4  ;;  %v4089_v6 = vrot.slane %v4087_v4, 4  ;;  %v6039_v60 = vrot.slane %v4032_v45, 10  ;;  %v4094_v27 = vrot.slane %v8251_v19, 6  ;;  %v4844_v45 = vld [vmem:[#allocation2 + $0x74] sm:$0x3] }
 0x1a3   : > { %v4007_v2 = vsel %vm7007_vm1, %v4005_v13, %v4006_v50  ;;  %v4097_v44 = vrot.slane %v4033_v34, 6  ;;  %v6114_v58 = vrot.slane %v4745_v21, 9  ;;  %v4807_v18 = vrot.slane %v8274_v24, 5  ;;  %v8301_v34 = vld [vmem:[#allocation2 + $0x4c] sm:$0xf] }
 0x1a4   : > { %v6055_v30 = vcombine.low %v4004_v16, %v4007_v2  ;;  %v4091_v37 = vsel %vm7607_vm6, %v4089_v6, %v4090_v17  ;;  %v4095_v32 = vsel %vm7607_vm6, %v6039_v60, %v4094_v27  ;;  %v4096_v9 = vrot.slane %v4094_v27, 4  ;;  %v8306_v16 = vld [vmem:[#allocation2 + $0x58] sm:$0xf]  ;;  %v3940_v6 = vld [vmem:[#allocation2 + $0x54] sm:$0xe] }
 0x1a5   : > { %5023 = vrot.lane.b32.xlu1 %v6145_v23, %s6651_s30  ;;  %4177 = vrot.lane.b32.xlu0 %v6054_v47, %s6650_s0  ;;  %v6062_v8 = vcombine.low %v4088_v38, %v4091_v37  ;;  %v4808_v57 = vsel %vm7007_vm1, %v6114_v58, %v4807_v18  ;;  %v4809_v54 = vrot.slane %v4807_v18, 4  ;;  %v4810_v7 = vrot.slane %v4746_v56, 5  ;;  %v3938_v23 = vld [vmem:[#allocation2 + $0x48] sm:$0xe]  ;;  %v3939_v47 = vld [vmem:[#allocation2 + $0x50] sm:$0x1] }
 0x1a6   : > { %v4098_v61 = vsel %vm7607_vm6, %v4096_v9, %v4097_v44  ;;  %v6115_v39 = vrot.slane %v4747_v35, 9  ;;  %v4814_v63 = vrot.slane %v8279_v26, 5  ;;  %v4817_v49 = vrot.slane %v4748_v48, 5  ;;  %v3941_v44 = vld [vmem:[#allocation2 + $0x5c] sm:$0x1] }
 0x1a7   : > { %v6063_v33 = vcombine.low %v4095_v32, %v4098_v61  ;;  %v4811_v11 = vsel %vm7007_vm1, %v4809_v54, %v4810_v7  ;;  %v6122_v5 = vrot.slane %v4841_v0, 10  ;;  %v4895_v50 = vrot.slane %v8274_v24, 6  ;;  %v4034_v37 = vld [vmem:[#allocation2 + $0x48] sm:$0xc]  ;;  %v4035_v32 = vld [vmem:[#allocation2 + $0x50] sm:$0x3] }
 0x1a8   : > { %v6138_v14 = vcombine.low %v4808_v57, %v4811_v11  ;;  %v4815_v52 = vsel %vm7007_vm1, %v6115_v39, %v4814_v63  ;;  %v4816_v4 = vrot.slane %v4814_v63, 4  ;;  %v4898_v21 = vrot.slane %v4842_v3, 6  ;;  %v4036_v54 = vld [vmem:[#allocation2 + $0x54] sm:$0xc]  ;;  %v4037_v7 = vld [vmem:[#allocation2 + $0x5c] sm:$0x3] }
 0x1a9   : > { %4179 = vrot.lane.b32.xlu1 %v6055_v30, %s6650_s0  ;;  %4217 = vrot.lane.b32.xlu0 %v6062_v8, %s6651_s30  ;;  %v4896_v13 = vsel %vm7607_vm6, %v6122_v5, %v4895_v50  ;;  %v4897_v17 = vrot.slane %v4895_v50, 4  ;;  %v6123_v56 = vrot.slane %v4843_v42, 10  ;;  %v4902_v38 = vrot.slane %v8279_v26, 6  ;;  %v1399_v63 = vld [vmem:[%s8967_s4] sm:$0xf] }
 0x1aa   : > { %v4818_v60 = vsel %vm7007_vm1, %v4816_v4, %v4817_v49  ;;  %v4905_v27 = vrot.slane %v4844_v45, 6  ;;  %v6032_v35 = vrot.slane %v3938_v23, 9  ;;  %v4010_v2 = vrot.slane %v8301_v34, 5  ;;  %v8332_v5 = vld [vmem:[#allocation2 + $0x7c] sm:$0xf] }
 0x1ab   : > { %v6139_v58 = vcombine.low %v4815_v52, %v4818_v60  ;;  %v4899_v18 = vsel %vm7607_vm6, %v4897_v17, %v4898_v21  ;;  %v4903_v48 = vsel %vm7607_vm6, %v6123_v56, %v4902_v38  ;;  %v4904_v30 = vrot.slane %v4902_v38, 4  ;;  %v4749_v50 = vld [vmem:[#allocation2 + $0x78] sm:$0xe]  ;;  %v8336_v21 = vld [vmem:[#allocation2 + $0x88] sm:$0xf] }
 0x1ac   : > { %v6146_v9 = vcombine.low %v4896_v13, %v4899_v18  ;;  %v4011_v0 = vsel %vm7007_vm1, %v6032_v35, %v4010_v2  ;;  %v4012_v8 = vrot.slane %v4010_v2, 4  ;;  %v4013_v57 = vrot.slane %v3939_v47, 5  ;;  %v3660_v47 = vld [vmem:[%s8971_s8] sm:$0xf]  ;;  %v4751_v2 = vld [vmem:[#allocation2 + $0x84] sm:$0xe] }
 0x1ad   : > { %4219 = vrot.lane.b32.xlu1 %v6063_v33, %s6651_s30  ;;  %4985 = vrot.lane.b32.xlu0 %v6138_v14, %s6650_s0  ;;  %v4906_v3 = vsel %vm7607_vm6, %v4904_v30, %v4905_v27  ;;  %v6033_v42 = vrot.slane %v3940_v6, 9  ;;  %v4017_v61 = vrot.slane %v8306_v16, 5  ;;  %v4020_v39 = vrot.slane %v3941_v44, 5  ;;  %v4750_v6 = vld [vmem:[#allocation2 + $0x80] sm:$0x1] }
 0x1ae   : > { %v6147_v49 = vcombine.low %v4903_v48, %v4906_v3  ;;  %v4014_v45 = vsel %vm7007_vm1, %v4012_v8, %v4013_v57  ;;  %v6040_v33 = vrot.slane %v4034_v37, 10  ;;  %v4101_v11 = vrot.slane %v8301_v34, 6  ;;  %v4752_v18 = vld [vmem:[#allocation2 + $0x8c] sm:$0x1]  ;;  %v4845_v48 = vld [vmem:[#allocation2 + $0x78] sm:$0xc] }
 0x1af   : > { %v6056_v23 = vcombine.low %v4011_v0, %v4014_v45  ;;  %v4018_v14 = vsel %vm7007_vm1, %v6033_v42, %v4017_v61  ;;  %v4019_v52 = vrot.slane %v4017_v61, 4  ;;  %v4104_v4 = vrot.slane %v4035_v32, 6  ;;  %v4846_v0 = vld [vmem:[#allocation2 + $0x80] sm:$0x3] }
 0x1b0   : > { %v4102_v13 = vsel %vm7607_vm6, %v6040_v33, %v4101_v11  ;;  %v4103_v17 = vrot.slane %v4101_v11, 4  ;;  %v6041_v56 = vrot.slane %v4036_v54, 10  ;;  %v4108_v38 = vrot.slane %v8306_v16, 6 }
 0x1b1   : > { %4987 = vrot.lane.b32.xlu1 %v6139_v58, %s6650_s0  ;;  %5025 = vrot.lane.b32.xlu0 %v6146_v9, %s6651_s30  ;;  %v4021_v60 = vsel %vm7007_vm1, %v4019_v52, %v4020_v39  ;;  %v4111_v27 = vrot.slane %v4037_v7, 6  ;;  %vm3685_vm14 = vcmask 1043456   ;;  %v6116_v35 = vrot.slane %v4749_v50, 9  ;;  %v4848_v50 = vld [vmem:[#allocation2 + $0x8c] sm:$0x3] }
 0x1b2   : > { %v4105_v44 = vsel %vm7607_vm6, %v4103_v17, %v4104_v4  ;;  %v4110_v58 = vrot.slane %v4108_v38, 4  ;;  %6507 = vmatprep.subr.msk.bf16.mxu1 %vm3685_vm14, %v1399_v63  ;;  %6506 = vmatprep.subr.msk.bf16.mxu0 %vm3685_vm14, %v3660_v47  ;;  %v6057_v30 = vcombine.low %v4018_v14, %v4021_v60  ;;  %v3811_v37 = vsel %vm3685_vm14, %v1399_v63, 0  ;;  %v4847_v63 = vld [vmem:[#allocation2 + $0x84] sm:$0xc] }
 0x1b3   : > { %v4821_v32 = vrot.slane %v8332_v5, 5  ;;  %v4824_v9 = vrot.slane %v4750_v6, 5  ;;  %v6064_v8 = vcombine.low %v4102_v13, %v4105_v44  ;;  %v4109_v57 = vsel %vm7607_vm6, %v6041_v56, %v4108_v38  ;;  %6401 = vmatpush3.bf16.msra.mxu1 %v3811_v37  ;;  %v8407_v37 = vld [vmem:[%s9235_s3] ss:$0 sm:$0xff] }
 0x1b4   : > { %v6117_v54 = vrot.slane %v4751_v2, 9  ;;  %v4828_v7 = vrot.slane %v8336_v21, 5  ;;  %v4112_v3 = vsel %vm7607_vm6, %v4110_v58, %v4111_v27  ;;  %v4831_v39 = vrot.slane %v4752_v18, 5  ;;  %v8390_v58 = vld [vmem:[%s8972_s9 + $0x8] sm:$0x3f]   ;;  %6509 = vmatprep.subr.msk.bf16.mxu1 %vm2587_vm11, %v6577_v28 }
 0x1b5   : > { %5027 = vrot.lane.b32.xlu1 %v6147_v49, %s6651_s30  ;;  %4181 = vrot.lane.b32.xlu0 %v6056_v23, %s6650_s0  ;;  %v4822_v42 = vsel %vm7007_vm1, %v6116_v35, %v4821_v32  ;;  %v4823_v61 = vrot.slane %v4821_v32, 4  ;;  %v6124_v45 = vrot.slane %v4845_v48, 10  ;;  %v4909_v33 = vrot.slane %v8332_v5, 6  ;;  %v8401_v18 = vld [vmem:[%s9234_s24] ss:$0 sm:$0xff] }
 0x1b6   : > { %v4830_v49 = vrot.slane %v4828_v7, 4  ;;  %v4912_v11 = vrot.slane %v4846_v0, 6  ;;  %v3687_v23 = vsel %vm3685_vm14, %v3660_v47, 0  ;;  %v4916_v52 = vrot.slane %v8336_v21, 6 }
 0x1b7   : > { %v4825_v14 = vsel %vm7007_vm1, %v4823_v61, %v4824_v9  ;;  %v6065_v4 = vcombine.low %v4109_v57, %v4112_v3  ;;  %v4829_v13 = vsel %vm7007_vm1, %v6117_v54, %v4828_v7  ;;  %v4911_v17 = vrot.slane %v4909_v33, 4  ;;  %6383 = vmatpush3.bf16.msra.mxu0 %v3687_v23 }
 0x1b8   : > { %v6125_v56 = vrot.slane %v4847_v63, 10  ;;  %v6140_v5 = vcombine.low %v4822_v42, %v4825_v14  ;;  %v4832_v38 = vsel %vm7007_vm1, %v4830_v49, %v4831_v39  ;;  %v4918_v6 = vrot.slane %v4916_v52, 4  ;;  %6508 = vmatprep.subr.msk.bf16.mxu0 %vm2587_vm11, %v8390_v58 }
 0x1b9   : > { %4183 = vrot.lane.b32.xlu1 %v6057_v30, %s6650_s0  ;;  %4221 = vrot.lane.b32.xlu0 %v6064_v8, %s6651_s30  ;;  %v4919_v60 = vrot.slane %v4848_v50, 6  ;;  %v4910_v21 = vsel %vm7607_vm6, %v6124_v45, %v4909_v33  ;;  %v4913_v47 = vsel %vm7607_vm6, %v4911_v17, %v4912_v11  ;;  %v6141_v27 = vcombine.low %v4829_v13, %v4832_v38 }
 0x1ba   : > { %v6148_v35 = vcombine.low %v4910_v21, %v4913_v47  ;;  %v4917_v2 = vsel %vm7607_vm6, %v6125_v56, %v4916_v52  ;;  %v8423_v56 = vpop.permute.xlu0 %4439  ;;  %v4621_v47 = vsel %vm2587_vm11, %v6577_v28, 0  ;;  %vm6653_vm15 = vmmov 0  }
 0x1bb   : > { %v4920_v46 = vsel %vm7607_vm6, %v4918_v6, %v4919_v60 }
 0x1bc   : > { %v6149_v44 = vcombine.low %v4917_v2, %v4920_v46 }
 0x1bd   : > { %4223 = vrot.lane.b32.xlu1 %v6065_v4, %s6651_s30  ;;  %4989 = vrot.lane.b32.xlu0 %v6140_v5, %s6650_s0 }
 0x1c1   : > { %4991 = vrot.lane.b32.xlu1 %v6141_v27, %s6650_s0  ;;  %5029 = vrot.lane.b32.xlu0 %v6148_v35, %s6651_s30  ;;  %s9239_s0 = sld [smem:[#allocation42_spill]] }
 0x1c5   : > { %5031 = vrot.lane.b32.xlu1 %v6149_v44, %s6651_s30 }
 0x1d5   : > { %v6314_v48 = vpop.f32.mrf.mxu0 }
 0x1d6   : > { %v1338_v30 = vmul.f32 %v6314_v48, %v8401_v18  ;;  %v8436_v48 = vpop.permute.xlu1 %4441 }
 0x1d7   : > { %v1266_v32 = vpop.f32.mrf.mxu0 }
 0x1d8   : > { %v1336_v9 = vmul.f32 %v8401_v18, %v1266_v32  ;;  %v1361_v0 = vadd.f32 %v8407_v37, %v1338_v30 }
 0x1d9   : > { %v6315_v8 = vpop.f32.mrf.mxu0 }
 0x1da   : > { %v1359_v57 = vadd.f32 %v8407_v37, %v1336_v9  ;;  %v1339_v54 = vmul.f32 %v6315_v8, %v8401_v18  ;;  %v1377_v61 = vmax.f32 %v1361_v0, 0.0 }
 0x1db   : > { %v1269_v7 = vpop.f32.mrf.mxu0 }
 0x1dc   : > { %v1362_v3 = vadd.f32 %v8407_v37, %v1339_v54  ;;  %v1337_v42 = vmul.f32 %v8401_v18, %v1269_v7  ;;  %v1375_v63 = vmax.f32 %v1359_v57, 0.0 }
 0x1dd   : > { %v6318_v39 = vpop.f32.mrf.mxu0 }
 0x1de   : > { %v1378_v49 = vmax.f32 %v1362_v3, 0.0  ;;  %v1360_v45 = vadd.f32 %v8407_v37, %v1337_v42  ;;  %v1342_v33 = vmul.f32 %v6318_v39, %v8401_v18 }
 0x1df   : > { %v1282_v50 = vpop.f32.mrf.mxu0 }
 0x1e0   : > { %v1376_v14 = vmax.f32 %v1360_v45, 0.0  ;;  %v1340_v23 = vmul.f32 %v8401_v18, %v1282_v50  ;;  %v1392_v52 = vpack.c.bf16 %v1378_v49, %v1377_v61  ;;  %v1365_v13 = vadd.f32 %v8407_v37, %v1342_v33  ;;  %v4721_v50 = vld [vmem:[#allocation2 + $0x30] sm:$0xf] }
 0x1e1   : > { %v8417_v11 = vpop.f32.mrf.mxu1  ;;  %v6319_v17 = vpop.f32.mrf.mxu0 }
 0x1e2   : > { %v1391_v5 = vpack.c.bf16 %v1376_v14, %v1375_v63  ;;  %v1363_v38 = vadd.f32 %v8407_v37, %v1340_v23  ;;  %v1343_v6 = vmul.f32 %v6319_v17, %v8401_v18  ;;  %v1381_v2 = vmax.f32 %v1365_v13, 0.0 }
 0x1e3   : > { %v8420_v4 = vpop.f32.mrf.mxu1  ;;  %v1285_v21 = vpop.f32.mrf.mxu0 }
 0x1e4   : > { %v1366_v27 = vadd.f32 %v8407_v37, %v1343_v6  ;;  %v1341_v35 = vmul.f32 %v8401_v18, %v1285_v21  ;;  %6402 = vmatprep.mubr.msk.bf16.mxu1 %vm2031_vm12, %v1391_v5  ;;  %v1379_v30 = vmax.f32 %v1363_v38, 0.0  ;;  %v6126_v21 = vcombine.low %v4721_v50, %v8138_v36 }
 0x1e5   : > { %v8427_v60 = vpop.f32.mrf.mxu1  ;;  %v6322_v44 = vpop.f32.mrf.mxu0  ;;  %6403 = vmatmul.mubr.msk.bf16.vlgmr.msra.gmra.mxu1 %vm2031_vm12, %v1392_v52 }
 0x1e6   : > { %v1382_v32 = vmax.f32 %v1366_v27, 0.0  ;;  %v1364_v9 = vadd.f32 %v8407_v37, %v1341_v35  ;;  %v1346_v28 = vmul.f32 %v6322_v44, %v8401_v18  ;;  %6437 = vmatpush3.bf16.msra.mxu1 %v4621_v47  ;;  %v4723_v47 = vld [vmem:[#allocation2 + $0x3c] sm:$0xf] }
 0x1e7   : > { %v8433_v46 = vpop.f32.mrf.mxu1  ;;  %v1298_v57 = vpop.f32.mrf.mxu0  ;;  %v6127_v36 = vcombine.low %v4723_v47, %v8150_v25  ;;  %v5426_v47 = vld [vmem:[%s6830_s29 + $0x10] sm:$0xff] }
 0x1e8   : > { %v1380_v54 = vmax.f32 %v1364_v9, 0.0  ;;  %v1344_v7 = vmul.f32 %v8401_v18, %v1298_v57  ;;  %v1394_v3 = vpack.c.bf16 %v1382_v32, %v1381_v2  ;;  %v1369_v61 = vadd.f32 %v8407_v37, %v1346_v28  ;;  %v5424_v32 = vld [vmem:[%s6830_s29] sm:$0xff]  ;;  %v5425_v9 = vld [vmem:[%s6830_s29 + $0x8] sm:$0xff] }
 0x1e9   : > { %v6323_v39 = vpop.f32.mrf.mxu0  ;;  %v5456_v50 = vsel %vm1203_vm7, %v5424_v32, 0.0 }
 0x1ea   : > { %v8442_v8 = vpop.f32.mrf.mxu1  ;;  %v1393_v63 = vpack.c.bf16 %v1380_v54, %v1379_v30  ;;  %v1367_v49 = vadd.f32 %v8407_v37, %v1344_v7  ;;  %v1347_v45 = vmul.f32 %v6323_v39, %v8401_v18  ;;  %v1385_v5 = vmax.f32 %v1369_v61, 0.0 }
 0x1eb   : > { %v1301_v23 = vpop.f32.mrf.mxu0 }
 0x1ec   : > { %v8445_v42 = vpop.f32.mrf.mxu1  ;;  %v1370_v52 = vadd.f32 %v8407_v37, %v1347_v45  ;;  %v1345_v13 = vmul.f32 %v8401_v18, %v1301_v23  ;;  %6406 = vmatprep.mubr.msk.bf16.mxu1 %vm2031_vm12, %v1393_v63  ;;  %v1383_v27 = vmax.f32 %v1367_v49, 0.0  ;;  %v3910_v45 = vld [vmem:[#allocation2] sm:$0xf]  ;;  %v5457_v23 = vsel %vm1203_vm7, %v5425_v9, 0.0 }
 0x1ed   : > { %6407 = vmatmul.mubr.msk.bf16.gmra.mxu1 %vm2031_vm12, %v1394_v3 }
 0x1ee   : > { %v8452_v14 = vpop.f32.mrf.mxu1  ;;  %v1386_v35 = vmax.f32 %v1370_v52, 0.0  ;;  %v1368_v2 = vadd.f32 %v8407_v37, %v1345_v13 }
 0x1ef   : > { %v6326_v6 = vpop.f32.mrf.mxu0 }
 0x1f0   : > { %v8459_v38 = vpop.f32.mrf.mxu1  ;;  %v1350_v44 = vmul.f32 %v6326_v6, %v8401_v18  ;;  %v1384_v54 = vmax.f32 %v1368_v2, 0.0  ;;  %v1396_v61 = vpack.c.bf16 %v1386_v35, %v1385_v5 }
 0x1f1   : > { %v1314_v57 = vpop.f32.mrf.mxu0 }
 0x1f2   : > { %v8469_v28 = vpop.f32.mrf.mxu1  ;;  %v1348_v7 = vmul.f32 %v8401_v18, %v1314_v57  ;;  %v1373_v63 = vadd.f32 %v8407_v37, %v1350_v44  ;;  %v1395_v52 = vpack.c.bf16 %v1384_v54, %v1383_v27  ;;  %v6042_v27 = vcombine.low %v3910_v45, %v8105_v29  ;;  %v3912_v45 = vld [vmem:[#allocation2 + $0xc] sm:$0xf] }
 0x1f3   : > { %v6327_v49 = vpop.f32.mrf.mxu0 }
 0x1f4   : > { %v8473_v39 = vpop.f32.mrf.mxu1  ;;  %v1371_v13 = vadd.f32 %v8407_v37, %v1348_v7  ;;  %v1351_v6 = vmul.f32 %v6327_v49, %v8401_v18  ;;  %6410 = vmatprep.mubr.msk.bf16.mxu1 %vm2031_vm12, %v1395_v52  ;;  %v1389_v54 = vmax.f32 %v1373_v63, 0.0  ;;  %v5459_v52 = vsel %vm1203_vm7, %v5426_v47, 0.0 }
 0x1f5   : > { %v1317_v5 = vpop.f32.mrf.mxu0  ;;  %6411 = vmatmul.mubr.msk.bf16.gmra.mxu1 %vm2031_vm12, %v1396_v61 }
 0x1f6   : > { %v8440_v0 = vpop.permute.xlu0 %4169  ;;  %v8481_v25 = vpop.f32.mrf.mxu1  ;;  %v1374_v35 = vadd.f32 %v8407_v37, %v1351_v6  ;;  %v1349_v44 = vmul.f32 %v8401_v18, %v1317_v5  ;;  %v1387_v49 = vmax.f32 %v1371_v13, 0.0 }
 0x1f7   : > { %v4227_v61 = vsel %vm1203_vm7, %v6042_v27, %v8440_v0 }
 0x1f8   : > { %v8489_v7 = vpop.f32.mrf.mxu1  ;;  %v1390_v6 = vmax.f32 %v1374_v35, 0.0  ;;  %v1372_v18 = vadd.f32 %v8407_v37, %v1349_v44  ;;  %v6043_v44 = vcombine.low %v3912_v45, %v8114_v55 }
 0x1fa   : > { %v8450_v33 = vpop.permute.xlu1 %4171  ;;  %v1388_v63 = vmax.f32 %v1372_v18, 0.0  ;;  %v5428_v18 = vld [vmem:[%s6830_s29 + $0x20] sm:$0xff] }
 0x1fb   : > { %v8457_v17 = vpop.permute.xlu0 %4209 }
 0x1fc   : > { %v1397_v37 = vpack.c.bf16 %v1388_v63, %v1387_v49  ;;  %v3916_v63 = vld [vmem:[#allocation2 + $0x24] sm:$0xf] }
 0x1fe   : > { %v8465_v30 = vpop.permute.xlu1 %4211  ;;  %6414 = vmatprep.mubr.msk.bf16.mxu1 %vm2031_vm12, %v1397_v37 }
 0x1ff   : > { %v4978_v3 = vpop.permute.xlu0 %4977 }
 0x200   : > { %v5035_v2 = vsel %vm1203_vm7, %v6126_v21, %v4978_v3  ;;  %v5458_v3 = vadd.f32 %v5457_v23, %v5456_v50  ;;  %v1398_v50 = vpack.c.bf16 %v1390_v6, %v1389_v54  ;;  %v3914_v23 = vld [vmem:[#allocation2 + $0x18] sm:$0xf] }
 0x201   : > { %v6044_v0 = vcombine.low %v3914_v23, %v8177_v15  ;;  %v5429_v15 = vld [vmem:[%s6830_s29 + $0x28] sm:$0xff] }
 0x202   : > { %v5460_v13 = vadd.f32 %v5459_v52, %v5458_v3  ;;  %6415 = vmatmul.mubr.msk.bf16.gmra.mxu1 %vm2031_vm12, %v1398_v50  ;;  %v4727_v3 = vld [vmem:[#allocation2 + $0x54] sm:$0xf]  ;;  %v4230_v52 = vsel %vm1203_vm7, %v6043_v44, %v8450_v33  ;;  %v5465_v33 = vsel %vm1203_vm7, %v5429_v15, 0.0  ;;  %v6045_v44 = vcombine.low %v3916_v63, %v8189_v1 }
 0x203   : > { %v4980_v57 = vpop.permute.xlu1 %4979  ;;  %v5018_v9 = vpop.permute.xlu0 %5017  ;;  %v6129_v45 = vcombine.low %v4727_v3, %v8225_v41 }
 0x204   : > { %v5038_v32 = vsel %vm1203_vm7, %v6127_v36, %v4980_v57  ;;  %v8493_v21 = vsel %vm2031_vm12, %v5035_v2, %v5018_v9  ;;  %v5427_v36 = vld [vmem:[%s6830_s29 + $0x18] sm:$0xff]  ;;  %v8503_v57 = vpop.f32.mrf.mxu1  ;;  %v4725_v9 = vld [vmem:[#allocation2 + $0x48] sm:$0xf] }
 0x205   : > { %v5461_v47 = vsel %vm1203_vm7, %v5427_v36, 0.0  ;;  %v6128_v55 = vcombine.low %v4725_v9, %v8214_v51  ;;  %v4252_v51 = vsel %vm2031_vm12, %v4230_v52, %v8465_v30  ;;  %v5430_v9 = vld [vmem:[%s6830_s29 + $0x30] sm:$0xff] }
 0x206   : > { %v8512_v54 = vpop.f32.mrf.mxu1  ;;  %v5462_v49 = vadd.f32 %v5461_v47, %v5460_v13 }
 0x207   : > { %v5020_v5 = vpop.permute.xlu1 %5019  ;;  %v4174_v2 = vpop.permute.xlu0 %4173 }
 0x208   : > { %v8498_v29 = vsel %vm2031_vm12, %v5038_v32, %v5020_v5  ;;  %v4250_v32 = vsel %vm2031_vm12, %v4227_v61, %v8457_v17  ;;  %v5463_v17 = vsel %vm1203_vm7, %v5428_v18, 0.0  ;;  %v6350_v5 = vpop.f32.mrf.mxu0  ;;  %v4233_v36 = vsel %vm1203_vm7, %v6044_v0, %v4174_v2  ;;  %v8523_v50 = vpop.f32.mrf.mxu1 }
 0x209   : > { %6438 = vmatprep.mubr.msk.bf16.mxu1 %vm2570_vm13, %v4250_v32  ;;  %v5464_v13 = vadd.f32 %v5463_v17, %v5462_v49  ;;  %v3918_v32 = vld [vmem:[#allocation2 + $0x30] sm:$0xf]  ;;  %v2755_v17 = vadd.f32 %v6350_v5, %v8417_v11  ;;  %v8553_v11 = vld [vmem:[%s8969_s6] ss:$0 sm:$0xff] }
 0x20a   : > { %v2746_v23 = vpop.f32.mrf.mxu0  ;;  %v8533_v0 = vpop.f32.mrf.mxu1  ;;  %6439 = vmatmul.mubr.msk.bf16.vlgmr.msra.gmra.mxu1 %vm2570_vm13, %v4252_v51  ;;  %v6046_v1 = vcombine.low %v3918_v32, %v8247_v22  ;;  %v4729_v32 = vld [vmem:[#allocation2 + $0x60] sm:$0xf] }
 0x20b   : > { %v4176_v35 = vpop.permute.xlu1 %4175  ;;  %v4214_v27 = vpop.permute.xlu0 %4213  ;;  %v5466_v49 = vadd.f32 %v5465_v33, %v5464_v13  ;;  %v2747_v63 = vadd.f32 %v2746_v23, %v8420_v4  ;;  %v5431_v13 = vld [vmem:[%s6830_s29 + $0x38] sm:$0xff] }
 0x20c   : > { %v4254_v2 = vsel %vm2031_vm12, %v4233_v36, %v4214_v27  ;;  %v6351_v3 = vpop.f32.mrf.mxu0  ;;  %v5467_v27 = vsel %vm1203_vm7, %v5430_v9, 0.0  ;;  %v4236_v15 = vsel %vm1203_vm7, %v6045_v44, %v4176_v35  ;;  %v5469_v9 = vsel %vm1203_vm7, %v5431_v13, 0.0 }
 0x20d   : > { %6442 = vmatprep.mubr.msk.bf16.mxu1 %vm2570_vm13, %v4254_v2  ;;  %v2758_v33 = vadd.f32 %v6351_v3, %v8427_v60 }
 0x20e   : > { %v2749_v51 = vpop.f32.mrf.mxu0 }
 0x20f   : > { %v4216_v6 = vpop.permute.xlu1 %4215  ;;  %v4982_v61 = vpop.permute.xlu0 %4981 }
 0x210   : > { %v5041_v37 = vsel %vm1203_vm7, %v6128_v55, %v4982_v61  ;;  %v6368_v52 = vpop.f32.mrf.mxu1  ;;  %v4256_v5 = vsel %vm2031_vm12, %v4236_v15, %v4216_v6  ;;  %v6130_v15 = vcombine.low %v4729_v32, %v8274_v24 }
 0x212   : > { %v3511_v22 = vpop.f32.mrf.mxu1  ;;  %6443 = vmatmul.mubr.msk.bf16.gmra.mxu1 %vm2570_vm13, %v4256_v5  ;;  %v5433_v5 = vld [vmem:[%s6830_s29 + $0x48] sm:$0xff] }
 0x213   : > { %v4984_v47 = vpop.permute.xlu1 %4983  ;;  %v5022_v18 = vpop.permute.xlu0 %5021  ;;  %v3574_v35 = vadd.f32 %v3511_v22, %v2747_v63 }
 0x214   : > { %v5044_v41 = vsel %vm1203_vm7, %v6129_v45, %v4984_v47  ;;  %v8537_v30 = vsel %vm2031_vm12, %v5041_v37, %v5022_v18  ;;  %v3920_v45 = vld [vmem:[#allocation2 + $0x3c] sm:$0xf]  ;;  %v3576_v37 = vadd.f32 %v6368_v52, %v2755_v17  ;;  %v5468_v47 = vadd.f32 %v5467_v27, %v5466_v49  ;;  %v6369_v44 = vpop.f32.mrf.mxu1  ;;  %v5432_v49 = vld [vmem:[%s6830_s29 + $0x40] sm:$0xff] }
 0x215   : > { %v6047_v2 = vcombine.low %v3920_v45, %v8251_v19  ;;  %v3597_v60 = vmul.f32 %v8553_v11, %v3574_v35  ;;  %v3577_v18 = vadd.f32 %v6369_v44, %v2758_v33  ;;  %v8568_v19 = vld [vmem:[%s8970_s7] ss:$0 sm:$0xff]  ;;  %v5471_v13 = vsel %vm1203_vm7, %v5432_v49, 0.0 }
 0x216   : > { %v3514_v27 = vpop.f32.mrf.mxu1  ;;  %v5470_v63 = vadd.f32 %v5469_v9, %v5468_v47 }
 0x217   : > { %v5024_v55 = vpop.permute.xlu1 %5023  ;;  %v4178_v61 = vpop.permute.xlu0 %4177 }
 0x218   : > { %v8545_v36 = vsel %vm2031_vm12, %v5044_v41, %v5024_v55  ;;  %v4239_v4 = vsel %vm1203_vm7, %v6046_v1, %v4178_v61  ;;  %v2750_v41 = vadd.f32 %v2749_v51, %v8433_v46  ;;  %v3599_v55 = vmul.f32 %v8553_v11, %v3576_v37  ;;  %v4731_v1 = vld [vmem:[#allocation2 + $0x6c] sm:$0xf] }
 0x219   : > { %v3600_v46 = vmul.f32 %v8553_v11, %v3577_v18  ;;  %v3620_v51 = vadd.f32 %v8568_v19, %v3597_v60  ;;  %v6131_v35 = vcombine.low %v4731_v1, %v8279_v26  ;;  %v5472_v32 = vadd.f32 %v5471_v13, %v5470_v63 }
 0x21a   : > { %v3575_v17 = vadd.f32 %v3514_v27, %v2750_v41  ;;  %v6354_v61 = vpop.f32.mrf.mxu0  ;;  %v3622_v24 = vadd.f32 %v8568_v19, %v3599_v55  ;;  %v3922_v41 = vld [vmem:[#allocation2 + $0x48] sm:$0xf]  ;;  %v5473_v60 = vsel %vm1203_vm7, %v5433_v5, 0.0  ;;  %v5434_v27 = vld [vmem:[%s6830_s29 + $0x50] sm:$0xff] }
 0x21b   : > { %v4180_v23 = vpop.permute.xlu1 %4179  ;;  %v4218_v3 = vpop.permute.xlu0 %4217  ;;  %v3623_v37 = vadd.f32 %v8568_v19, %v3600_v46  ;;  %v3636_v18 = vmax.f32 %v3620_v51, 0.0  ;;  %v3924_v46 = vld [vmem:[#allocation2 + $0x54] sm:$0xf]  ;;  %v6048_v63 = vcombine.low %v3922_v41, %v8301_v34  ;;  %v2771_v51 = vadd.f32 %v6354_v61, %v8442_v8 }
 0x21c   : > { %v4258_v6 = vsel %vm2031_vm12, %v4239_v4, %v4218_v3  ;;  %v4242_v45 = vsel %vm1203_vm7, %v6047_v2, %v4180_v23  ;;  %v3598_v22 = vmul.f32 %v8553_v11, %v3575_v17  ;;  %v2762_v4 = vpop.f32.mrf.mxu0  ;;  %v3638_v55 = vmax.f32 %v3622_v24, 0.0  ;;  %v5435_v24 = vld [vmem:[%s6830_s29 + $0x58] sm:$0xff] }
 0x21d   : > { %6446 = vmatprep.mubr.msk.bf16.mxu1 %vm2570_vm13, %v4258_v6  ;;  %v3639_v9 = vmax.f32 %v3623_v37, 0.0  ;;  %v6049_v5 = vcombine.low %v3924_v46, %v8306_v16  ;;  %v5477_v16 = vsel %vm1203_vm7, %v5435_v24, 0.0 }
 0x21e   : > { %v3621_v47 = vadd.f32 %v8568_v19, %v3598_v22  ;;  %v6355_v6 = vpop.f32.mrf.mxu0  ;;  %v8598_v22 = vld [vmem:[%s8972_s9 + $0x10] sm:$0x3f]  }
 0x21f   : > { %v4220_v52 = vpop.permute.xlu1 %4219  ;;  %v4986_v33 = vpop.permute.xlu0 %4985  ;;  %v3653_v13 = vpack.c.bf16 %v3639_v9, %v3638_v55 }
 0x220   : > { %v4260_v23 = vsel %vm2031_vm12, %v4242_v45, %v4220_v52  ;;  %v5047_v44 = vsel %vm1203_vm7, %v6130_v15, %v4986_v33  ;;  %v3637_v3 = vmax.f32 %v3621_v47, 0.0  ;;  %v4500_v52 = vsel %vm2587_vm11, %v8390_v58, 0  ;;  %v2765_v8 = vpop.f32.mrf.mxu0 }
 0x221   : > { %6447 = vmatmul.mubr.msk.bf16.gmra.mxu1 %vm2570_vm13, %v4260_v23  ;;  %v5474_v45 = vadd.f32 %v5473_v60, %v5472_v32  ;;  %v2763_v58 = vadd.f32 %v2762_v4, %v8445_v42  ;;  %v2774_v23 = vadd.f32 %v6355_v6, %v8452_v14  ;;  %v2766_v9 = vadd.f32 %v2765_v8, %v8459_v38 }
 0x222   : > { %v3652_v17 = vpack.c.bf16 %v3637_v3, %v3636_v18  ;;  %v5436_v3 = vld [vmem:[%s6830_s29 + $0x60] sm:$0xff] }
 0x223   : > { %v4988_v2 = vpop.permute.xlu1 %4987  ;;  %v5026_v49 = vpop.permute.xlu0 %5025 }
 0x224   : > { %v5050_v26 = vsel %vm1203_vm7, %v6131_v35, %v4988_v2  ;;  %v8588_v1 = vsel %vm2031_vm12, %v5047_v44, %v5026_v49  ;;  %v6372_v37 = vpop.f32.mrf.mxu1  ;;  %v5475_v35 = vsel %vm1203_vm7, %v5434_v27, 0.0  ;;  %6384 = vmatprep.mubr.msk.bf16.mxu0 %vm2031_vm12, %v3652_v17 }
 0x225   : > { %v3580_v61 = vadd.f32 %v6372_v37, %v2771_v51  ;;  %6385 = vmatmul.mubr.msk.bf16.vlgmr.msra.gmra.mxu0 %vm2031_vm12, %v3653_v13  ;;  %v5476_v42 = vadd.f32 %v5475_v35, %v5474_v45  ;;  %v5437_v51 = vld [vmem:[%s6830_s29 + $0x68] sm:$0xff] }
 0x226   : > { %v3527_v47 = vpop.f32.mrf.mxu1  ;;  %6419 = vmatpush3.bf16.msra.mxu0 %v4500_v52  ;;  %v5481_v24 = vsel %vm1203_vm7, %v5437_v51, 0.0 }
 0x227   : > { %v5028_v15 = vpop.permute.xlu1 %5027  ;;  %v4182_v34 = vpop.permute.xlu0 %4181  ;;  %v3578_v44 = vadd.f32 %v3527_v47, %v2763_v58  ;;  %6510 = vmatprep.subr.msk.bf16.mxu0 %vm2587_vm11, %v8598_v22  ;;  %v5478_v38 = vadd.f32 %v5477_v16, %v5476_v42  ;;  %v5438_v47 = vld [vmem:[%s6830_s29 + $0x70] sm:$0xff] }
 0x228   : > { %v8601_v33 = vsel %vm2031_vm12, %v5050_v26, %v5028_v15  ;;  %v4245_v2 = vsel %vm1203_vm7, %v6048_v63, %v4182_v34  ;;  %v6373_v4 = vpop.f32.mrf.mxu1  ;;  %v3603_v26 = vmul.f32 %v8553_v11, %v3580_v61  ;;  %v5479_v15 = vsel %vm1203_vm7, %v5436_v3, 0.0 }
 0x229   : > { %v3601_v41 = vmul.f32 %v8553_v11, %v3578_v44  ;;  %v3581_v60 = vadd.f32 %v6373_v4, %v2774_v23  ;;  %v5480_v34 = vadd.f32 %v5479_v15, %v5478_v38  ;;  %v5440_v38 = vld [vmem:[%s6830_s29 + $0x80] sm:$0xff] }
 0x22a   : > { %v3530_v49 = vpop.f32.mrf.mxu1  ;;  %v3626_v37 = vadd.f32 %v8568_v19, %v3603_v26 }
 0x22b   : > { %v4184_v32 = vpop.permute.xlu1 %4183  ;;  %v4222_v14 = vpop.permute.xlu0 %4221  ;;  %v3604_v55 = vmul.f32 %v8553_v11, %v3581_v60  ;;  %v3579_v6 = vadd.f32 %v3530_v49, %v2766_v9  ;;  %v3624_v63 = vadd.f32 %v8568_v19, %v3601_v41  ;;  %v5483_v9 = vsel %vm1203_vm7, %v5438_v47, 0.0  ;;  %v5439_v60 = vld [vmem:[%s6830_s29 + $0x78] sm:$0xff] }
 0x22c   : > { %v4248_v18 = vsel %vm1203_vm7, %v6049_v5, %v4184_v32  ;;  %v4262_v27 = vsel %vm2031_vm12, %v4245_v2, %v4222_v14  ;;  %v3642_v23 = vmax.f32 %v3626_v37, 0.0  ;;  %v5482_v32 = vadd.f32 %v5481_v24, %v5480_v34 }
 0x22d   : > { %6450 = vmatprep.mubr.msk.bf16.mxu1 %vm2570_vm13, %v4262_v27  ;;  %v6358_v17 = vpop.f32.mrf.mxu0  ;;  %v3627_v45 = vadd.f32 %v8568_v19, %v3604_v55  ;;  %v3602_v13 = vmul.f32 %v8553_v11, %v3579_v6  ;;  %v3640_v8 = vmax.f32 %v3624_v63, 0.0 }
 0x22e   : > { %v2787_v4 = vadd.f32 %v6358_v17, %v8469_v28  ;;  %v5484_v27 = vadd.f32 %v5483_v9, %v5482_v32  ;;  %v5485_v28 = vsel %vm1203_vm7, %v5439_v60, 0.0 }
 0x22f   : > { %v4224_v46 = vpop.permute.xlu1 %4223  ;;  %v2778_v35 = vpop.f32.mrf.mxu0  ;;  %v3625_v58 = vadd.f32 %v8568_v19, %v3602_v13  ;;  %v3643_v5 = vmax.f32 %v3627_v45, 0.0  ;;  %v5487_v13 = vsel %vm1203_vm7, %v5440_v38, 0.0 }
 0x230   : > { %v4264_v52 = vsel %vm2031_vm12, %v4248_v18, %v4224_v46  ;;  %v2779_v41 = vadd.f32 %v2778_v35, %v8473_v39  ;;  %v5441_v35 = vld [vmem:[%s6830_s29 + $0x88] sm:$0xff] }
 0x231   : > { %6451 = vmatmul.mubr.msk.bf16.gmra.mxu1 %vm2570_vm13, %v4264_v52  ;;  %v3641_v61 = vmax.f32 %v3625_v58, 0.0  ;;  %v6359_v44 = vpop.f32.mrf.mxu0  ;;  %v3655_v42 = vpack.c.bf16 %v3643_v5, %v3642_v23 }
 0x232   : > { %v2790_v26 = vadd.f32 %v6359_v44, %v8481_v25  ;;  %v5486_v25 = vadd.f32 %v5485_v28, %v5484_v27  ;;  %v5442_v44 = vld [vmem:[%s6830_s29 + $0x90] sm:$0xff] }
 0x233   : > { %v3654_v2 = vpack.c.bf16 %v3641_v61, %v3640_v8  ;;  %v2781_v18 = vpop.f32.mrf.mxu0  ;;  %v5489_v61 = vsel %vm1203_vm7, %v5441_v35, 0.0  ;;  %v5491_v9 = vsel %vm1203_vm7, %v5442_v44, 0.0 }
 0x234   : > { %v2782_v6 = vadd.f32 %v2781_v18, %v8489_v7  ;;  %v5488_v24 = vadd.f32 %v5487_v13, %v5486_v25  ;;  %v5443_v18 = vld [vmem:[%s6830_s29 + $0x98] sm:$0xff] }
 0x235   : > { %6388 = vmatprep.mubr.msk.bf16.mxu0 %vm2031_vm12, %v3654_v2 }
 0x236   : > { %v6376_v16 = vpop.f32.mrf.mxu1  ;;  %6389 = vmatmul.mubr.msk.bf16.gmra.mxu0 %vm2031_vm12, %v3655_v42 }
 0x237   : > { %v3584_v14 = vadd.f32 %v6376_v16, %v2787_v4  ;;  %v5490_v4 = vadd.f32 %v5489_v61, %v5488_v24  ;;  %v6560_v24 = vld [vmem:[#allocation2 + $0x18] sm:$0xff]  }
 0x238   : > { %v3543_v3 = vpop.f32.mrf.mxu1 }
 0x239   : > { %v3582_v49 = vadd.f32 %v3543_v3, %v2779_v41  ;;  %v3607_v17 = vmul.f32 %v8553_v11, %v3584_v14  ;;  %v5492_v27 = vadd.f32 %v5491_v9, %v5490_v4  ;;  %v5448_v9 = vld [vmem:[%s6830_s29 + $0xc0] sm:$0xff] }
 0x23a   : > { %v6377_v55 = vpop.f32.mrf.mxu1 }
 0x23b   : > { %v3605_v39 = vmul.f32 %v8553_v11, %v3582_v49  ;;  %v3585_v46 = vadd.f32 %v6377_v55, %v2790_v26  ;;  %v3630_v58 = vadd.f32 %v8568_v19, %v3607_v17 }
 0x23c   : > { %v3546_v52 = vpop.f32.mrf.mxu1 }
 0x23d   : > { %v3608_v15 = vmul.f32 %v8553_v11, %v3585_v46  ;;  %v3583_v63 = vadd.f32 %v3546_v52, %v2782_v6  ;;  %v3628_v51 = vadd.f32 %v8568_v19, %v3605_v39  ;;  %v3646_v2 = vmax.f32 %v3630_v58, 0.0 }
 0x23e   : > { %v5493_v6 = vsel %vm1203_vm7, %v5443_v18, 0.0  ;;  %v5449_v18 = vld [vmem:[%s6830_s29 + $0xc8] sm:$0xff] }
 0x23f   : > { %v3631_v37 = vadd.f32 %v8568_v19, %v3608_v15  ;;  %v3606_v7 = vmul.f32 %v8553_v11, %v3583_v63  ;;  %v3644_v47 = vmax.f32 %v3628_v51, 0.0  ;;  %v5494_v15 = vadd.f32 %v5493_v6, %v5492_v27  ;;  %v5451_v27 = vld [vmem:[%s6830_s29 + $0xd8] sm:$0xff] }
 0x240   : > { %v6362_v45 = vpop.f32.mrf.mxu0 }
 0x241   : > { %v3629_v34 = vadd.f32 %v8568_v19, %v3606_v7  ;;  %v3647_v8 = vmax.f32 %v3631_v37, 0.0  ;;  %v2803_v41 = vadd.f32 %v6362_v45, %v8503_v57  ;;  %v5444_v57 = vld [vmem:[%s6830_s29 + $0xa0] sm:$0xff]  ;;  %v5445_v45 = vld [vmem:[%s6830_s29 + $0xa8] sm:$0xff] }
 0x242   : > { %v2794_v5 = vpop.f32.mrf.mxu0  ;;  %v5497_v58 = vsel %vm1203_vm7, %v5445_v45, 0.0 }
 0x243   : > { %v3645_v23 = vmax.f32 %v3629_v34, 0.0  ;;  %v3657_v16 = vpack.c.bf16 %v3647_v8, %v3646_v2  ;;  %v2795_v14 = vadd.f32 %v2794_v5, %v8512_v54  ;;  %v5446_v5 = vld [vmem:[%s6830_s29 + $0xb0] sm:$0xff] }
 0x244   : > { %v6363_v42 = vpop.f32.mrf.mxu0  ;;  %v5499_v2 = vsel %vm1203_vm7, %v5446_v5, 0.0  ;;  %v4992_v5 = vpop.permute.xlu1 %4991 }
 0x245   : > { %v3656_v32 = vpack.c.bf16 %v3645_v23, %v3644_v47  ;;  %v2806_v55 = vadd.f32 %v6363_v42, %v8523_v50  ;;  %v5495_v50 = vsel %vm1203_vm7, %v5444_v57, 0.0  ;;  %v4444_v42 = vsel %vm1203_vm7, %v6560_v24, %v7541_v43  ;;  %v5453_v57 = vld [vmem:[%s6830_s29 + $0xe8] sm:$0xff] }
 0x246   : > { %v2797_v3 = vpop.f32.mrf.mxu0  ;;  %v5496_v7 = vadd.f32 %v5495_v50, %v5494_v15  ;;  %v5098_v43 = vsel %vm2587_vm11, %v8598_v22, 0  ;;  %v5528_v50 = vld [vmem:[%s8976_s13] sm:$0x3]  ;;  %v6606_v24 = vld [vmem:[#allocation2 + $0x88] sm:$0xf] }
 0x247   : > { %6392 = vmatprep.mubr.msk.bf16.mxu0 %vm2031_vm12, %v3656_v32  ;;  %v2798_v46 = vadd.f32 %v2797_v3, %v8533_v0  ;;  %v5447_v32 = vld [vmem:[%s6830_s29 + $0xb8] sm:$0xff]  ;;  %v9076_v3 = vmov 0.0  }
 0x248   : > { %v6380_v60 = vpop.f32.mrf.mxu1  ;;  %6393 = vmatmul.mubr.msk.bf16.gmra.mxu0 %vm2031_vm12, %v3657_v16  ;;  %v5498_v23 = vadd.f32 %v5497_v58, %v5496_v7  ;;  %v5501_v16 = vsel %vm1203_vm7, %v5447_v32, 0.0 }
 0x249   : > { %v3588_v26 = vadd.f32 %v6380_v60, %v2803_v41  ;;  %v5503_v60 = vsel %vm1203_vm7, %v5448_v9, 0.0 }
 0x24a   : > { %v3559_v49 = vpop.f32.mrf.mxu1  ;;  %v5500_v4 = vadd.f32 %v5499_v2, %v5498_v23 }
 0x24b   : > { %v3586_v28 = vadd.f32 %v3559_v49, %v2795_v14  ;;  %v3611_v54 = vmul.f32 %v8553_v11, %v3588_v26  ;;  %v5505_v14 = vsel %vm1203_vm7, %v5449_v18, 0.0  ;;  %v5450_v26 = vld [vmem:[%s6830_s29 + $0xd0] sm:$0xff] }
 0x24c   : > { %v6381_v39 = vpop.f32.mrf.mxu1  ;;  %v5502_v41 = vadd.f32 %v5501_v16, %v5500_v4  ;;  %v5507_v22 = vsel %vm1203_vm7, %v5450_v26, 0.0 }
 0x24d   : > { %v3609_v38 = vmul.f32 %v8553_v11, %v3586_v28  ;;  %v3589_v17 = vadd.f32 %v6381_v39, %v2806_v55  ;;  %v3634_v37 = vadd.f32 %v8568_v19, %v3611_v54  ;;  %v5452_v55 = vld [vmem:[%s6830_s29 + $0xe0] sm:$0xff]  ;;  %v5454_v54 = vld [vmem:[%s6830_s29 + $0xf0] sm:$0xff] }
 0x24e   : > { %v3562_v52 = vpop.f32.mrf.mxu1  ;;  %v6567_v28 = vld [vmem:[#allocation2 + $0x60] sm:$0xff]   ;;  %v5511_v39 = vsel %vm1203_vm7, %v5452_v55, 0.0  ;;  %v5515_v15 = vsel %vm1203_vm7, %v5454_v54, 0.0 }
 0x24f   : > { %v3612_v63 = vmul.f32 %v8553_v11, %v3589_v17  ;;  %v3587_v25 = vadd.f32 %v3562_v52, %v2798_v46  ;;  %v3632_v13 = vadd.f32 %v8568_v19, %v3609_v38  ;;  %v3650_v47 = vmax.f32 %v3634_v37, 0.0  ;;  %v6566_v17 = vld [vmem:[#allocation2 + $0x6c] sm:$0xff]  }
 0x250   : > { %v4456_v46 = vsel %vm1203_vm7, %v6567_v28, %v7681_v59  ;;  %v5455_v59 = vld [vmem:[%s6830_s29 + $0xf8] sm:$0xff] }
 0x251   : > { %v3635_v51 = vadd.f32 %v8568_v19, %v3612_v63  ;;  %v3610_v0 = vmul.f32 %v8553_v11, %v3587_v25  ;;  %v3648_v8 = vmax.f32 %v3632_v13, 0.0  ;;  %v4458_v63 = vsel %vm1203_vm7, %v6566_v17, %v7662_v62 }
 0x252   : > { %v5517_v25 = vsel %vm1203_vm7, %v5455_v59, 0.0  ;;  %v5533_v13 = vsel %vm1228_vm4, %v5528_v50, 0 }
 0x253   : > { %v3633_v35 = vadd.f32 %v8568_v19, %v3610_v0  ;;  %v3651_v34 = vmax.f32 %v3635_v51, 0.0  ;;  %v4460_v19 = vsel %vm2031_vm12, %v4444_v42, %v8167_v12  ;;  %v5504_v12 = vadd.f32 %v5503_v60, %v5502_v41  ;;  %v6605_v0 = vld [vmem:[#allocation2 + $0x7c] sm:$0xf] }
 0x255   : > { %v3649_v61 = vmax.f32 %v3633_v35, 0.0  ;;  %v3659_v11 = vpack.c.bf16 %v3651_v34, %v3650_v47  ;;  %v5506_v49 = vadd.f32 %v5505_v14, %v5504_v12  ;;  %v4735_v34 = vld [vmem:[#allocation2 + $0x84] sm:$0xf]  ;;  %v5032_v47 = vpop.permute.xlu1 %5031 }
 0x257   : > { %v3658_v44 = vpack.c.bf16 %v3649_v61, %v3648_v8  ;;  %v6133_v8 = vcombine.low %v4735_v34, %v6606_v24 }
 0x259   : > { %6396 = vmatprep.mubr.msk.bf16.mxu0 %vm2031_vm12, %v3658_v44 }
 0x25a   : > { %6397 = vmatmul.mubr.msk.bf16.gmra.mxu0 %vm2031_vm12, %v3659_v11 }
 0x25b   : > { %6420 = vmatprep.mubr.msk.bf16.mxu0 %vm2570_vm13, %v4460_v19 }
 0x262   : > { %6421 = vmatmul.mubr.msk.bf16.vlgmr.msra.gmra.mxu0 %vm2570_vm13, %v8158_v20  ;;  %v5508_v20 = vadd.f32 %v5507_v22, %v5506_v49 }
 0x263   : > { %6455 = vmatpush3.bf16.msra.mxu0 %v5098_v43  ;;  %6424 = vmatprep.mubr.msk.bf16.mxu0 %vm2570_vm13, %v8197_v53  ;;  %v5509_v53 = vsel %vm1203_vm7, %v5451_v27, 0.0 }
 0x264   : > { %6490 = vmatprep.subr.bf16.mxu0 %v9076_v3  ;;  %v5510_v6 = vadd.f32 %v5509_v53, %v5508_v20 }
 0x266   : > { %v5512_v38 = vadd.f32 %v5511_v39, %v5510_v6 }
 0x26a   : > { %6425 = vmatmul.mubr.msk.bf16.gmra.mxu0 %vm2570_vm13, %v8181_v10  ;;  %v4472_v10 = vsel %vm2031_vm12, %v4456_v46, %v8423_v56  ;;  %v4474_v56 = vsel %vm2031_vm12, %v4458_v63, %v8436_v48  ;;  %v4733_v48 = vld [vmem:[#allocation2 + $0x78] sm:$0xf] }
 0x26b   : > { %6428 = vmatprep.mubr.msk.bf16.mxu0 %vm2570_vm13, %v8217_v31  ;;  %v5513_v31 = vsel %vm1203_vm7, %v5453_v57, 0.0  ;;  %v6132_v37 = vcombine.low %v4733_v48, %v6605_v0 }
 0x26c   : > { %v5514_v52 = vadd.f32 %v5513_v31, %v5512_v38 }
 0x272   : > { %6429 = vmatmul.mubr.msk.bf16.gmra.mxu0 %vm2570_vm13, %v8202_v40  ;;  %v5516_v40 = vadd.f32 %v5515_v15, %v5514_v52 }
 0x273   : > { %6432 = vmatprep.mubr.msk.bf16.mxu0 %vm2570_vm13, %v4472_v10 }
 0x274   : > { %v5518_v45 = vadd.f32 %v5517_v25, %v5516_v40 }
 0x276   : > { %v5519_v62 = vrot.slane %v5518_v45, 4 }
 0x278   : > { %v5520_v51 = vadd.f32 %v5519_v62, %v5518_v45 }
 0x27a   : > { %6433 = vmatmul.mubr.msk.bf16.gmra.mxu0 %vm2570_vm13, %v4474_v56  ;;  %v5521_v7 = vrot.slane %v5520_v51, 2 }
 0x27b   : > { %6456 = vmatprep.mubr.msk.bf16.mxu0 %vm2570_vm13, %v8493_v21  ;;  %v4990_v21 = vpop.permute.xlu0 %4989 }
 0x27c   : > { %v5053_v35 = vsel %vm1203_vm7, %v6132_v37, %v4990_v21  ;;  %v5522_v58 = vadd.f32 %v5521_v7, %v5520_v51 }
 0x27e   : > { %v5523_v61 = vrot.slane %v5522_v58, 1 }
 0x282   : > { %6457 = vmatmul.mubr.msk.bf16.vlgmr.msra.gmra.mxu0 %vm2570_vm13, %v8498_v29  ;;  %v5030_v29 = vpop.permute.xlu0 %5029 }
 0x283   : > { %6460 = vmatprep.mubr.msk.bf16.mxu0 %vm2570_vm13, %v8537_v30  ;;  %6491 = vmatpush3.bf16.msra.mxu0 %v5533_v13  ;;  %v5070_v30 = vsel %vm2031_vm12, %v5053_v35, %v5030_v29 }
 0x28a   : > { %6461 = vmatmul.mubr.msk.bf16.gmra.mxu0 %vm2570_vm13, %v8545_v36  ;;  %v5056_v36 = vsel %vm1203_vm7, %v6133_v8, %v4992_v5 }
 0x28b   : > { %6464 = vmatprep.mubr.msk.bf16.mxu0 %vm2570_vm13, %v8588_v1  ;;  %v5524_v1 = vadd.f32 %v5523_v61, %v5522_v58  ;;  %v5072_v23 = vsel %vm2031_vm12, %v5056_v36, %v5032_v47 }
 0x28d   : > { %v5526_v44 = vmul.f32 0.00390625, %v5524_v1 }
 0x28f   : > { %v5527_v2 = vpack.c.bf16 %v5526_v44, %v5526_v44 }
 0x292   : > { %6465 = vmatmul.mubr.msk.bf16.gmra.mxu0 %vm2570_vm13, %v8601_v33  ;;  %v5283_v33 = vld [vmem:[%s8975_s12] sm:$0xf] }
 0x293   : > { %6468 = vmatprep.mubr.msk.bf16.mxu0 %vm2570_vm13, %v5070_v30  ;;  %6511 = vmatprep.subr.msk.bf16.mxu1 %vm3685_vm14, %v5283_v33  ;;  %v5309_v11 = vsel %vm3685_vm14, %v5283_v33, 0 }
 0x294   : > { %6473 = vmatpush3.bf16.msra.mxu1 %v5309_v11 }
 0x295   : > { %6496 = vmatprep.subr.bf16.mxu1 %v9076_v3 }
 0x29a   : > { %6469 = vmatmul.mubr.msk.bf16.gmra.mxu0 %vm2570_vm13, %v5072_v23 }
 0x29b   : > { %6492 = vmatprep.mubr.msk.bf16.mxu0 %vm6653_vm15, %v9076_v3 }
 0x2a2   : > { %6493 = vmatmul.mubr.msk.bf16.vlgmr.msra.gmra.mxu0 %vm1203_vm7, %v5527_v2 }
 0x2a5   : > { %v6404_v32 = vpop.f32.mrf.mxu1 }
 0x2a7   : > { %v3847_v42 = vpop.f32.mrf.mxu1 }
 0x2a9   : > { %v6405_v16 = vpop.f32.mrf.mxu1 }
 0x2ab   : > { %v3850_v18 = vpop.f32.mrf.mxu1 }
 0x2ad   : > { %v6408_v26 = vpop.f32.mrf.mxu1 }
 0x2af   : > { %v3863_v49 = vpop.f32.mrf.mxu1 }
 0x2b1   : > { %v6409_v20 = vpop.f32.mrf.mxu1 }
 0x2b3   : > { %v3866_v39 = vpop.f32.mrf.mxu1 }
 0x2b5   : > { %v8773_v10 = vpop.f32.mrf.mxu1 }
 0x2b7   : > { %v8775_v38 = vpop.f32.mrf.mxu1 }
 0x2b9   : > { %v8777_v31 = vpop.f32.mrf.mxu1 }
 0x2bb   : > { %v8781_v54 = vpop.f32.mrf.mxu1 }
 0x2c2   : > { %v8785_v15 = vpop.f32.mrf.mxu1 }
 0x2c4   : > { %v8789_v59 = vpop.f32.mrf.mxu1 }
 0x2c6   : > { %v8795_v25 = vpop.f32.mrf.mxu1 }
 0x2c8   : > { %v8801_v13 = vpop.f32.mrf.mxu1 }
 0x2ca   : > { %v6440_v48 = vpop.f32.mrf.mxu1 }
 0x2cc   : > { %v4657_v0 = vpop.f32.mrf.mxu1 }
 0x2ce   : > { %v6441_v35 = vpop.f32.mrf.mxu1 }
 0x2d0   : > { %v4660_v34 = vpop.f32.mrf.mxu1 }
 0x2d2   : > { %v6444_v30 = vpop.f32.mrf.mxu1 }
 0x2d4   : > { %v4673_v61 = vpop.f32.mrf.mxu1 }
 0x2d6   : > { %v6445_v1 = vpop.f32.mrf.mxu1 }
 0x2d8   : > { %v4676_v2 = vpop.f32.mrf.mxu1 }
 0x2e5   : > { %v6386_v19 = vpop.f32.mrf.mxu0 }
 0x2e6   : > { %v8757_v4 = vadd.f32 %v6404_v32, %v6386_v19  ;;  %v6448_v32 = vpop.f32.mrf.mxu1 }
 0x2e7   : > { %v3723_v9 = vpop.f32.mrf.mxu0 }
 0x2e8   : > { %v8759_v41 = vadd.f32 %v3847_v42, %v3723_v9 }
 0x2e9   : > { %v6387_v60 = vpop.f32.mrf.mxu0 }
 0x2ea   : > { %v8761_v43 = vadd.f32 %v6405_v16, %v6387_v60  ;;  %v4689_v60 = vpop.f32.mrf.mxu1 }
 0x2eb   : > { %v3726_v12 = vpop.f32.mrf.mxu0 }
 0x2ec   : > { %v8763_v14 = vadd.f32 %v3850_v18, %v3726_v12 }
 0x2f6   : > { %v6390_v22 = vpop.f32.mrf.mxu0 }
 0x2f7   : > { %v8765_v27 = vadd.f32 %v6408_v26, %v6390_v22 }
 0x2f8   : > { %v3739_v53 = vpop.f32.mrf.mxu0 }
 0x2f9   : > { %v8767_v55 = vadd.f32 %v3863_v49, %v3739_v53  ;;  %v8820_v49 = vld [vmem:[%s8973_s10] ss:$0 sm:$0xff] }
 0x2fa   : > { %v6391_v28 = vpop.f32.mrf.mxu0 }
 0x2fb   : > { %v8769_v6 = vadd.f32 %v6409_v20, %v6391_v28 }
 0x2fc   : > { %v3742_v57 = vpop.f32.mrf.mxu0 }
 0x2fd   : > { %v8771_v46 = vadd.f32 %v3866_v39, %v3742_v57  ;;  %v6449_v57 = vpop.f32.mrf.mxu1 }
 0x2ff   : > { %9236 = vst [vmem:[#allocation9_spill] sm:$0xff] %v8771_v46 }
 0x308   : > { %v8779_v17 = vpop.f32.mrf.mxu0 }
 0x30a   : > { %v8783_v52 = vpop.f32.mrf.mxu0 }
 0x30c   : > { %v8787_v63 = vpop.f32.mrf.mxu0 }
 0x30e   : > { %v8791_v56 = vpop.f32.mrf.mxu0 }
 0x31a   : > { %v8793_v40 = vpop.f32.mrf.mxu0 }
 0x31c   : > { %v8797_v50 = vpop.f32.mrf.mxu0 }
 0x31e   : > { %v8799_v45 = vpop.f32.mrf.mxu0 }
 0x320   : > { %v8803_v62 = vpop.f32.mrf.mxu0 }
 0x322   : > { %v6422_v51 = vpop.f32.mrf.mxu0 }
 0x323   : > { %v4666_v19 = vadd.f32 %v6440_v48, %v6422_v51 }
 0x324   : > { %v4536_v21 = vpop.f32.mrf.mxu0 }
 0x325   : > { %v4658_v9 = vadd.f32 %v4657_v0, %v4536_v21  ;;  %v8827_v21 = vld [vmem:[%s8974_s11] ss:$0 sm:$0xff] }
 0x326   : > { %v6423_v37 = vpop.f32.mrf.mxu0 }
 0x327   : > { %v4669_v26 = vadd.f32 %v6441_v35, %v6423_v37 }
 0x328   : > { %v4539_v7 = vpop.f32.mrf.mxu0 }
 0x329   : > { %v4661_v53 = vadd.f32 %v4660_v34, %v4539_v7 }
 0x32a   : > { %v6426_v29 = vpop.f32.mrf.mxu0 }
 0x32b   : > { %v4682_v35 = vadd.f32 %v6444_v30, %v6426_v29 }
 0x32c   : > { %v4552_v58 = vpop.f32.mrf.mxu0 }
 0x32e   : > { %v6427_v5 = vpop.f32.mrf.mxu0 }
 0x32f   : > { %v4685_v46 = vadd.f32 %v6445_v1, %v6427_v5 }
 0x330   : > { %v4555_v24 = vpop.f32.mrf.mxu0 }
 0x331   : > { %v4677_v29 = vadd.f32 %v4676_v2, %v4555_v24 }
 0x332   : > { %v6430_v8 = vpop.f32.mrf.mxu0 }
 0x334   : > { %v4568_v36 = vpop.f32.mrf.mxu0 }
 0x336   : > { %v8805_v47 = vpop.f32.mrf.mxu0 }
 0x338   : > { %v8807_v23 = vpop.f32.mrf.mxu0 }
 0x33a   : > { %v8809_v44 = vpop.f32.mrf.mxu0 }
 0x33c   : > { %v8811_v33 = vpop.f32.mrf.mxu0 }
 0x33e   : > { %v8813_v11 = vpop.f32.mrf.mxu0 }
 0x340   : > { %v8815_v42 = vpop.f32.mrf.mxu0 }
 0x342   : > { %v6458_v16 = vpop.f32.mrf.mxu0 }
 0x343   : > { %v5199_v18 = vadd.f32 %v6458_v16, %v4666_v19  ;;  %v4674_v16 = vadd.f32 %v4673_v61, %v4552_v58 }
 0x344   : > { %v5134_v12 = vpop.f32.mrf.mxu0 }
 0x345   : > { %v5197_v22 = vadd.f32 %v5134_v12, %v4658_v9  ;;  %v5222_v48 = vmul.f32 %v8820_v49, %v5199_v18  ;;  %v4692_v12 = vpop.f32.mrf.mxu1 }
 0x346   : > { %v6459_v20 = vpop.f32.mrf.mxu0 }
 0x347   : > { %v5220_v28 = vmul.f32 %v8820_v49, %v5197_v22  ;;  %v5200_v39 = vadd.f32 %v6459_v20, %v4669_v26  ;;  %v5245_v18 = vadd.f32 %v8827_v21, %v5222_v48 }
 0x348   : > { %v5137_v51 = vpop.f32.mrf.mxu0 }
 0x349   : > { %v5223_v0 = vmul.f32 %v8820_v49, %v5200_v39  ;;  %v5198_v37 = vadd.f32 %v5137_v51, %v4661_v53  ;;  %v5243_v7 = vadd.f32 %v8827_v21, %v5220_v28  ;;  %v5583_v28 = vld [vmem:[%s8979_s16] sm:$0xf]  ;;  %v6452_v51 = vpop.f32.mrf.mxu1 }
 0x34a   : > { %v6462_v19 = vpop.f32.mrf.mxu0  ;;  %v5588_v2 = vsel %vm3685_vm14, %v5583_v28, 0 }
 0x34b   : > { %v5246_v34 = vadd.f32 %v8827_v21, %v5223_v0  ;;  %v5221_v9 = vmul.f32 %v8820_v49, %v5198_v37  ;;  %v5203_v26 = vadd.f32 %v6462_v19, %v4682_v35  ;;  %v5259_v30 = vmax.f32 %v5243_v7, 0.0 }
 0x34c   : > { %v5150_v22 = vpop.f32.mrf.mxu0  ;;  %v5261_v0 = vmax.f32 %v5245_v18, 0.0  ;;  %v4698_v7 = vadd.f32 %v6448_v32, %v6430_v8  ;;  %v4705_v18 = vpop.f32.mrf.mxu1 }
 0x34d   : > { %v5244_v20 = vadd.f32 %v8827_v21, %v5221_v9  ;;  %v5201_v3 = vadd.f32 %v5150_v22, %v4674_v16  ;;  %v5262_v39 = vmax.f32 %v5246_v34, 0.0  ;;  %v5226_v48 = vmul.f32 %v8820_v49, %v5203_v26 }
 0x34e   : > { %v6463_v53 = vpop.f32.mrf.mxu0 }
 0x34f   : > { %v5260_v58 = vmax.f32 %v5244_v20, 0.0  ;;  %v5224_v61 = vmul.f32 %v8820_v49, %v5201_v3  ;;  %v5204_v37 = vadd.f32 %v6463_v53, %v4685_v46  ;;  %v5276_v5 = vpack.c.bf16 %v5262_v39, %v5261_v0 }
 0x350   : > { %v5153_v35 = vpop.f32.mrf.mxu0  ;;  %v4690_v3 = vadd.f32 %v4689_v60, %v4568_v36  ;;  %v5249_v46 = vadd.f32 %v8827_v21, %v5226_v48  ;;  %v4701_v20 = vadd.f32 %v6449_v57, %v8805_v47 }
 0x351   : > { %v5275_v19 = vpack.c.bf16 %v5260_v58, %v5259_v30  ;;  %v5202_v16 = vadd.f32 %v5153_v35, %v4677_v29  ;;  %v5227_v1 = vmul.f32 %v8820_v49, %v5204_v37  ;;  %v5247_v34 = vadd.f32 %v8827_v21, %v5224_v61  ;;  %v6453_v61 = vpop.f32.mrf.mxu1 }
 0x352   : > { %v6466_v24 = vpop.f32.mrf.mxu0  ;;  %v4693_v58 = vadd.f32 %v4692_v12, %v8807_v23  ;;  %v5265_v28 = vmax.f32 %v5249_v46, 0.0 }
 0x353   : > { %v5225_v9 = vmul.f32 %v8820_v49, %v5202_v16  ;;  %6474 = vmatprep.mubr.msk.bf16.mxu1 %vm2031_vm12, %v5275_v19  ;;  %v5250_v26 = vadd.f32 %v8827_v21, %v5227_v1  ;;  %v5207_v8 = vadd.f32 %v6466_v24, %v4698_v7  ;;  %v5263_v53 = vmax.f32 %v5247_v34, 0.0  ;;  %v4708_v23 = vpop.f32.mrf.mxu1 }
 0x354   : > { %v5166_v22 = vpop.f32.mrf.mxu0  ;;  %6475 = vmatmul.mubr.msk.bf16.vlgmr.msra.gmra.mxu1 %vm2031_vm12, %v5276_v5  ;;  %v4714_v5 = vadd.f32 %v6452_v51, %v8809_v44  ;;  %v4706_v1 = vadd.f32 %v4705_v18, %v8811_v33  ;;  %v4709_v18 = vadd.f32 %v4708_v23, %v8815_v42 }
 0x355   : > { %v5248_v39 = vadd.f32 %v8827_v21, %v5225_v9  ;;  %v5205_v36 = vadd.f32 %v5166_v22, %v4690_v3  ;;  %6497 = vmatpush3.bf16.msra.mxu1 %v5588_v2  ;;  %v5266_v32 = vmax.f32 %v5250_v26, 0.0  ;;  %v5230_v47 = vmul.f32 %v8820_v49, %v5207_v8 }
 0x356   : > { %v6467_v60 = vpop.f32.mrf.mxu0  ;;  %v4717_v3 = vadd.f32 %v6453_v61, %v8813_v11 }
 0x357   : > { %v5264_v29 = vmax.f32 %v5248_v39, 0.0  ;;  %v5208_v30 = vadd.f32 %v6467_v60, %v4701_v20  ;;  %v5228_v0 = vmul.f32 %v8820_v49, %v5205_v36  ;;  %v5278_v35 = vpack.c.bf16 %v5266_v32, %v5265_v28 }
 0x358   : > { %v5169_v48 = vpop.f32.mrf.mxu0  ;;  %v5253_v34 = vadd.f32 %v8827_v21, %v5230_v47 }
 0x359   : > { %v5277_v37 = vpack.c.bf16 %v5264_v29, %v5263_v53  ;;  %v5231_v57 = vmul.f32 %v8820_v49, %v5208_v30  ;;  %v5206_v19 = vadd.f32 %v5169_v48, %v4693_v58  ;;  %v5251_v12 = vadd.f32 %v8827_v21, %v5228_v0  ;;  %v5575_v30 = vld [vmem:[%s8977_s14] sm:$0x1] }
 0x35a   : > { %v6470_v16 = vpop.f32.mrf.mxu0  ;;  %v5269_v36 = vmax.f32 %v5253_v34, 0.0 }
 0x35b   : > { %v5254_v24 = vadd.f32 %v8827_v21, %v5231_v57  ;;  %6478 = vmatprep.mubr.msk.bf16.mxu1 %vm2031_vm12, %v5277_v37  ;;  %v5229_v2 = vmul.f32 %v8820_v49, %v5206_v19  ;;  %v5211_v9 = vadd.f32 %v6470_v16, %v4714_v5  ;;  %v5267_v20 = vmax.f32 %v5251_v12, 0.0  ;;  %v5577_v57 = vld [vmem:[%s8978_s15] sm:$0x1] }
 0x35c   : > { %v5182_v7 = vpop.f32.mrf.mxu0  ;;  %6479 = vmatmul.mubr.msk.bf16.gmra.mxu1 %vm2031_vm12, %v5278_v35 }
 0x35d   : > { %v5209_v44 = vadd.f32 %v5182_v7, %v4706_v1  ;;  %v5252_v33 = vadd.f32 %v8827_v21, %v5229_v2  ;;  %v5270_v46 = vmax.f32 %v5254_v24, 0.0  ;;  %v5234_v32 = vmul.f32 %v8820_v49, %v5211_v9 }
 0x35e   : > { %v6471_v51 = vpop.f32.mrf.mxu0 }
 0x35f   : > { %v5232_v26 = vmul.f32 %v8820_v49, %v5209_v44  ;;  %v5212_v22 = vadd.f32 %v6471_v51, %v4717_v3  ;;  %v5268_v39 = vmax.f32 %v5252_v33, 0.0  ;;  %v5280_v42 = vpack.c.bf16 %v5270_v46, %v5269_v36 }
 0x360   : > { %v5185_v8 = vpop.f32.mrf.mxu0  ;;  %v5257_v48 = vadd.f32 %v8827_v21, %v5234_v32 }
 0x361   : > { %v5235_v11 = vmul.f32 %v8820_v49, %v5212_v22  ;;  %v5210_v60 = vadd.f32 %v5185_v8, %v4709_v18  ;;  %v5279_v53 = vpack.c.bf16 %v5268_v39, %v5267_v20  ;;  %v5255_v58 = vadd.f32 %v8827_v21, %v5232_v26 }
 0x362   : > { %v5569_v29 = vpop.f32.mrf.mxu0  ;;  %v5633_v26 = vlaneseq }
 0x363   : > { %v5258_v61 = vadd.f32 %v8827_v21, %v5235_v11  ;;  %v5233_v28 = vmul.f32 %v8820_v49, %v5210_v60  ;;  %6482 = vmatprep.mubr.msk.bf16.mxu1 %vm2031_vm12, %v5279_v53  ;;  %v5576_v47 = vmul.f32 %v5575_v30, %v5569_v29  ;;  %v5271_v19 = vmax.f32 %v5255_v58, 0.0  ;;  %v5581_v11 = vld [vmem:[%s8980_s17] sm:$0x1] }
 0x364   : > { %v6494_v0 = vpop.f32.mrf.mxu0  ;;  %6483 = vmatmul.mubr.msk.bf16.gmra.mxu1 %vm2031_vm12, %v5280_v42  ;;  %v5273_v49 = vmax.f32 %v5257_v48, 0.0  ;;  %v5634_v39 = vshrl.u32 %v5633_v26, 7  ;;  %v3888_v58 = vadd.f32 %v8773_v10, %v8779_v17  ;;  %v3883_v48 = vadd.f32 %v8781_v54, %v8791_v56 }
 0x365   : > { %v5256_v37 = vadd.f32 %v8827_v21, %v5233_v28  ;;  %v5274_v16 = vmax.f32 %v5258_v61, 0.0  ;;  %v5578_v23 = vadd.f32 %v5577_v57, %v5576_v47  ;;  %v9237_v21 = vmov 0.0  }
 0x366   : > { %v5572_v35 = vpop.f32.mrf.mxu0  ;;  %v5635_v32 = vsub.s32 0, %v5634_v39  ;;  %v3880_v28 = vadd.f32 %v8775_v38, %v8783_v52  ;;  %v3891_v0 = vadd.f32 %v8777_v31, %v8787_v63  ;;  %v3899_v10 = vadd.f32 %v8801_v13, %v8803_v62 }
 0x367   : > { %v5272_v5 = vmax.f32 %v5256_v37, 0.0  ;;  %v5282_v12 = vpack.c.bf16 %v5274_v16, %v5273_v49  ;;  %v5579_v2 = vmax.f32 %v5578_v23, 0.0  ;;  %v3896_v37 = vadd.f32 %v8789_v59, %v8797_v50  ;;  %v9238_v59 = vld [vmem:[#allocation9_spill] sm:$0xff] }
 0x368   : > { %v6495_v1 = vpop.f32.mrf.mxu0  ;;  %v5636_v30 = vrot.slane %v5581_v11, %v5635_v32 }
 0x369   : > { %v5281_v24 = vpack.c.bf16 %v5272_v5, %v5271_v19  ;;  %v5582_v7 = vpack.c.bf16 %v5579_v2, %v5579_v2 }
 0x36b   : > { %6486 = vmatprep.mubr.msk.bf16.mxu1 %vm2031_vm12, %v5281_v24 }
 0x36c   : > { %6487 = vmatmul.mubr.msk.bf16.gmra.mxu1 %vm2031_vm12, %v5282_v12 }
 0x36d   : > { %6498 = vmatprep.mubr.msk.bf16.mxu1 %vm6653_vm15, %v9237_v21 }
 0x374   : > { %6499 = vmatmul.mubr.msk.bf16.vlgmr.msra.gmra.mxu1 %vm2031_vm12, %v5582_v7 }
 0x414   : > { %v6476_v3 = vpop.f32.mrf.mxu1 }
 0x415   : > { %v5410_v53 = vadd.f32 %v6476_v3, %v8757_v4  ;;  %v3904_v4 = vadd.f32 %v8785_v15, %v8793_v40 }
 0x416   : > { %v5345_v34 = vpop.f32.mrf.mxu1 }
 0x417   : > { %v5408_v42 = vadd.f32 %v5345_v34, %v8759_v41  ;;  %v3907_v41 = vadd.f32 %v8795_v25, %v8799_v45  ;;  %v5640_v38 = vmul.f32 %v5636_v30, %v5410_v53  ;;  %v5580_v25 = vld [vmem:[%s9239_s0] sm:$0x1] }
 0x418   : > { %v6477_v9 = vpop.f32.mrf.mxu1 }
 0x419   : > { %v5411_v52 = vadd.f32 %v6477_v9, %v8761_v43  ;;  %v5638_v63 = vmul.f32 %v5636_v30, %v5408_v42 }
 0x41a   : > { %v5348_v44 = vpop.f32.mrf.mxu1 }
 0x41b   : > { %v5409_v31 = vadd.f32 %v5348_v44, %v8763_v14 }
 0x41c   : > { %v6480_v33 = vpop.f32.mrf.mxu1 }
 0x41d   : > { %v5414_v54 = vadd.f32 %v6480_v33, %v8765_v27  ;;  %v5639_v16 = vmul.f32 %v5636_v30, %v5409_v31 }
 0x41e   : > { %v5361_v51 = vpop.f32.mrf.mxu1 }
 0x41f   : > { %v5412_v15 = vadd.f32 %v5361_v51, %v8767_v55  ;;  %v5644_v5 = vmul.f32 %v5636_v30, %v5414_v54 }
 0x420   : > { %v6481_v18 = vpop.f32.mrf.mxu1 }
 0x421   : > { %v5415_v56 = vadd.f32 %v6481_v18, %v8769_v6  ;;  %v5641_v6 = vmul.f32 %v5636_v30, %v5411_v52  ;;  %v5642_v1 = vmul.f32 %v5636_v30, %v5412_v15 }
 0x422   : > { %v5364_v46 = vpop.f32.mrf.mxu1 }
 0x423   : > { %v5413_v40 = vadd.f32 %v5364_v46, %v9238_v59  ;;  %v5645_v24 = vmul.f32 %v5636_v30, %v5415_v56 }
 0x424   : > { %v6484_v22 = vpop.f32.mrf.mxu1 }
 0x425   : > { %v5418_v50 = vadd.f32 %v6484_v22, %v3888_v58  ;;  %v5643_v49 = vmul.f32 %v5636_v30, %v5413_v40 }
 0x426   : > { %v5377_v20 = vpop.f32.mrf.mxu1 }
 0x427   : > { %v5416_v13 = vadd.f32 %v5377_v20, %v3880_v28  ;;  %v5648_v23 = vmul.f32 %v5636_v30, %v5418_v50 }
 0x428   : > { %v6485_v8 = vpop.f32.mrf.mxu1 }
 0x429   : > { %v5419_v62 = vadd.f32 %v6485_v8, %v3891_v0  ;;  %v5646_v2 = vmul.f32 %v5636_v30, %v5416_v13 }
 0x42a   : > { %v5380_v36 = vpop.f32.mrf.mxu1 }
 0x42b   : > { %v5417_v43 = vadd.f32 %v5380_v36, %v3883_v48  ;;  %v5649_v7 = vmul.f32 %v5636_v30, %v5419_v62 }
 0x42c   : > { %v6488_v60 = vpop.f32.mrf.mxu1 }
 0x42d   : > { %v5422_v14 = vadd.f32 %v6488_v60, %v3904_v4  ;;  %v5647_v21 = vmul.f32 %v5636_v30, %v5417_v43 }
 0x42e   : > { %v5393_v29 = vpop.f32.mrf.mxu1 }
 0x42f   : > { %v5420_v57 = vadd.f32 %v5393_v29, %v3896_v37  ;;  %v5652_v44 = vmul.f32 %v5636_v30, %v5422_v14 }
 0x430   : > { %v6489_v61 = vpop.f32.mrf.mxu1 }
 0x431   : > { %v5423_v27 = vadd.f32 %v6489_v61, %v3907_v41  ;;  %v5650_v34 = vmul.f32 %v5636_v30, %v5420_v57 }
 0x432   : > { %v5396_v17 = vpop.f32.mrf.mxu1 }
 0x433   : > { %v5421_v35 = vadd.f32 %v5396_v17, %v3899_v10  ;;  %v5653_v33 = vmul.f32 %v5636_v30, %v5423_v27 }
 0x434   : > { %v5624_v45 = vpop.f32.mrf.mxu1 }
 0x435   : > { %v5630_v47 = vmul.f32 %v5624_v45, %v5581_v11  ;;  %v5651_v9 = vmul.f32 %v5636_v30, %v5421_v35 }
 0x436   : > { %v6500_v19 = vpop.f32.mrf.mxu1 }
 0x437   : > { %v5631_v55 = vadd.f32 %v5630_v47, %v5580_v25 }
 0x438   : > { %v5627_v12 = vpop.f32.mrf.mxu1 }
 0x439   : > { %v5658_v3 = vrot.slane %v5631_v55, %v5635_v32 }
 0x43a   : > { %v6501_v51 = vpop.f32.mrf.mxu1 }
 0x43b   : > { %v5660_v18 = vadd.f32 %v5658_v3, %v5638_v63  ;;  %v5661_v46 = vadd.f32 %v5658_v3, %v5639_v16  ;;  %v5662_v26 = vadd.f32 %v5658_v3, %v5640_v38  ;;  %v5663_v22 = vadd.f32 %v5658_v3, %v5641_v6 }
 0x43c   : > { %v5664_v20 = vadd.f32 %v5658_v3, %v5642_v1  ;;  %v5665_v39 = vadd.f32 %v5658_v3, %v5643_v49  ;;  %v5666_v8 = vadd.f32 %v5658_v3, %v5644_v5  ;;  %v5667_v36 = vadd.f32 %v5658_v3, %v5645_v24 }
 0x43d   : > { %v5668_v11 = vadd.f32 %v5658_v3, %v5646_v2  ;;  %v5669_v60 = vadd.f32 %v5658_v3, %v5647_v21  ;;  %v5670_v53 = vadd.f32 %v5658_v3, %v5648_v23  ;;  %v5671_v29 = vadd.f32 %v5658_v3, %v5649_v7 }
 0x43e   : > { %v5672_v42 = vadd.f32 %v5658_v3, %v5650_v34  ;;  %v5673_v32 = vadd.f32 %v5658_v3, %v5651_v9  ;;  %v5674_v58 = vadd.f32 %v5658_v3, %v5652_v44  ;;  %v5675_v30 = vadd.f32 %v5658_v3, %v5653_v33 }
 0x43f   : > { %v5676_v61 = vmax.f32 %v5660_v18, 0.0  ;;  %v5677_v28 = vmax.f32 %v5661_v46, 0.0  ;;  %v5678_v0 = vmax.f32 %v5662_v26, 0.0  ;;  %v5679_v48 = vmax.f32 %v5663_v22, 0.0 }
 0x440   : > { %v5680_v4 = vmax.f32 %v5664_v20, 0.0  ;;  %v5681_v37 = vmax.f32 %v5665_v39, 0.0  ;;  %v5682_v41 = vmax.f32 %v5666_v8, 0.0  ;;  %v5683_v10 = vmax.f32 %v5667_v36, 0.0 }
 0x441   : > { %v5684_v17 = vmax.f32 %v5668_v11, 0.0  ;;  %v5685_v38 = vmax.f32 %v5669_v60, 0.0  ;;  %v5686_v52 = vmax.f32 %v5670_v53, 0.0  ;;  %v5687_v31 = vmax.f32 %v5671_v29, 0.0  ;;  %5692 = vst.msk [vmem:[%s6835_s18] sm:$0xff] %vm2031_vm12, %v5676_v61  ;;  %5693 = vst.msk [vmem:[%s6835_s18 + $0x8] sm:$0xff] %vm2031_vm12, %v5677_v28 }
 0x442   : > { %5694 = vst.msk [vmem:[%s6835_s18 + $0x10] sm:$0xff] %vm2031_vm12, %v5678_v0  ;;  %5695 = vst.msk [vmem:[%s6835_s18 + $0x18] sm:$0xff] %vm2031_vm12, %v5679_v48  ;;  %v5688_v54 = vmax.f32 %v5672_v42, 0.0  ;;  %v5689_v63 = vmax.f32 %v5673_v32, 0.0  ;;  %v5690_v15 = vmax.f32 %v5674_v58, 0.0  ;;  %v5691_v56 = vmax.f32 %v5675_v30, 0.0 }
 0x443   : > { %5696 = vst.msk [vmem:[%s6835_s18 + $0x20] sm:$0xff] %vm2031_vm12, %v5680_v4  ;;  %5697 = vst.msk [vmem:[%s6835_s18 + $0x28] sm:$0xff] %vm2031_vm12, %v5681_v37 }
 0x444   : > { %5698 = vst.msk [vmem:[%s6835_s18 + $0x30] sm:$0xff] %vm2031_vm12, %v5682_v41  ;;  %5699 = vst.msk [vmem:[%s6835_s18 + $0x38] sm:$0xff] %vm2031_vm12, %v5683_v10 }
 0x445   : > { %5700 = vst.msk [vmem:[%s6835_s18 + $0x40] sm:$0xff] %vm2031_vm12, %v5684_v17  ;;  %5701 = vst.msk [vmem:[%s6835_s18 + $0x48] sm:$0xff] %vm2031_vm12, %v5685_v38 }
 0x446   : > { %5702 = vst.msk [vmem:[%s6835_s18 + $0x50] sm:$0xff] %vm2031_vm12, %v5686_v52  ;;  %5703 = vst.msk [vmem:[%s6835_s18 + $0x58] sm:$0xff] %vm2031_vm12, %v5687_v31 }
 0x447   : > { %5704 = vst.msk [vmem:[%s6835_s18 + $0x60] sm:$0xff] %vm2031_vm12, %v5688_v54  ;;  %5705 = vst.msk [vmem:[%s6835_s18 + $0x68] sm:$0xff] %vm2031_vm12, %v5689_v63 }
 0x448   : > { %5706 = vst.msk [vmem:[%s6835_s18 + $0x70] sm:$0xff] %vm2031_vm12, %v5690_v15  ;;  %5707 = vst.msk [vmem:[%s6835_s18 + $0x78] sm:$0xff] %vm2031_vm12, %v5691_v56 }
 0x449 PF: > { %s9240_s23 = sld [smem:[#allocation5_spill]] }
 0x44a   : > { %s9241_s0 = sld [smem:[#allocation3_spill]] }
 0x44b   : > { %s9242_s30 = sld [smem:[#allocation4_spill]] }
 0x44c   : > { %s9243_s20 = sld [smem:[#allocation6_spill]] }
 0x44d   : > { %s9244_s21 = sld [smem:[#allocation7_spill]] }
 0x44f   : > { %s29_s1 = sadd.s32 1, %s9240_s23  }
 0x450   : > { %p26_p9 = scmp.ge.s32.totalorder %s29_s1, 6  }
 0x452   :  { %28 = sbr.rel (!%p26_p9) target bundleno = 6 (0x6), region = 145 }

</bundles_post_ra>
